<compile_context>
chip_gen: v7x
topology: tpu7x:2x2x1
jax: 0.10.0
libtpu: 0.0.40
codegen_flags: <defaults>
</compile_context>

<pallas_src>
import math
from functools import partial

import jax
import jax.numpy as jnp
from jax import lax
from jax.experimental import pallas as pl
from jax.experimental.pallas import tpu as pltpu


def _round_up(x, m):
    return ((x + m - 1) // m) * m


def _default_row_tile():
    # v5e/v6e (128 MiB VMEM): 256-row tiles amortize the ~0.35 us per-grid-step
    # overhead. v7x (64 MiB per TC): keep the per-step working set small.
    try:
        if pltpu.get_tpu_info().vmem_capacity_bytes <= (64 << 20):
            return 128
        return 256
    except Exception:
        return 128


# ---------------------------------------------------------------------------
# top-k path: row-tiled, resident [Np, Dp] table, iterative arg-max selection.
# ---------------------------------------------------------------------------
def _topk_kernel(e_row_ref, e_all_ref, o_ref, *, top_k, n_valid, unroll):
    e_row = e_row_ref[...]                              # [tm, Dp] f32
    e_all = e_all_ref[...]                              # [Np, Dp] f32 (resident)

    # sim[i, j] = <e_row[i], e_all[j]>; contract the shared last dim on the MXU
    # directly (no materialized transpose).
    # TODO(synk): confirm via pl.lower_as_mlir that this NT dot does not emit a
    # per-step XLU transpose of the RHS; if it does, pass E^T from the wrapper.
    sim = lax.dot_general(
        e_row, e_all,
        dimension_numbers=(((1,), (1,)), ((), ())),
        preferred_element_type=jnp.float32)             # [tm, Np]

    tm, n_pad = sim.shape
    col_ids = lax.broadcasted_iota(jnp.int32, (1, n_pad), 1)   # [1, Np]
    col_valid = col_ids < n_valid
    neg_inf = jnp.float32(-jnp.inf)

    # Padded (all-zero) columns must never be selected by top-k.
    work0 = jnp.where(col_valid, sim, neg_inf)
    sumsq0 = jnp.zeros((tm, 1), jnp.float32)

    # Carry only (work, sumsq); selected positions are reconstructed after the
    # loop from `work == -inf`, removing one [tm, Np] carry + select per iter.
    def body(_, carry):
        work, sumsq = carry
        row_max = jnp.max(work, axis=-1, keepdims=True)          # [tm, 1]
        is_max = work == row_max
        # first (lowest-index) occurrence of the row max
        first_idx = jnp.min(
            jnp.where(is_max, col_ids, jnp.int32(n_pad)),
            axis=-1, keepdims=True)                              # [tm, 1]
        work = jnp.where(col_ids == first_idx, neg_inf, work)
        # Exactly one element (== row_max, finite since top_k <= n_valid) is
        # removed per row: accumulate the row norm here instead of a post-loop
        # [tm, Np] multiply + cross-lane reduction.
        sumsq = sumsq + row_max * row_max
        return work, sumsq

    work, sumsq = lax.fori_loop(0, top_k, body, (work0, sumsq0), unroll=unroll)

    # Selected entries are exactly the valid columns knocked down to -inf.
    adj = jnp.where((work == neg_inf) & col_valid, sim, jnp.float32(0.0))

    # torch.nn.functional.normalize(p=2, dim=-1): x / max(||x||_2, 1e-12).
    # Narrow [tm, 1] sqrt + reciprocal are cheap; the wide op is a multiply.
    inv_norm = 1.0 / jnp.maximum(jnp.sqrt(sumsq), jnp.float32(1e-12))
    o_ref[...] = adj * inv_norm


# ---------------------------------------------------------------------------
# dense (no top-k) path: column-tiled so the per-step VMEM does not scale
# with N. Row norms are precomputed in the wrapper via G = E^T E.
# ---------------------------------------------------------------------------
def _dense_kernel(inv_ref, e_row_ref, e_col_ref, o_ref):
    sim = lax.dot_general(
        e_row_ref[...], e_col_ref[...],
        dimension_numbers=(((1,), (1,)), ((), ())),
        preferred_element_type=jnp.float32)             # [tm, tn]
    o_ref[...] = sim * inv_ref[...]                     # [tm, 1] broadcast


def _dense_call(e, n_pad, d_pad, tm, tn):
    if n_pad % tn:
        tn = 128   # n_pad is always a multiple of 128

    # Row L2-norms without touching full rows: sumsq_i = e_i^T (E^T E) e_i.
    g = e.T @ e                                              # [Dp, Dp], once
    sumsq = jnp.sum((e @ g) * e, axis=-1, keepdims=True)     # [Np, 1]
    inv_norm = 1.0 / jnp.maximum(
        jnp.sqrt(jnp.maximum(sumsq, 0.0)), jnp.float32(1e-12))

    vmem_limit = int(min(max(
        2 * 4 * (tm * tn + tm * d_pad + tn * d_pad + tm)     # double-buffered IO
        + tm * tn * 4 + (4 << 20),                           # temps + slack
        32 << 20), 64 << 20))

    return pl.pallas_call(
        _dense_kernel,
        out_shape=jax.ShapeDtypeStruct((n_pad, n_pad), jnp.float32),
        grid=(n_pad // tm, n_pad // tn),
        in_specs=[
            pl.BlockSpec((tm, 1), lambda i, j: (i, 0)),       # inv_norm rows
            pl.BlockSpec((tm, d_pad), lambda i, j: (i, 0)),   # E row tile
            pl.BlockSpec((tn, d_pad), lambda i, j: (j, 0)),   # E col tile
        ],
        out_specs=pl.BlockSpec((tm, tn), lambda i, j: (i, j)),
        compiler_params=pltpu.CompilerParams(
            dimension_semantics=("parallel", "parallel"),
            vmem_limit_bytes=vmem_limit),
    )(inv_norm, e, e)


def _topk_call(e, n, n_pad, d_pad, tm, top_k):
    # Full unroll only while the per-iteration [tm, Np] temps stay small;
    # beyond that, partial unroll keeps LLO visibility at bounded footprint.
    iter_bytes = tm * n_pad * 4
    unroll = True if top_k * iter_bytes <= (2 << 20) else min(4, top_k)

    kernel = partial(_topk_kernel, top_k=top_k, n_valid=n, unroll=unroll)

    def run(single_buffer_table):
        table_bufs = 1 if single_buffer_table else 2
        vmem_limit = int(min(max(
            2 * tm * n_pad * 4                  # output (double-buffered)
            + table_bufs * n_pad * d_pad * 4    # resident table
            + 2 * tm * d_pad * 4                # row tile (double-buffered)
            + 4 * tm * n_pad * 4                # sim/work/mask temps
            + (4 << 20),                        # slack
            32 << 20), 64 << 20))

        if single_buffer_table:
            # Constant index_map -> the block never changes; single-buffer it
            # to halve the table's VMEM footprint (no prefetch needed).
            table_spec = pl.BlockSpec((n_pad, d_pad), lambda i: (0, 0),
                                      pipeline_mode=pl.Buffered(1))
        else:
            table_spec = pl.BlockSpec((n_pad, d_pad), lambda i: (0, 0))

        return pl.pallas_call(
            kernel,
            out_shape=jax.ShapeDtypeStruct((n_pad, n_pad), jnp.float32),
            grid=(n_pad // tm,),
            in_specs=[
                pl.BlockSpec((tm, d_pad), lambda i: (i, 0)),   # E row tile
                table_spec,                                    # E resident (RHS)
            ],
            out_specs=pl.BlockSpec((tm, n_pad), lambda i: (i, 0)),
            compiler_params=pltpu.CompilerParams(
                dimension_semantics=("parallel",),
                vmem_limit_bytes=vmem_limit),
        )(e, e)

    try:
        return run(True)
    except Exception:
        # pipeline_mode=pl.Buffered(1) not supported on this jax build: fall
        # back to the default double-buffered resident table.
        return run(False)


def graph_learner_forward(embedding_weight, top_k=None, *,
                          row_tile=None, col_tile=512):
    n, d = embedding_weight.shape

    # torch does `if self.top_k:` (0 / None are falsy); clamp top_k to N so
    # later iterations never see an all -inf row.
    top_k_eff = min(int(top_k), n) if (top_k is not None and top_k > 0) else None

    # Pad BOTH axes to multiples of 128:
    #  - node axis: lane-dense, unmasked output stores + exact grid decomposition
    #  - D axis: MXU contraction / lane axis of both operands (D=32 would leave
    #    lanes 3/4 empty). Zero padding is exact.
    # TODO(synk): optionally hold E in bf16 for the MXU (f32 accumulate) — it
    # would break strict 1e-5 parity with the f32 reference, so it is off here.
    n_pad = _round_up(n, 128)
    d_pad = _round_up(d, 128)
    e = embedding_weight.astype(jnp.float32)
    if (n_pad, d_pad) != (n, d):
        e = jnp.pad(e, ((0, n_pad - n), (0, d_pad - d)))

    if row_tile is None:
        row_tile = _default_row_tile()
    tm = min(row_tile, n_pad)
    if n_pad % tm:
        tm = 128   # n_pad is always a multiple of 128

    if top_k_eff is None:
        out = _dense_call(e, n_pad, d_pad, tm, min(col_tile, n_pad))
    else:
        out = _topk_call(e, n, n_pad, d_pad, tm, top_k_eff)

    # TODO(synk): this slice re-reads/writes ~N^2*4 bytes in a separate XLA op;
    # skip it if the consumer accepts the zero-padded [n_pad, n_pad] layout.
    if n_pad != n:
        out = out[:n, :n]
    return out


def init_embedding_weight(key, num_nodes, num_embeddings):
    # torch.nn.init.kaiming_uniform_(w, a=sqrt(5)) on a [N, D] weight:
    #   fan_in = D, gain = sqrt(2 / (1 + a^2)) = sqrt(1/3)
    #   bound = gain * sqrt(3 / fan_in) = 1 / sqrt(fan_in)
    fan_in = num_embeddings
    bound = 1.0 / math.sqrt(fan_in)
    return jax.random.uniform(
        key, (num_nodes, num_embeddings), dtype=jnp.float32,
        minval=-bound, maxval=bound)


def graph_learner_reference(w, top_k=None):
    """Pure-JAX reference mirroring the PyTorch forward."""
    sim = w @ w.T
    if top_k:
        vals, idx = lax.top_k(sim, top_k)
        rows = jnp.arange(sim.shape[0])[:, None]
        adj = jnp.zeros_like(sim).at[rows, idx].set(vals)
    else:
        adj = sim
    norm = jnp.sqrt(jnp.sum(adj * adj, axis=-1, keepdims=True))
    return adj / jnp.maximum(norm, 1e-12)


if __name__ == "__main__":
    num_nodes = 16
    num_embeddings = 32
    top_k = 4

    key = jax.random.PRNGKey(0)
    weight = init_embedding_weight(key, num_nodes, num_embeddings)

    # top-k path
    adj = jax.block_until_ready(graph_learner_forward(weight, top_k=top_k))
    ref = graph_learner_reference(weight, top_k=top_k)

    assert adj.shape == (num_nodes, num_nodes)
    assert bool(jnp.all(jnp.isfinite(adj)))
    nnz = jnp.sum(adj != 0.0, axis=-1)
    assert bool(jnp.all(nnz == top_k))
    row_norms = jnp.sqrt(jnp.sum(adj * adj, axis=-1))
    assert bool(jnp.all(jnp.abs(row_norms - 1.0) < 1e-5))
    assert bool(jnp.max(jnp.abs(adj - ref)) < 1e-5)

    # dense (no top-k) path
    adj_full = jax.block_until_ready(graph_learner_forward(weight, top_k=None))
    ref_full = graph_learner_reference(weight, top_k=None)
    assert adj_full.shape == (num_nodes, num_nodes)
    assert bool(jnp.max(jnp.abs(adj_full - ref_full)) < 1e-5)

    print("KERNEL_OK")
</pallas_src>

<mosaic_0001>
module attributes {stable_mosaic.version = 11 : i64} {
  func.func @_topk_kernel(%arg0: i32, %arg1: memref<128x128xf32, #tpu.memory_space<vmem>>, %arg2: memref<128x128xf32, #tpu.memory_space<vmem>>, %arg3: memref<128x128xf32, #tpu.memory_space<vmem>>) attributes {dimension_semantics = [#tpu.dimension_semantics<parallel>], iteration_bounds = array<i64: 1>, scalar_prefetch = 0 : i64, scratch_operands = 0 : i64, tpu.core_type = #tpu.core_type<tc>, window_params = [{transform_indices = @transform_0, window_bounds = array<i64: 128, 128>}, {pipeline_mode = #tpu.pipeline_mode<synchronous>, transform_indices = @transform_1, window_bounds = array<i64: 128, 128>}, {transform_indices = @transform_2, window_bounds = array<i64: 128, 128>}]} {
    %c0 = arith.constant 0 : index
    %c0_0 = arith.constant 0 : index
    %0 = vector.load %arg1[%c0, %c0_0] : memref<128x128xf32, #tpu.memory_space<vmem>>, vector<128x128xf32>
    %c0_1 = arith.constant 0 : index
    %c0_2 = arith.constant 0 : index
    %1 = vector.load %arg2[%c0_1, %c0_2] : memref<128x128xf32, #tpu.memory_space<vmem>>, vector<128x128xf32>
    %cst = arith.constant dense<0.000000e+00> : vector<128x128xf32>
    %2 = tpu.matmul %0, %1, %cst {dimension_numbers = #tpu.dot_dimension_numbers<[1], [1], [0], [0], [0, 0, 1, 0], [], []>} : vector<128x128xf32>, vector<128x128xf32>, vector<128x128xf32> -> vector<128x128xf32>
    %3 = tpu.iota {dimensions = array<i32: 1>} : vector<1x128xi32>
    %c16_i32 = arith.constant 16 : i32
    %4 = vector.broadcast %c16_i32 : i32 to vector<1x128xi32>
    %5 = arith.cmpi slt, %3, %4 : vector<1x128xi32>
    %cst_3 = arith.constant 0xFF800000 : f32
    %6 = vector.shape_cast %5 : vector<1x128xi1> to vector<1x128xi1>
    %7 = vector.broadcast %6 : vector<1x128xi1> to vector<128x128xi1>
    %8 = vector.broadcast %cst_3 : f32 to vector<128x128xf32>
    %9 = arith.select %7, %2, %8 : vector<128x128xi1>, vector<128x128xf32>
    %cst_4 = arith.constant 0.000000e+00 : f32
    %10 = vector.broadcast %cst_4 : f32 to vector<128x1xf32>
    %cst_5 = arith.constant 0xFF800000 : f32
    %c0_i32 = arith.constant 0 : i32
    %cst_6 = arith.constant dense<0xFF800000> : vector<128xf32>
    %11 = vector.multi_reduction <maximumf>, %9, %cst_6 [1] : vector<128x128xf32> to vector<128xf32>
    %12 = vector.shape_cast %11 : vector<128xf32> to vector<128x1xf32>
    %13 = vector.broadcast %12 : vector<128x1xf32> to vector<128x128xf32>
    %14 = arith.cmpf oeq, %9, %13 : vector<128x128xf32>
    %c128_i32 = arith.constant 128 : i32
    %15 = vector.shape_cast %3 : vector<1x128xi32> to vector<1x128xi32>
    %16 = vector.broadcast %15 : vector<1x128xi32> to vector<128x128xi32>
    %17 = vector.broadcast %c128_i32 : i32 to vector<128x128xi32>
    %18 = arith.select %14, %16, %17 : vector<128x128xi1>, vector<128x128xi32>
    %cst_7 = arith.constant dense<2147483647> : vector<128xi32>
    %19 = vector.multi_reduction <minsi>, %18, %cst_7 [1] : vector<128x128xi32> to vector<128xi32>
    %20 = vector.shape_cast %19 : vector<128xi32> to vector<128x1xi32>
    %21 = vector.broadcast %3 : vector<1x128xi32> to vector<128x128xi32>
    %22 = vector.broadcast %20 : vector<128x1xi32> to vector<128x128xi32>
    %23 = arith.cmpi eq, %21, %22 : vector<128x128xi32>
    %24 = vector.broadcast %cst_5 : f32 to vector<128x128xf32>
    %25 = arith.select %23, %24, %9 : vector<128x128xi1>, vector<128x128xf32>
    %26 = arith.mulf %12, %12 : vector<128x1xf32>
    %27 = arith.addf %10, %26 : vector<128x1xf32>
    %c1_i32 = arith.constant 1 : i32
    %cst_8 = arith.constant dense<0xFF800000> : vector<128xf32>
    %28 = vector.multi_reduction <maximumf>, %25, %cst_8 [1] : vector<128x128xf32> to vector<128xf32>
    %29 = vector.shape_cast %28 : vector<128xf32> to vector<128x1xf32>
    %30 = vector.broadcast %29 : vector<128x1xf32> to vector<128x128xf32>
    %31 = arith.cmpf oeq, %25, %30 : vector<128x128xf32>
    %c128_i32_9 = arith.constant 128 : i32
    %32 = vector.shape_cast %3 : vector<1x128xi32> to vector<1x128xi32>
    %33 = vector.broadcast %32 : vector<1x128xi32> to vector<128x128xi32>
    %34 = vector.broadcast %c128_i32_9 : i32 to vector<128x128xi32>
    %35 = arith.select %31, %33, %34 : vector<128x128xi1>, vector<128x128xi32>
    %cst_10 = arith.constant dense<2147483647> : vector<128xi32>
    %36 = vector.multi_reduction <minsi>, %35, %cst_10 [1] : vector<128x128xi32> to vector<128xi32>
    %37 = vector.shape_cast %36 : vector<128xi32> to vector<128x1xi32>
    %38 = vector.broadcast %3 : vector<1x128xi32> to vector<128x128xi32>
    %39 = vector.broadcast %37 : vector<128x1xi32> to vector<128x128xi32>
    %40 = arith.cmpi eq, %38, %39 : vector<128x128xi32>
    %41 = vector.broadcast %cst_5 : f32 to vector<128x128xf32>
    %42 = arith.select %40, %41, %25 : vector<128x128xi1>, vector<128x128xf32>
    %43 = arith.mulf %29, %29 : vector<128x1xf32>
    %44 = arith.addf %27, %43 : vector<128x1xf32>
    %c2_i32 = arith.constant 2 : i32
    %cst_11 = arith.constant dense<0xFF800000> : vector<128xf32>
    %45 = vector.multi_reduction <maximumf>, %42, %cst_11 [1] : vector<128x128xf32> to vector<128xf32>
    %46 = vector.shape_cast %45 : vector<128xf32> to vector<128x1xf32>
    %47 = vector.broadcast %46 : vector<128x1xf32> to vector<128x128xf32>
    %48 = arith.cmpf oeq, %42, %47 : vector<128x128xf32>
    %c128_i32_12 = arith.constant 128 : i32
    %49 = vector.shape_cast %3 : vector<1x128xi32> to vector<1x128xi32>
    %50 = vector.broadcast %49 : vector<1x128xi32> to vector<128x128xi32>
    %51 = vector.broadcast %c128_i32_12 : i32 to vector<128x128xi32>
    %52 = arith.select %48, %50, %51 : vector<128x128xi1>, vector<128x128xi32>
    %cst_13 = arith.constant dense<2147483647> : vector<128xi32>
    %53 = vector.multi_reduction <minsi>, %52, %cst_13 [1] : vector<128x128xi32> to vector<128xi32>
    %54 = vector.shape_cast %53 : vector<128xi32> to vector<128x1xi32>
    %55 = vector.broadcast %3 : vector<1x128xi32> to vector<128x128xi32>
    %56 = vector.broadcast %54 : vector<128x1xi32> to vector<128x128xi32>
    %57 = arith.cmpi eq, %55, %56 : vector<128x128xi32>
    %58 = vector.broadcast %cst_5 : f32 to vector<128x128xf32>
    %59 = arith.select %57, %58, %42 : vector<128x128xi1>, vector<128x128xf32>
    %60 = arith.mulf %46, %46 : vector<128x1xf32>
    %61 = arith.addf %44, %60 : vector<128x1xf32>
    %c3_i32 = arith.constant 3 : i32
    %cst_14 = arith.constant dense<0xFF800000> : vector<128xf32>
    %62 = vector.multi_reduction <maximumf>, %59, %cst_14 [1] : vector<128x128xf32> to vector<128xf32>
    %63 = vector.shape_cast %62 : vector<128xf32> to vector<128x1xf32>
    %64 = vector.broadcast %63 : vector<128x1xf32> to vector<128x128xf32>
    %65 = arith.cmpf oeq, %59, %64 : vector<128x128xf32>
    %c128_i32_15 = arith.constant 128 : i32
    %66 = vector.shape_cast %3 : vector<1x128xi32> to vector<1x128xi32>
    %67 = vector.broadcast %66 : vector<1x128xi32> to vector<128x128xi32>
    %68 = vector.broadcast %c128_i32_15 : i32 to vector<128x128xi32>
    %69 = arith.select %65, %67, %68 : vector<128x128xi1>, vector<128x128xi32>
    %cst_16 = arith.constant dense<2147483647> : vector<128xi32>
    %70 = vector.multi_reduction <minsi>, %69, %cst_16 [1] : vector<128x128xi32> to vector<128xi32>
    %71 = vector.shape_cast %70 : vector<128xi32> to vector<128x1xi32>
    %72 = vector.broadcast %3 : vector<1x128xi32> to vector<128x128xi32>
    %73 = vector.broadcast %71 : vector<128x1xi32> to vector<128x128xi32>
    %74 = arith.cmpi eq, %72, %73 : vector<128x128xi32>
    %75 = vector.broadcast %cst_5 : f32 to vector<128x128xf32>
    %76 = arith.select %74, %75, %59 : vector<128x128xi1>, vector<128x128xf32>
    %77 = arith.mulf %63, %63 : vector<128x1xf32>
    %78 = arith.addf %61, %77 : vector<128x1xf32>
    %cst_17 = arith.constant 0xFF800000 : f32
    %79 = vector.broadcast %cst_17 : f32 to vector<128x128xf32>
    %80 = arith.cmpf oeq, %76, %79 : vector<128x128xf32>
    %81 = vector.broadcast %5 : vector<1x128xi1> to vector<128x128xi1>
    %82 = arith.andi %80, %81 : vector<128x128xi1>
    %cst_18 = arith.constant 0.000000e+00 : f32
    %83 = vector.broadcast %cst_18 : f32 to vector<128x128xf32>
    %84 = arith.select %82, %2, %83 : vector<128x128xi1>, vector<128x128xf32>
    %85 = math.sqrt %78 : vector<128x1xf32>
    %cst_19 = arith.constant 9.99999996E-13 : f32
    %86 = vector.broadcast %cst_19 : f32 to vector<128x1xf32>
    %87 = arith.maximumf %85, %86 : vector<128x1xf32>
    %cst_20 = arith.constant 1.000000e+00 : f32
    %88 = vector.broadcast %cst_20 : f32 to vector<128x1xf32>
    %89 = arith.divf %88, %87 : vector<128x1xf32>
    %90 = vector.broadcast %89 : vector<128x1xf32> to vector<128x128xf32>
    %91 = arith.mulf %84, %90 : vector<128x128xf32>
    %c0_21 = arith.constant 0 : index
    %c0_22 = arith.constant 0 : index
    %92 = vector.load %arg3[%c0_21, %c0_22] : memref<128x128xf32, #tpu.memory_space<vmem>>, vector<128x128xf32>
    tpu.vector_store %arg3[%c0_21, %c0_22], %91 {strides = array<i32>} : memref<128x128xf32, #tpu.memory_space<vmem>>, vector<128x128xf32>,
    return
  }
  func.func @transform_0(%arg0: i32) -> (i32, i32) {
    %c0_i32 = arith.constant 0 : i32
    %c0_i32_0 = arith.constant 0 : i32
    return %arg0, %c0_i32 : i32, i32
  }
  func.func @transform_1(%arg0: i32) -> (i32, i32) {
    %c0_i32 = arith.constant 0 : i32
    %c0_i32_0 = arith.constant 0 : i32
    %c0_i32_1 = arith.constant 0 : i32
    return %c0_i32, %c0_i32_0 : i32, i32
  }
  func.func @transform_2(%arg0: i32) -> (i32, i32) {
    %c0_i32 = arith.constant 0 : i32
    %c0_i32_0 = arith.constant 0 : i32
    return %arg0, %c0_i32 : i32, i32
  }
}

module attributes {stable_mosaic.version = 11 : i64} {
  func.func @_topk_kernel(%arg0: i32, %arg1: memref<128x128xf32, #tpu.memory_space<vmem>>, %arg2: memref<128x128xf32, #tpu.memory_space<vmem>>, %arg3: memref<128x128xf32, #tpu.memory_space<vmem>>) attributes {dimension_semantics = [#tpu.dimension_semantics<parallel>], iteration_bounds = array<i64: 1>, scalar_prefetch = 0 : i64, scratch_operands = 0 : i64, tpu.core_type = #tpu.core_type<tc>, window_params = [{transform_indices = @transform_0, window_bounds = array<i64: 128, 128>}, {pipeline_mode = #tpu.pipeline_mode<synchronous>, transform_indices = @transform_1, window_bounds = array<i64: 128, 128>}, {transform_indices = @transform_2, window_bounds = array<i64: 128, 128>}]} {
    %c0 = arith.constant 0 : index
    %c0_0 = arith.constant 0 : index
    %0 = vector.load %arg1[%c0, %c0_0] : memref<128x128xf32, #tpu.memory_space<vmem>>, vector<128x128xf32>
    %c0_1 = arith.constant 0 : index
    %c0_2 = arith.constant 0 : index
    %1 = vector.load %arg2[%c0_1, %c0_2] : memref<128x128xf32, #tpu.memory_space<vmem>>, vector<128x128xf32>
    %cst = arith.constant dense<0.000000e+00> : vector<128x128xf32>
    %2 = tpu.matmul %0, %1, %cst {dimension_numbers = #tpu.dot_dimension_numbers<[1], [1], [0], [0], [0, 0, 1, 0], [], []>} : vector<128x128xf32>, vector<128x128xf32>, vector<128x128xf32> -> vector<128x128xf32>
    %3 = tpu.iota {dimensions = array<i32: 1>} : vector<1x128xi32>
    %c16_i32 = arith.constant 16 : i32
    %4 = vector.broadcast %c16_i32 : i32 to vector<1x128xi32>
    %5 = arith.cmpi slt, %3, %4 : vector<1x128xi32>
    %cst_3 = arith.constant 0xFF800000 : f32
    %6 = vector.shape_cast %5 : vector<1x128xi1> to vector<1x128xi1>
    %7 = vector.broadcast %6 : vector<1x128xi1> to vector<128x128xi1>
    %8 = vector.broadcast %cst_3 : f32 to vector<128x128xf32>
    %9 = arith.select %7, %2, %8 : vector<128x128xi1>, vector<128x128xf32>
    %cst_4 = arith.constant 0.000000e+00 : f32
    %10 = vector.broadcast %cst_4 : f32 to vector<128x1xf32>
    %cst_5 = arith.constant 0xFF800000 : f32
    %c0_i32 = arith.constant 0 : i32
    %cst_6 = arith.constant dense<0xFF800000> : vector<128xf32>
    %11 = vector.multi_reduction <maximumf>, %9, %cst_6 [1] : vector<128x128xf32> to vector<128xf32>
    %12 = vector.shape_cast %11 : vector<128xf32> to vector<128x1xf32>
    %13 = vector.broadcast %12 : vector<128x1xf32> to vector<128x128xf32>
    %14 = arith.cmpf oeq, %9, %13 : vector<128x128xf32>
    %c128_i32 = arith.constant 128 : i32
    %15 = vector.shape_cast %3 : vector<1x128xi32> to vector<1x128xi32>
    %16 = vector.broadcast %15 : vector<1x128xi32> to vector<128x128xi32>
    %17 = vector.broadcast %c128_i32 : i32 to vector<128x128xi32>
    %18 = arith.select %14, %16, %17 : vector<128x128xi1>, vector<128x128xi32>
    %cst_7 = arith.constant dense<2147483647> : vector<128xi32>
    %19 = vector.multi_reduction <minsi>, %18, %cst_7 [1] : vector<128x128xi32> to vector<128xi32>
    %20 = vector.shape_cast %19 : vector<128xi32> to vector<128x1xi32>
    %21 = vector.broadcast %3 : vector<1x128xi32> to vector<128x128xi32>
    %22 = vector.broadcast %20 : vector<128x1xi32> to vector<128x128xi32>
    %23 = arith.cmpi eq, %21, %22 : vector<128x128xi32>
    %24 = vector.broadcast %cst_5 : f32 to vector<128x128xf32>
    %25 = arith.select %23, %24, %9 : vector<128x128xi1>, vector<128x128xf32>
    %26 = arith.mulf %12, %12 : vector<128x1xf32>
    %27 = arith.addf %10, %26 : vector<128x1xf32>
    %c1_i32 = arith.constant 1 : i32
    %cst_8 = arith.constant dense<0xFF800000> : vector<128xf32>
    %28 = vector.multi_reduction <maximumf>, %25, %cst_8 [1] : vector<128x128xf32> to vector<128xf32>
    %29 = vector.shape_cast %28 : vector<128xf32> to vector<128x1xf32>
    %30 = vector.broadcast %29 : vector<128x1xf32> to vector<128x128xf32>
    %31 = arith.cmpf oeq, %25, %30 : vector<128x128xf32>
    %c128_i32_9 = arith.constant 128 : i32
    %32 = vector.shape_cast %3 : vector<1x128xi32> to vector<1x128xi32>
    %33 = vector.broadcast %32 : vector<1x128xi32> to vector<128x128xi32>
    %34 = vector.broadcast %c128_i32_9 : i32 to vector<128x128xi32>
    %35 = arith.select %31, %33, %34 : vector<128x128xi1>, vector<128x128xi32>
    %cst_10 = arith.constant dense<2147483647> : vector<128xi32>
    %36 = vector.multi_reduction <minsi>, %35, %cst_10 [1] : vector<128x128xi32> to vector<128xi32>
    %37 = vector.shape_cast %36 : vector<128xi32> to vector<128x1xi32>
    %38 = vector.broadcast %3 : vector<1x128xi32> to vector<128x128xi32>
    %39 = vector.broadcast %37 : vector<128x1xi32> to vector<128x128xi32>
    %40 = arith.cmpi eq, %38, %39 : vector<128x128xi32>
    %41 = vector.broadcast %cst_5 : f32 to vector<128x128xf32>
    %42 = arith.select %40, %41, %25 : vector<128x128xi1>, vector<128x128xf32>
    %43 = arith.mulf %29, %29 : vector<128x1xf32>
    %44 = arith.addf %27, %43 : vector<128x1xf32>
    %c2_i32 = arith.constant 2 : i32
    %cst_11 = arith.constant dense<0xFF800000> : vector<128xf32>
    %45 = vector.multi_reduction <maximumf>, %42, %cst_11 [1] : vector<128x128xf32> to vector<128xf32>
    %46 = vector.shape_cast %45 : vector<128xf32> to vector<128x1xf32>
    %47 = vector.broadcast %46 : vector<128x1xf32> to vector<128x128xf32>
    %48 = arith.cmpf oeq, %42, %47 : vector<128x128xf32>
    %c128_i32_12 = arith.constant 128 : i32
    %49 = vector.shape_cast %3 : vector<1x128xi32> to vector<1x128xi32>
    %50 = vector.broadcast %49 : vector<1x128xi32> to vector<128x128xi32>
    %51 = vector.broadcast %c128_i32_12 : i32 to vector<128x128xi32>
    %52 = arith.select %48, %50, %51 : vector<128x128xi1>, vector<128x128xi32>
    %cst_13 = arith.constant dense<2147483647> : vector<128xi32>
    %53 = vector.multi_reduction <minsi>, %52, %cst_13 [1] : vector<128x128xi32> to vector<128xi32>
    %54 = vector.shape_cast %53 : vector<128xi32> to vector<128x1xi32>
    %55 = vector.broadcast %3 : vector<1x128xi32> to vector<128x128xi32>
    %56 = vector.broadcast %54 : vector<128x1xi32> to vector<128x128xi32>
    %57 = arith.cmpi eq, %55, %56 : vector<128x128xi32>
    %58 = vector.broadcast %cst_5 : f32 to vector<128x128xf32>
    %59 = arith.select %57, %58, %42 : vector<128x128xi1>, vector<128x128xf32>
    %60 = arith.mulf %46, %46 : vector<128x1xf32>
    %61 = arith.addf %44, %60 : vector<128x1xf32>
    %c3_i32 = arith.constant 3 : i32
    %cst_14 = arith.constant dense<0xFF800000> : vector<128xf32>
    %62 = vector.multi_reduction <maximumf>, %59, %cst_14 [1] : vector<128x128xf32> to vector<128xf32>
    %63 = vector.shape_cast %62 : vector<128xf32> to vector<128x1xf32>
    %64 = vector.broadcast %63 : vector<128x1xf32> to vector<128x128xf32>
    %65 = arith.cmpf oeq, %59, %64 : vector<128x128xf32>
    %c128_i32_15 = arith.constant 128 : i32
    %66 = vector.shape_cast %3 : vector<1x128xi32> to vector<1x128xi32>
    %67 = vector.broadcast %66 : vector<1x128xi32> to vector<128x128xi32>
    %68 = vector.broadcast %c128_i32_15 : i32 to vector<128x128xi32>
    %69 = arith.select %65, %67, %68 : vector<128x128xi1>, vector<128x128xi32>
    %cst_16 = arith.constant dense<2147483647> : vector<128xi32>
    %70 = vector.multi_reduction <minsi>, %69, %cst_16 [1] : vector<128x128xi32> to vector<128xi32>
    %71 = vector.shape_cast %70 : vector<128xi32> to vector<128x1xi32>
    %72 = vector.broadcast %3 : vector<1x128xi32> to vector<128x128xi32>
    %73 = vector.broadcast %71 : vector<128x1xi32> to vector<128x128xi32>
    %74 = arith.cmpi eq, %72, %73 : vector<128x128xi32>
    %75 = vector.broadcast %cst_5 : f32 to vector<128x128xf32>
    %76 = arith.select %74, %75, %59 : vector<128x128xi1>, vector<128x128xf32>
    %77 = arith.mulf %63, %63 : vector<128x1xf32>
    %78 = arith.addf %61, %77 : vector<128x1xf32>
    %cst_17 = arith.constant 0xFF800000 : f32
    %79 = vector.broadcast %cst_17 : f32 to vector<128x128xf32>
    %80 = arith.cmpf oeq, %76, %79 : vector<128x128xf32>
    %81 = vector.broadcast %5 : vector<1x128xi1> to vector<128x128xi1>
    %82 = arith.andi %80, %81 : vector<128x128xi1>
    %cst_18 = arith.constant 0.000000e+00 : f32
    %83 = vector.broadcast %cst_18 : f32 to vector<128x128xf32>
    %84 = arith.select %82, %2, %83 : vector<128x128xi1>, vector<128x128xf32>
    %85 = math.sqrt %78 : vector<128x1xf32>
    %cst_19 = arith.constant 9.99999996E-13 : f32
    %86 = vector.broadcast %cst_19 : f32 to vector<128x1xf32>
    %87 = arith.maximumf %85, %86 : vector<128x1xf32>
    %cst_20 = arith.constant 1.000000e+00 : f32
    %88 = vector.broadcast %cst_20 : f32 to vector<128x1xf32>
    %89 = arith.divf %88, %87 : vector<128x1xf32>
    %90 = vector.broadcast %89 : vector<128x1xf32> to vector<128x128xf32>
    %91 = arith.mulf %84, %90 : vector<128x128xf32>
    %c0_21 = arith.constant 0 : index
    %c0_22 = arith.constant 0 : index
    %92 = vector.load %arg3[%c0_21, %c0_22] : memref<128x128xf32, #tpu.memory_space<vmem>>, vector<128x128xf32>
    tpu.vector_store %arg3[%c0_21, %c0_22], %91 {strides = array<i32>} : memref<128x128xf32, #tpu.memory_space<vmem>>, vector<128x128xf32>,
    return
  }
  func.func @transform_0(%arg0: i32) -> (i32, i32) {
    %c0_i32 = arith.constant 0 : i32
    %c0_i32_0 = arith.constant 0 : i32
    return %arg0, %c0_i32 : i32, i32
  }
  func.func @transform_1(%arg0: i32) -> (i32, i32) {
    %c0_i32 = arith.constant 0 : i32
    %c0_i32_0 = arith.constant 0 : i32
    %c0_i32_1 = arith.constant 0 : i32
    return %c0_i32, %c0_i32_0 : i32, i32
  }
  func.func @transform_2(%arg0: i32) -> (i32, i32) {
    %c0_i32 = arith.constant 0 : i32
    %c0_i32_0 = arith.constant 0 : i32
    return %arg0, %c0_i32 : i32, i32
  }
}

</mosaic_0001>

<bundles_post_ra>
// kernel: tpu_custom_call.1
= control target key start
LH: loop header
LB: loop body
LE: loop exit
PB: predicated region body
PF: predicated region fallthrough
CT: control target
= control target key end

     0   :  { %7 = vsyncpa [#allocation3], 0  ;;  %s4098_s0 = inlined_call_operand.hbm [shape: f32[128,128], index: 0, kind: input, shape index: {}]   ;;  %s4099_s1 = inlined_call_operand.hbm [shape: f32[128,128], index: 1, kind: input, shape index: {}]   ;;  %s4100_s2 = inlined_call_operand.hbm [shape: f32[128,128], index: 2, kind: output, shape index: {}]  }
   0x1   :  { %8 = vsyncpa [#allocation6], 0 }
   0x2   :  { %9 = vsyncpa [#allocation4], 0  ;;  %s2181_s9 = smov [#allocation2]   ;;  %s2109_s13 = scalar_lea.hbm %s4098_s0, 2048 }
   0x3   :  { %s15_s10 = sshll.u32 %s2181_s9, 4  ;;  %p2110_p0 = scmp.ne.s32.totalorder %s4098_s0, %s2109_s13  ;;  %s16_s10 = int_to_ptr.vmem [resolvable:$true] %s15_s10 }
   0x4   :  { %p2113_p1 = scmp.lt.u32.totalorder %s2109_s13, %s4098_s0 }
   0x6   :  { %p2115_p2 = pnand %p2113_p1, %p2110_p0 }
   0x8   :  { %2118 = shalt.err (!%p2115_p2)
}
   0x9   :  { %s2119_s18 = scalar_lea.vmem %s16_s10, 2048  ;;  %p2124_p4 = scmp.lt.s32.totalorder %s16_s10, %s16_s10 }
   0xa   :  { %p2120_p3 = scmp.ne.s32.totalorder %s16_s10, %s2119_s18  ;;  %p2125_p5 = scmp.lt.s32.totalorder %s2119_s18, %s2119_s18 }
   0xc   :  { %p2126_p6 = por %p2125_p5, %p2124_p4 }
   0xe   :  { %p2127_p7 = pnand %p2126_p6, %p2120_p3 }
  0x10   :  { %2130 = shalt.err (!%p2127_p7)
}
  0x11   :  { %s2182_s19 = smov 128   ;;  %s2183_s20 = smov 8  }
  0x12   :  { %21 = dma.hbm_to_vmem [thread:$0]  %s4098_s0, 2048, %s16_s10, [#allocation3], %s2182_s19, %s2182_s19, %s2183_s20  }
  0x13   :  { %s2184_s23 = smov [#allocation5]   ;;  %s2131_s27 = scalar_lea.hbm %s4099_s1, 2048 }
  0x14   :  { %s27_s24 = sshll.u32 %s2184_s23, 4  ;;  %p2132_p8 = scmp.ne.s32.totalorder %s4099_s1, %s2131_s27  ;;  %s28_s24 = int_to_ptr.vmem [resolvable:$true] %s27_s24 }
  0x15   :  { %p2135_p9 = scmp.lt.u32.totalorder %s2131_s27, %s4099_s1 }
  0x17   :  { %p2137_p10 = pnand %p2135_p9, %p2132_p8 }
  0x19   :  { %2140 = shalt.err (!%p2137_p10)
}
  0x1a   :  { %s2141_s4 = scalar_lea.vmem %s28_s24, 2048  ;;  %p2146_p12 = scmp.lt.s32.totalorder %s28_s24, %s28_s24 }
  0x1b   :  { %p2142_p11 = scmp.ne.s32.totalorder %s28_s24, %s2141_s4  ;;  %p2147_p13 = scmp.lt.s32.totalorder %s2141_s4, %s2141_s4 }
  0x1d   :  { %p2148_p0 = por %p2147_p13, %p2146_p12 }
  0x1f   :  { %p2149_p1 = pnand %p2148_p0, %p2142_p11 }
  0x21   :  { %2152 = shalt.err (!%p2149_p1)
}
  0x22   :  { %33 = dma.hbm_to_vmem [thread:$0]  %s4099_s1, 2048, %s28_s24, [#allocation6], %s2182_s19, %s2182_s19, %s2183_s20  }
  0x23   :  { %2175 = dma.done.wait [#allocation3], 2048  }
  0x24   :  { %2176 = vsyncadd [#allocation3], 4294965248 }
  0x25   :  { %2177 = dma.done.wait [#allocation6], 2048  }
  0x26   :  { %2178 = vsyncadd [#allocation6], 4294965248  ;;  %v56_v0 = vld [vmem:[#allocation5] sm:$0xff]  ;;  %v57_v1 = vld [vmem:[#allocation5 + $0x8] sm:$0xff]  ;;  %v217_v40 = vlaneseq  ;;  %s2185_s1 = smov [#allocation7]  }
  0x27   :  { %v58_v2 = vld [vmem:[#allocation5 + $0x10] sm:$0xff]  ;;  %v1992_v3 = vpack.c.bf16 %v57_v1, %v56_v0  ;;  %v59_v4 = vld [vmem:[#allocation5 + $0x18] sm:$0xff]  ;;  %v40_v6 = vld [vmem:[#allocation2] sm:$0xff]  ;;  %s1891_s6 = sshll.u32 %s2185_s1, 4  ;;  %s1892_s6 = int_to_ptr.vmem [resolvable:$true] %s1891_s6 }
  0x28   :  { %v1996_v5 = vpack.c.bf16 %v59_v4, %v58_v2  ;;  %v48_v7 = vld [vmem:[#allocation2 + $0x40] sm:$0xff]  ;;  %v61_v9 = vld [vmem:[#allocation5 + $0x28] sm:$0xff]  ;;  %1968 = vmatprep.mubr.f32.mxu0 %v40_v6  ;;  %v62_v11 = vld [vmem:[#allocation5 + $0x30] sm:$0xff]  ;;  %v2231_v41 = vand.u32 127, %v217_v40  ;;  %s2153_s7 = scalar_lea.vmem %s1892_s6, 2048  ;;  %p2158_p3 = scmp.lt.s32.totalorder %s1892_s6, %s1892_s6 }
  0x29   :  { %1993 = vmatprep.subr.bf16.mxu0 %v1992_v3  ;;  %2024 = vmatprep.subr.bf16.mxu1 %v1992_v3  ;;  %v60_v8 = vld [vmem:[#allocation5 + $0x20] sm:$0xff]  ;;  %v63_v12 = vld [vmem:[#allocation5 + $0x38] sm:$0xff]  ;;  %v65_v15 = vld [vmem:[#allocation5 + $0x48] sm:$0xff]  ;;  %p2154_p2 = scmp.ne.s32.totalorder %s1892_s6, %s2153_s7  ;;  %p2159_p4 = scmp.lt.s32.totalorder %s2153_s7, %s2153_s7 }
  0x2a   :  { %1995 = vmatpush3.bf16.xpose.msra.mxu0 %v1992_v3  ;;  %2032 = vmatpush3.bf16.xpose.msra.mxu1 %v1992_v3  ;;  %v2000_v10 = vpack.c.bf16 %v61_v9, %v60_v8  ;;  %v2004_v13 = vpack.c.bf16 %v63_v12, %v62_v11  ;;  %v64_v14 = vld [vmem:[#allocation5 + $0x40] sm:$0xff]  ;;  %v66_v17 = vld [vmem:[#allocation5 + $0x50] sm:$0xff]  ;;  %v67_v18 = vld [vmem:[#allocation5 + $0x58] sm:$0xff]  ;;  %vm219_vm0 = vcmp.lt.s32.totalorder %v2231_v41, 16 }
  0x2b   :  { %1997 = vmatprep.subr.bf16.mxu0 %v1996_v5  ;;  %2025 = vmatprep.subr.bf16.mxu1 %v1996_v5  ;;  %v2008_v16 = vpack.c.bf16 %v65_v15, %v64_v14  ;;  %v2012_v19 = vpack.c.bf16 %v67_v18, %v66_v17  ;;  %v68_v20 = vld [vmem:[#allocation5 + $0x60] sm:$0xff]  ;;  %v69_v21 = vld [vmem:[#allocation5 + $0x68] sm:$0xff]  ;;  %v70_v23 = vld [vmem:[#allocation5 + $0x70] sm:$0xff]  ;;  %p2160_p5 = por %p2159_p4, %p2158_p3 }
  0x2c   :  { %1980 = vmatprep.mubr.f32.mxu1 %v48_v7  ;;  %v2016_v22 = vpack.c.bf16 %v69_v21, %v68_v20  ;;  %v71_v24 = vld [vmem:[#allocation5 + $0x78] sm:$0xff]  ;;  %v41_v26 = vld [vmem:[#allocation2 + $0x8] sm:$0xff]  ;;  %v42_v28 = vld [vmem:[#allocation2 + $0x10] sm:$0xff] }
  0x2d   :  { %v2020_v25 = vpack.c.bf16 %v71_v24, %v70_v23  ;;  %v49_v27 = vld [vmem:[#allocation2 + $0x48] sm:$0xff]  ;;  %v50_v29 = vld [vmem:[#allocation2 + $0x50] sm:$0xff]  ;;  %v43_v30 = vld [vmem:[#allocation2 + $0x18] sm:$0xff]  ;;  %p2161_p6 = pnand %p2160_p5, %p2154_p2 }
  0x2e   :  { %v51_v31 = vld [vmem:[#allocation2 + $0x58] sm:$0xff]  ;;  %v44_v32 = vld [vmem:[#allocation2 + $0x20] sm:$0xff]  ;;  %v45_v34 = vld [vmem:[#allocation2 + $0x28] sm:$0xff] }
  0x2f   :  { %v52_v33 = vld [vmem:[#allocation2 + $0x60] sm:$0xff]  ;;  %v53_v35 = vld [vmem:[#allocation2 + $0x68] sm:$0xff]  ;;  %v46_v36 = vld [vmem:[#allocation2 + $0x30] sm:$0xff] }
  0x30   :  { %v54_v37 = vld [vmem:[#allocation2 + $0x70] sm:$0xff]  ;;  %v47_v38 = vld [vmem:[#allocation2 + $0x38] sm:$0xff] }
  0x31   :  { %v55_v39 = vld [vmem:[#allocation2 + $0x78] sm:$0xff] }
  0x32   :  { %1999 = vmatpush3.bf16.xpose.msra.mxu0 %v1996_v5  ;;  %2033 = vmatpush3.bf16.xpose.msra.mxu1 %v1996_v5 }
  0x33   :  { %2001 = vmatprep.subr.bf16.mxu0 %v2000_v10  ;;  %2026 = vmatprep.subr.bf16.mxu1 %v2000_v10 }
  0x3a   :  { %2003 = vmatpush3.bf16.xpose.msra.mxu0 %v2000_v10  ;;  %2034 = vmatpush3.bf16.xpose.msra.mxu1 %v2000_v10 }
  0x3b   :  { %2005 = vmatprep.subr.bf16.mxu0 %v2004_v13  ;;  %2027 = vmatprep.subr.bf16.mxu1 %v2004_v13 }
  0x42   :  { %2007 = vmatpush3.bf16.xpose.msra.mxu0 %v2004_v13  ;;  %2035 = vmatpush3.bf16.xpose.msra.mxu1 %v2004_v13 }
  0x43   :  { %2009 = vmatprep.subr.bf16.mxu0 %v2008_v16  ;;  %2028 = vmatprep.subr.bf16.mxu1 %v2008_v16 }
  0x4a   :  { %2011 = vmatpush3.bf16.xpose.msra.mxu0 %v2008_v16  ;;  %2036 = vmatpush3.bf16.xpose.msra.mxu1 %v2008_v16 }
  0x4b   :  { %2013 = vmatprep.subr.bf16.mxu0 %v2012_v19  ;;  %2029 = vmatprep.subr.bf16.mxu1 %v2012_v19 }
  0x52   :  { %2015 = vmatpush3.bf16.xpose.msra.mxu0 %v2012_v19  ;;  %2037 = vmatpush3.bf16.xpose.msra.mxu1 %v2012_v19 }
  0x53   :  { %2017 = vmatprep.subr.bf16.mxu0 %v2016_v22  ;;  %2030 = vmatprep.subr.bf16.mxu1 %v2016_v22 }
  0x5a   :  { %2019 = vmatpush3.bf16.xpose.msra.mxu0 %v2016_v22  ;;  %2038 = vmatpush3.bf16.xpose.msra.mxu1 %v2016_v22 }
  0x5b   :  { %2021 = vmatprep.subr.bf16.mxu0 %v2020_v25  ;;  %2031 = vmatprep.subr.bf16.mxu1 %v2020_v25 }
  0x62   :  { %2023 = vmatpush3.bf16.xpose.msra.mxu0 %v2020_v25  ;;  %2039 = vmatpush3.bf16.xpose.msra.mxu1 %v2020_v25 }
  0x69   :  { %1969 = vmatmul.mubr.f32.vlgmr.msra.gmra.mrb[0].mxu0 %v41_v26  ;;  %1981 = vmatmul.mubr.f32.vlgmr.msra.gmra.mrb[0].mxu1 %v49_v27 }
  0x6a   :  { %1971 = vmatprep.mubr.f32.mxu0 %v42_v28  ;;  %1983 = vmatprep.mubr.f32.mxu1 %v50_v29 }
  0x6d   :  { %1972 = vmatmul.mubr.f32.gmra.mrb[2].mxu0 %v43_v30  ;;  %1984 = vmatmul.mubr.f32.gmra.mrb[2].mxu1 %v51_v31 }
  0x6e   :  { %1974 = vmatprep.mubr.f32.mxu0 %v44_v32  ;;  %1986 = vmatprep.mubr.f32.mxu1 %v52_v33 }
  0x71   :  { %1975 = vmatmul.mubr.f32.gmra.mrb[4].mxu0 %v45_v34  ;;  %1987 = vmatmul.mubr.f32.gmra.mrb[4].mxu1 %v53_v35 }
  0x72   :  { %1977 = vmatprep.mubr.f32.mxu0 %v46_v36  ;;  %1989 = vmatprep.mubr.f32.mxu1 %v54_v37 }
  0x75   :  { %1978 = vmatmul.mubr.f32.gmra.mrb[6].mxu0 %v47_v38  ;;  %1990 = vmatmul.mubr.f32.gmra.mrb[6].mxu1 %v55_v39 }
 0x13c   :  { %v2234_v42 = vpop.f32.mrb[0].mxu0  ;;  %v2236_v43 = vpop.f32.mrb[0].mxu1 }
 0x13d   :  { %4171 = vst [vmem:[#allocation11_spill] sm:$0xff] %v2234_v42  ;;  %4172 = vst [vmem:[#allocation12_spill] sm:$0xff] %v2236_v43  ;;  %v2238_v44 = vpop.f32.mrb[1].mxu0  ;;  %v2240_v45 = vpop.f32.mrb[1].mxu1  ;;  %v2245_v46 = vsel %vm219_vm0, %v2236_v43, -inf  ;;  %v2250_v47 = vsel %vm219_vm0, %v2234_v42, -inf }
 0x13e   :  { %4173 = vst [vmem:[#allocation13_spill] sm:$0xff] %v2238_v44  ;;  %4174 = vst [vmem:[#allocation14_spill] sm:$0xff] %v2240_v45  ;;  %256 = vmax.xlane.f32.xlu1 %v2245_v46  ;;  %240 = vmax.xlane.f32.xlu0 %v2250_v47  ;;  %v2263_v51 = vsel %vm219_vm0, %v2238_v44, -inf  ;;  %v2286_v57 = vsel %vm219_vm0, %v2240_v45, -inf }
 0x140   :  { %v2254_v48 = vpop.f32.mrb[2].mxu0  ;;  %v2256_v49 = vpop.f32.mrb[2].mxu1 }
 0x141   :  { %4175 = vst [vmem:[#allocation15_spill] sm:$0xff] %v2254_v48  ;;  %4176 = vst [vmem:[#allocation16_spill] sm:$0xff] %v2256_v49  ;;  %v2258_v50 = vpop.f32.mrb[3].mxu0  ;;  %v2268_v52 = vsel %vm219_vm0, %v2254_v48, -inf  ;;  %v2270_v53 = vpop.f32.mrb[3].mxu1  ;;  %v2277_v54 = vsel %vm219_vm0, %v2256_v49, -inf }
 0x142   :  { %4177 = vst [vmem:[#allocation17_spill] sm:$0xff] %v2258_v50  ;;  %4178 = vst [vmem:[#allocation18_spill] sm:$0xff] %v2270_v53  ;;  %238 = vmax.xlane.f32.xlu0 %v2263_v51  ;;  %244 = vmax.xlane.f32.xlu1 %v2268_v52  ;;  %v2301_v62 = vsel %vm219_vm0, %v2270_v53, -inf  ;;  %v2306_v63 = vsel %vm219_vm0, %v2258_v50, -inf }
 0x144   :  { %v2279_v55 = vpop.f32.mrb[4].mxu0  ;;  %v2281_v56 = vpop.f32.mrb[4].mxu1 }
 0x145   :  { %4179 = vst [vmem:[#allocation19_spill] sm:$0xff] %v2279_v55  ;;  %4180 = vst [vmem:[#allocation20_spill] sm:$0xff] %v2281_v56  ;;  %v2288_v58 = vpop.f32.mrb[5].mxu0  ;;  %v2290_v59 = vpop.f32.mrb[5].mxu1  ;;  %v2317_v2 = vsel %vm219_vm0, %v2279_v55, -inf  ;;  %v2329_v4 = vsel %vm219_vm0, %v2281_v56, -inf }
 0x146   :  { %4181 = vst [vmem:[#allocation21_spill] sm:$0xff] %v2288_v58  ;;  %4182 = vst [vmem:[#allocation22_spill] sm:$0xff] %v2290_v59  ;;  %254 = vmax.xlane.f32.xlu0 %v2286_v57  ;;  %260 = vmax.xlane.f32.xlu1 %v2277_v54  ;;  %v2322_v3 = vsel %vm219_vm0, %v2288_v58, -inf  ;;  %v2334_v5 = vsel %vm219_vm0, %v2290_v59, -inf }
 0x148   :  { %v2294_v60 = vpop.f32.mrb[6].mxu0  ;;  %v2296_v61 = vpop.f32.mrb[6].mxu1 }
 0x149   :  { %4183 = vst [vmem:[#allocation23_spill] sm:$0xff] %v2294_v60  ;;  %4184 = vst [vmem:[#allocation24_spill] sm:$0xff] %v2296_v61  ;;  %v2308_v0 = vpop.f32.mrb[7].mxu0  ;;  %v2310_v1 = vpop.f32.mrb[7].mxu1  ;;  %v2346_v7 = vsel %vm219_vm0, %v2294_v60, -inf  ;;  %v2358_v9 = vsel %vm219_vm0, %v2296_v61, -inf }
 0x14a   :  { %4185 = vst [vmem:[#allocation25_spill] sm:$0xff] %v2308_v0  ;;  %4186 = vst [vmem:[#allocation26_spill] sm:$0xff] %v2310_v1  ;;  %258 = vmax.xlane.f32.xlu0 %v2301_v62  ;;  %242 = vmax.xlane.f32.xlu1 %v2306_v63  ;;  %v2341_v6 = vsel %vm219_vm0, %v2308_v0, -inf  ;;  %v2353_v8 = vsel %vm219_vm0, %v2310_v1, -inf }
 0x14e   :  { %248 = vmax.xlane.f32.xlu1 %v2317_v2  ;;  %246 = vmax.xlane.f32.xlu0 %v2322_v3 }
 0x152   :  { %264 = vmax.xlane.f32.xlu1 %v2329_v4  ;;  %262 = vmax.xlane.f32.xlu0 %v2334_v5 }
 0x156   :  { %252 = vmax.xlane.f32.xlu1 %v2346_v7  ;;  %250 = vmax.xlane.f32.xlu0 %v2341_v6 }
 0x15a   :  { %268 = vmax.xlane.f32.xlu1 %v2358_v9  ;;  %266 = vmax.xlane.f32.xlu0 %v2353_v8 }
 0x1cb   :  { %v2362_v10 = vpop.xlane.xlu1 %256  ;;  %v2364_v11 = vpop.xlane.xlu0 %240 }
 0x1cc   :  { %vm279_vm1 = vcmp.eq.f32.partialorder %v2245_v46, %v2362_v10  ;;  %vm271_vm2 = vcmp.eq.f32.partialorder %v2250_v47, %v2364_v11 }
 0x1cd   :  { %v2371_v12 = vsel %vm271_vm2, %v2231_v41, 128  ;;  %v2375_v14 = vsel %vm279_vm1, %v2231_v41, 128 }
 0x1ce   :  { %v317_v13 = vshra.s32 %v2371_v12, 16  ;;  %v429_v18 = vshra.s32 %v2375_v14, 16 }
 0x1cf   :  { %v2377_v15 = vpop.xlane.xlu0 %238  ;;  %v2379_v16 = vpop.xlane.xlu1 %244 }
 0x1d0   :  { %4187 = vst [vmem:[#allocation27_spill] sm:$0xff] %v2377_v15  ;;  %4188 = vst [vmem:[#allocation28_spill] sm:$0xff] %v2379_v16  ;;  %vm270_vm3 = vcmp.eq.f32.partialorder %v2263_v51, %v2377_v15  ;;  %vm273_vm4 = vcmp.eq.f32.partialorder %v2268_v52, %v2379_v16  ;;  %v2385_v17 = vcvt.s32.f32 %v317_v13  ;;  %v2404_v24 = vcvt.s32.f32 %v429_v18 }
 0x1d1   :  { %v2389_v19 = vsel %vm270_vm3, %v2231_v41, 128  ;;  %v2393_v21 = vsel %vm273_vm4, %v2231_v41, 128 }
 0x1d2   :  { %v303_v20 = vshra.s32 %v2389_v19, 16  ;;  %320 = vmin.xlane.f32.xlu1 %v2385_v17  ;;  %v345_v26 = vshra.s32 %v2393_v21, 16 }
 0x1d3   :  { %v2396_v22 = vpop.xlane.xlu0 %254  ;;  %v2398_v23 = vpop.xlane.xlu1 %260 }
 0x1d4   :  { %4189 = vst [vmem:[#allocation29_spill] sm:$0xff] %v2396_v22  ;;  %4190 = vst [vmem:[#allocation30_spill] sm:$0xff] %v2398_v23  ;;  %vm278_vm5 = vcmp.eq.f32.partialorder %v2286_v57, %v2396_v22  ;;  %vm281_vm6 = vcmp.eq.f32.partialorder %v2277_v54, %v2398_v23  ;;  %v2406_v25 = vcvt.s32.f32 %v303_v20  ;;  %v2426_v32 = vcvt.s32.f32 %v345_v26 }
 0x1d5   :  { %v2410_v27 = vsel %vm278_vm5, %v2231_v41, 128  ;;  %v2414_v29 = vsel %vm281_vm6, %v2231_v41, 128 }
 0x1d6   :  { %v415_v28 = vshra.s32 %v2410_v27, 16  ;;  %432 = vmin.xlane.f32.xlu1 %v2404_v24  ;;  %306 = vmin.xlane.f32.xlu0 %v2406_v25  ;;  %v457_v34 = vshra.s32 %v2414_v29, 16  ;;  %v414_v22 = vand.u32 65535, %v2410_v27 }
 0x1d7   :  { %v2418_v30 = vpop.xlane.xlu0 %258  ;;  %v2420_v31 = vpop.xlane.xlu1 %242 }
 0x1d8   :  { %4191 = vst [vmem:[#allocation31_spill] sm:$0xff] %v2418_v30  ;;  %4192 = vst [vmem:[#allocation32_spill] sm:$0xff] %v2420_v31  ;;  %vm280_vm7 = vcmp.eq.f32.partialorder %v2301_v62, %v2418_v30  ;;  %vm272_vm8 = vcmp.eq.f32.partialorder %v2306_v63, %v2420_v31  ;;  %v2428_v33 = vcvt.s32.f32 %v415_v28  ;;  %v2448_v40 = vcvt.s32.f32 %v457_v34 }
 0x1d9   :  { %v2432_v35 = vsel %vm272_vm8, %v2231_v41, 128  ;;  %v2436_v37 = vsel %vm280_vm7, %v2231_v41, 128 }
 0x1da   :  { %v331_v36 = vshra.s32 %v2432_v35, 16  ;;  %348 = vmin.xlane.f32.xlu1 %v2426_v32  ;;  %418 = vmin.xlane.f32.xlu0 %v2428_v33  ;;  %v443_v20 = vshra.s32 %v2436_v37, 16  ;;  %v330_v27 = vand.u32 65535, %v2432_v35  ;;  %v442_v35 = vand.u32 65535, %v2436_v37 }
 0x1db   :  { %v2440_v38 = vpop.xlane.xlu1 %248  ;;  %v2442_v39 = vpop.xlane.xlu0 %246 }
 0x1dc   :  { %4193 = vst [vmem:[#allocation33_spill] sm:$0xff] %v2440_v38  ;;  %4194 = vst [vmem:[#allocation34_spill] sm:$0xff] %v2442_v39  ;;  %vm275_vm9 = vcmp.eq.f32.partialorder %v2317_v2, %v2440_v38  ;;  %vm274_vm10 = vcmp.eq.f32.partialorder %v2322_v3, %v2442_v39  ;;  %v2450_v13 = vcvt.s32.f32 %v331_v36  ;;  %v2472_v0 = vcvt.s32.f32 %v443_v20 }
 0x1dd   :  { %v2453_v18 = vsel %vm275_vm9, %v2231_v41, 128  ;;  %v2458_v28 = vsel %vm274_vm10, %v2231_v41, 128 }
 0x1de   :  { %v373_v26 = vshra.s32 %v2453_v18, 16  ;;  %460 = vmin.xlane.f32.xlu1 %v2448_v40  ;;  %334 = vmin.xlane.f32.xlu0 %v2450_v13  ;;  %v359_v59 = vshra.s32 %v2458_v28, 16  ;;  %v358_v37 = vand.u32 65535, %v2458_v28 }
 0x1df   :  { %v2462_v1 = vpop.xlane.xlu1 %264  ;;  %v2464_v34 = vpop.xlane.xlu0 %262 }
 0x1e0   :  { %4195 = vst [vmem:[#allocation35_spill] sm:$0xff] %v2462_v1  ;;  %4196 = vst [vmem:[#allocation36_spill] sm:$0xff] %v2464_v34  ;;  %vm283_vm11 = vcmp.eq.f32.partialorder %v2329_v4, %v2462_v1  ;;  %vm282_vm12 = vcmp.eq.f32.partialorder %v2334_v5, %v2464_v34  ;;  %v2470_v36 = vcvt.s32.f32 %v373_v26  ;;  %v2494_v53 = vcvt.s32.f32 %v359_v59 }
 0x1e1   :  { %v2475_v61 = vsel %vm283_vm11, %v2231_v41, 128  ;;  %v2480_v58 = vsel %vm282_vm12, %v2231_v41, 128 }
 0x1e2   :  { %v485_v60 = vshra.s32 %v2475_v61, 16  ;;  %376 = vmin.xlane.f32.xlu1 %v2470_v36  ;;  %446 = vmin.xlane.f32.xlu0 %v2472_v0  ;;  %v471_v50 = vshra.s32 %v2480_v58, 16  ;;  %v470_v28 = vand.u32 65535, %v2480_v58 }
 0x1e3   :  { %v2484_v56 = vpop.xlane.xlu1 %252  ;;  %v2486_v26 = vpop.xlane.xlu0 %250 }
 0x1e4   :  { %4197 = vst [vmem:[#allocation37_spill] sm:$0xff] %v2484_v56  ;;  %4198 = vst [vmem:[#allocation38_spill] sm:$0xff] %v2486_v26  ;;  %vm277_vm13 = vcmp.eq.f32.partialorder %v2346_v7, %v2484_v56  ;;  %vm276_vm14 = vcmp.eq.f32.partialorder %v2341_v6, %v2486_v26  ;;  %v2492_v20 = vcvt.s32.f32 %v485_v60  ;;  %v2516_v44 = vcvt.s32.f32 %v471_v50 }
 0x1e5   :  { %v2497_v55 = vsel %vm277_vm13, %v2231_v41, 128  ;;  %v2502_v45 = vsel %vm276_vm14, %v2231_v41, 128  ;;  %v316_v56 = vand.u32 65535, %v2371_v12  ;;  %v344_v12 = vand.u32 65535, %v2393_v21 }
 0x1e6   :  { %v401_v49 = vshra.s32 %v2497_v55, 16  ;;  %488 = vmin.xlane.f32.xlu1 %v2492_v20  ;;  %362 = vmin.xlane.f32.xlu0 %v2494_v53  ;;  %v387_v42 = vshra.s32 %v2502_v45, 16  ;;  %v456_v21 = vand.u32 65535, %v2414_v29  ;;  %v372_v29 = vand.u32 65535, %v2453_v18 }
 0x1e7   :  { %v2506_v48 = vpop.xlane.xlu1 %268  ;;  %v2508_v60 = vpop.xlane.xlu0 %266  ;;  %v318_v1 = vcvt.s32.f32 %v316_v56  ;;  %v484_v18 = vand.u32 65535, %v2475_v61  ;;  %v400_v61 = vand.u32 65535, %v2497_v55  ;;  %v386_v58 = vand.u32 65535, %v2502_v45 }
 0x1e8   :  { %4199 = vst [vmem:[#allocation39_spill] sm:$0xff] %v2506_v48  ;;  %4200 = vst [vmem:[#allocation40_spill] sm:$0xff] %v2508_v60  ;;  %vm285_vm15 = vcmp.eq.f32.partialorder %v2358_v9, %v2506_v48  ;;  %vm284_vm1 = vcmp.eq.f32.partialorder %v2353_v8, %v2508_v60  ;;  %v2514_v59 = vcvt.s32.f32 %v401_v49  ;;  %v2530_v49 = vcvt.s32.f32 %v387_v42 }
 0x1e9   :  { %v2519_v43 = vsel %vm285_vm15, %v2231_v41, 128  ;;  %v2524_v34 = vsel %vm284_vm1, %v2231_v41, 128  ;;  %v302_v42 = vand.u32 65535, %v2389_v19  ;;  %v346_v19 = vcvt.s32.f32 %v344_v12 }
 0x1ea   :  { %v513_v26 = vshra.s32 %v2519_v43, 16  ;;  %404 = vmin.xlane.f32.xlu1 %v2514_v59  ;;  %474 = vmin.xlane.f32.xlu0 %v2516_v44  ;;  %v499_v50 = vshra.s32 %v2524_v34, 16  ;;  %v512_v55 = vand.u32 65535, %v2519_v43  ;;  %v498_v43 = vand.u32 65535, %v2524_v34 }
 0x1eb   :  { %v304_v23 = vcvt.s32.f32 %v302_v42 }
 0x1ec   :  { %v2528_v48 = vcvt.s32.f32 %v513_v26  ;;  %v2535_v60 = vcvt.s32.f32 %v499_v50  ;;  %v428_v26 = vand.u32 65535, %v2375_v14 }
 0x1ee   :  { %516 = vmin.xlane.f32.xlu1 %v2528_v48  ;;  %390 = vmin.xlane.f32.xlu0 %v2530_v49  ;;  %v430_v31 = vcvt.s32.f32 %v428_v26  ;;  %v458_v26 = vcvt.s32.f32 %v456_v21  ;;  %v486_v21 = vcvt.s32.f32 %v484_v18 }
 0x1f2   :  { %502 = vmin.xlane.f32.xlu0 %v2535_v60 }
 0x25f   :  { %v2539_v39 = vpop.xlane.xlu1 %320 }
 0x260   :  { %vm322_vm2 = vcmp.eq.f32.partialorder %v2385_v17, %v2539_v39  ;;  %v327_v34 = vcvt.f32.s32 %v2539_v39 }
 0x261   :  { %v323_v30 = vsel %vm322_vm2, %v318_v1, inf }
 0x262   :  { %324 = vmin.xlane.f32.xlu1 %v323_v30  ;;  %v416_v30 = vcvt.s32.f32 %v414_v22  ;;  %v332_v22 = vcvt.s32.f32 %v330_v27  ;;  %v360_v27 = vcvt.s32.f32 %v358_v37  ;;  %v328_v37 = vshll.u32 %v327_v34, 16 }
 0x263   :  { %v2545_v38 = vpop.xlane.xlu1 %432  ;;  %v2547_v50 = vpop.xlane.xlu0 %306 }
 0x264   :  { %vm434_vm3 = vcmp.eq.f32.partialorder %v2404_v24, %v2545_v38  ;;  %vm308_vm4 = vcmp.eq.f32.partialorder %v2406_v25, %v2547_v50  ;;  %v439_v18 = vcvt.f32.s32 %v2545_v38 }
 0x265   :  { %v435_v56 = vsel %vm434_vm3, %v430_v31, inf  ;;  %v309_v14 = vsel %vm308_vm4, %v304_v23, inf }
 0x266   :  { %436 = vmin.xlane.f32.xlu1 %v435_v56  ;;  %310 = vmin.xlane.f32.xlu0 %v309_v14  ;;  %v374_v56 = vcvt.s32.f32 %v372_v29  ;;  %v444_v14 = vcvt.s32.f32 %v442_v35 }
 0x267   :  { %v2555_v1 = vpop.xlane.xlu1 %348  ;;  %v2557_v17 = vpop.xlane.xlu0 %418 }
 0x268   :  { %vm350_vm5 = vcmp.eq.f32.partialorder %v2426_v32, %v2555_v1  ;;  %vm420_vm6 = vcmp.eq.f32.partialorder %v2428_v33, %v2557_v17 }
 0x269   :  { %v351_v24 = vsel %vm350_vm5, %v346_v19, inf  ;;  %v421_v23 = vsel %vm420_vm6, %v416_v30, inf }
 0x26a   :  { %352 = vmin.xlane.f32.xlu1 %v351_v24  ;;  %422 = vmin.xlane.f32.xlu0 %v421_v23 }
 0x26b   :  { %v2565_v25 = vpop.xlane.xlu1 %460  ;;  %v2567_v31 = vpop.xlane.xlu0 %334 }
 0x26c   :  { %vm462_vm7 = vcmp.eq.f32.partialorder %v2448_v40, %v2565_v25  ;;  %vm336_vm8 = vcmp.eq.f32.partialorder %v2450_v13, %v2567_v31 }
 0x26d   :  { %v463_v32 = vsel %vm462_vm7, %v458_v26, inf  ;;  %v337_v33 = vsel %vm336_vm8, %v332_v22, inf  ;;  %v402_v26 = vcvt.s32.f32 %v400_v61  ;;  %v472_v22 = vcvt.s32.f32 %v470_v28 }
 0x26e   :  { %464 = vmin.xlane.f32.xlu1 %v463_v32  ;;  %338 = vmin.xlane.f32.xlu0 %v337_v33  ;;  %v514_v32 = vcvt.s32.f32 %v512_v55  ;;  %v388_v33 = vcvt.s32.f32 %v386_v58  ;;  %v425_v61 = vcvt.f32.s32 %v2557_v17  ;;  %v341_v17 = vcvt.f32.s32 %v2567_v31 }
 0x26f   :  { %v2575_v42 = vpop.xlane.xlu1 %376  ;;  %v2577_v12 = vpop.xlane.xlu0 %446 }
 0x270   :  { %vm378_vm9 = vcmp.eq.f32.partialorder %v2470_v36, %v2575_v42  ;;  %vm448_vm10 = vcmp.eq.f32.partialorder %v2472_v0, %v2577_v12  ;;  %v426_v55 = vshll.u32 %v425_v61, 16  ;;  %v342_v31 = vshll.u32 %v341_v17, 16 }
 0x271   :  { %v379_v40 = vsel %vm378_vm9, %v374_v56, inf  ;;  %v449_v13 = vsel %vm448_vm10, %v444_v14, inf  ;;  %v500_v56 = vcvt.s32.f32 %v498_v43 }
 0x272   :  { %380 = vmin.xlane.f32.xlu1 %v379_v40  ;;  %450 = vmin.xlane.f32.xlu0 %v449_v13 }
 0x273   :  { %v2585_v19 = vpop.xlane.xlu1 %488  ;;  %v2587_v30 = vpop.xlane.xlu0 %362 }
 0x274   :  { %vm490_vm11 = vcmp.eq.f32.partialorder %v2492_v20, %v2585_v19  ;;  %vm364_vm12 = vcmp.eq.f32.partialorder %v2494_v53, %v2587_v30 }
 0x275   :  { %v491_v0 = vsel %vm490_vm11, %v486_v21, inf  ;;  %v365_v36 = vsel %vm364_vm12, %v360_v27, inf  ;;  %v440_v21 = vshll.u32 %v439_v18, 16  ;;  %v355_v27 = vcvt.f32.s32 %v2555_v1 }
 0x276   :  { %492 = vmin.xlane.f32.xlu1 %v491_v0  ;;  %366 = vmin.xlane.f32.xlu0 %v365_v36  ;;  %v467_v1 = vcvt.f32.s32 %v2565_v25 }
 0x277   :  { %v2595_v24 = vpop.xlane.xlu1 %404  ;;  %v2597_v23 = vpop.xlane.xlu0 %474 }
 0x278   :  { %vm406_vm13 = vcmp.eq.f32.partialorder %v2514_v59, %v2595_v24  ;;  %vm476_vm14 = vcmp.eq.f32.partialorder %v2516_v44, %v2597_v23  ;;  %v468_v25 = vshll.u32 %v467_v1, 16 }
 0x279   :  { %v407_v53 = vsel %vm406_vm13, %v402_v26, inf  ;;  %v477_v20 = vsel %vm476_vm14, %v472_v22, inf }
 0x27a   :  { %408 = vmin.xlane.f32.xlu1 %v407_v53  ;;  %478 = vmin.xlane.f32.xlu0 %v477_v20 }
 0x27b   :  { %v2605_v29 = vpop.xlane.xlu1 %516  ;;  %v2607_v35 = vpop.xlane.xlu0 %390 }
 0x27c   :  { %vm518_vm15 = vcmp.eq.f32.partialorder %v2528_v48, %v2605_v29  ;;  %vm392_vm1 = vcmp.eq.f32.partialorder %v2530_v49, %v2607_v35  ;;  %v313_v49 = vcvt.f32.s32 %v2547_v50  ;;  %v356_v50 = vshll.u32 %v355_v27, 16 }
 0x27d   :  { %v519_v45 = vsel %vm518_vm15, %v514_v32, inf  ;;  %v393_v44 = vsel %vm392_vm1, %v388_v33, inf }
 0x27e   :  { %520 = vmin.xlane.f32.xlu1 %v519_v45  ;;  %394 = vmin.xlane.f32.xlu0 %v393_v44  ;;  %v383_v44 = vcvt.f32.s32 %v2575_v42 }
 0x27f   :  { %v2614_v59 = vpop.xlane.xlu0 %502 }
 0x280   :  { %vm504_vm2 = vcmp.eq.f32.partialorder %v2535_v60, %v2614_v59  ;;  %v314_v60 = vshll.u32 %v313_v49, 16  ;;  %v384_v42 = vshll.u32 %v383_v44, 16  ;;  %v509_v44 = vcvt.f32.s32 %v2614_v59 }
 0x281   :  { %v505_v14 = vsel %vm504_vm2, %v500_v56, inf  ;;  %v453_v56 = vcvt.f32.s32 %v2577_v12 }
 0x282   :  { %506 = vmin.xlane.f32.xlu0 %v505_v14 }
 0x283   :  { %v454_v12 = vshll.u32 %v453_v56, 16 }
 0x2ef   :  { %v325_v48 = vpop.xlane.xlu1 %324 }
 0x2f0   :  { %v326_v40 = vcvt.f32.s32 %v325_v48 }
 0x2f2   :  { %v329_v13 = vadd.s32 %v328_v37, %v326_v40  ;;  %v495_v40 = vcvt.f32.s32 %v2585_v19 }
 0x2f3   :  { %v437_v28 = vpop.xlane.xlu1 %436  ;;  %v311_v0 = vpop.xlane.xlu0 %310 }
 0x2f4   :  { %v438_v36 = vcvt.f32.s32 %v437_v28  ;;  %v312_v26 = vcvt.f32.s32 %v311_v0  ;;  %vm527_vm3 = vcmp.eq.s32.totalorder %v2231_v41, %v329_v13  ;;  %v369_v13 = vcvt.f32.s32 %v2587_v30 }
 0x2f5   :  { %v2625_v38 = vsel %vm527_vm3, -inf, %v2250_v47  ;;  %v496_v19 = vshll.u32 %v495_v40, 16 }
 0x2f6   :  { %v441_v39 = vadd.s32 %v440_v21, %v438_v36  ;;  %v315_v22 = vadd.s32 %v314_v60, %v312_v26  ;;  %592 = vmax.xlane.f32.xlu1 %v2625_v38  ;;  %v370_v30 = vshll.u32 %v369_v13, 16  ;;  %v411_v36 = vcvt.f32.s32 %v2595_v24 }
 0x2f7   :  { %v353_v58 = vpop.xlane.xlu1 %352  ;;  %v423_v53 = vpop.xlane.xlu0 %422  ;;  %v481_v26 = vcvt.f32.s32 %v2597_v23 }
 0x2f8   :  { %v354_v20 = vcvt.f32.s32 %v353_v58  ;;  %v424_v32 = vcvt.f32.s32 %v423_v53  ;;  %vm535_vm4 = vcmp.eq.s32.totalorder %v2231_v41, %v441_v39  ;;  %vm526_vm5 = vcmp.eq.s32.totalorder %v2231_v41, %v315_v22 }
 0x2f9   :  { %v2633_v47 = vsel %vm535_vm4, -inf, %v2245_v46  ;;  %v2636_v33 = vsel %vm526_vm5, -inf, %v2263_v51  ;;  %v412_v24 = vshll.u32 %v411_v36, 16  ;;  %v482_v23 = vshll.u32 %v481_v26, 16 }
 0x2fa   :  { %v357_v43 = vadd.s32 %v356_v50, %v354_v20  ;;  %v427_v45 = vadd.s32 %v426_v55, %v424_v32  ;;  %608 = vmax.xlane.f32.xlu1 %v2633_v47  ;;  %590 = vmax.xlane.f32.xlu0 %v2636_v33  ;;  %v523_v58 = vcvt.f32.s32 %v2605_v29  ;;  %v397_v53 = vcvt.f32.s32 %v2607_v35 }
 0x2fb   :  { %v465_v14 = vpop.xlane.xlu1 %464  ;;  %v339_v34 = vpop.xlane.xlu0 %338 }
 0x2fc   :  { %v466_v18 = vcvt.f32.s32 %v465_v14  ;;  %v340_v46 = vcvt.f32.s32 %v339_v34  ;;  %vm529_vm6 = vcmp.eq.s32.totalorder %v2231_v41, %v357_v43  ;;  %vm534_vm7 = vcmp.eq.s32.totalorder %v2231_v41, %v427_v45 }
 0x2fd   :  { %v2645_v51 = vsel %vm529_vm6, -inf, %v2268_v52  ;;  %v2648_v48 = vsel %vm534_vm7, -inf, %v2286_v57  ;;  %v524_v29 = vshll.u32 %v523_v58, 16  ;;  %v398_v35 = vshll.u32 %v397_v53, 16 }
 0x2fe   :  { %v469_v37 = vadd.s32 %v468_v25, %v466_v18  ;;  %v343_v49 = vadd.s32 %v342_v31, %v340_v46  ;;  %596 = vmax.xlane.f32.xlu1 %v2645_v51  ;;  %606 = vmax.xlane.f32.xlu0 %v2648_v48 }
 0x2ff   :  { %v381_v21 = vpop.xlane.xlu1 %380  ;;  %v451_v27 = vpop.xlane.xlu0 %450 }
 0x300   :  { %v382_v61 = vcvt.f32.s32 %v381_v21  ;;  %v452_v52 = vcvt.f32.s32 %v451_v27  ;;  %vm537_vm8 = vcmp.eq.s32.totalorder %v2231_v41, %v469_v37  ;;  %vm528_vm9 = vcmp.eq.s32.totalorder %v2231_v41, %v343_v49 }
 0x301   :  { %v2657_v57 = vsel %vm537_vm8, -inf, %v2277_v54  ;;  %v2660_v28 = vsel %vm528_vm9, -inf, %v2306_v63  ;;  %v510_v49 = vshll.u32 %v509_v44, 16 }
 0x302   :  { %v385_v0 = vadd.s32 %v384_v42, %v382_v61  ;;  %v455_v60 = vadd.s32 %v454_v12, %v452_v52  ;;  %612 = vmax.xlane.f32.xlu1 %v2657_v57  ;;  %594 = vmax.xlane.f32.xlu0 %v2660_v28 }
 0x303   :  { %v493_v39 = vpop.xlane.xlu1 %492  ;;  %v367_v22 = vpop.xlane.xlu0 %366 }
 0x304   :  { %v494_v50 = vcvt.f32.s32 %v493_v39  ;;  %v368_v54 = vcvt.f32.s32 %v367_v22  ;;  %vm531_vm10 = vcmp.eq.s32.totalorder %v2231_v41, %v385_v0  ;;  %vm536_vm11 = vcmp.eq.s32.totalorder %v2231_v41, %v455_v60 }
 0x305   :  { %v2669_v63 = vsel %vm531_vm10, -inf, %v2317_v2  ;;  %v2672_v55 = vsel %vm536_vm11, -inf, %v2301_v62 }
 0x306   :  { %v497_v1 = vadd.s32 %v496_v19, %v494_v50  ;;  %v371_v17 = vadd.s32 %v370_v30, %v368_v54  ;;  %600 = vmax.xlane.f32.xlu1 %v2669_v63  ;;  %610 = vmax.xlane.f32.xlu0 %v2672_v55 }
 0x307   :  { %v409_v20 = vpop.xlane.xlu1 %408  ;;  %v479_v32 = vpop.xlane.xlu0 %478 }
 0x308   :  { %v410_v43 = vcvt.f32.s32 %v409_v20  ;;  %v480_v2 = vcvt.f32.s32 %v479_v32  ;;  %vm539_vm12 = vcmp.eq.s32.totalorder %v2231_v41, %v497_v1  ;;  %vm530_vm13 = vcmp.eq.s32.totalorder %v2231_v41, %v371_v17 }
 0x309   :  { %v2681_v62 = vsel %vm539_vm12, -inf, %v2329_v4  ;;  %v2684_v45 = vsel %vm530_vm13, -inf, %v2322_v3 }
 0x30a   :  { %v413_v25 = vadd.s32 %v412_v24, %v410_v43  ;;  %v483_v31 = vadd.s32 %v482_v23, %v480_v2  ;;  %616 = vmax.xlane.f32.xlu1 %v2681_v62  ;;  %598 = vmax.xlane.f32.xlu0 %v2684_v45 }
 0x30b   :  { %v521_v56 = vpop.xlane.xlu1 %520  ;;  %v395_v14 = vpop.xlane.xlu0 %394 }
 0x30c   :  { %v522_v34 = vcvt.f32.s32 %v521_v56  ;;  %v396_v18 = vcvt.f32.s32 %v395_v14  ;;  %vm533_vm14 = vcmp.eq.s32.totalorder %v2231_v41, %v413_v25  ;;  %vm538_vm15 = vcmp.eq.s32.totalorder %v2231_v41, %v483_v31 }
 0x30d   :  { %v2692_v3 = vsel %vm533_vm14, -inf, %v2346_v7  ;;  %v2695_v4 = vsel %vm538_vm15, -inf, %v2334_v5 }
 0x30e   :  { %v525_v46 = vadd.s32 %v524_v29, %v522_v34  ;;  %v399_v37 = vadd.s32 %v398_v35, %v396_v18  ;;  %604 = vmax.xlane.f32.xlu1 %v2692_v3  ;;  %614 = vmax.xlane.f32.xlu0 %v2695_v4 }
 0x30f   :  { %v507_v59 = vpop.xlane.xlu0 %506 }
 0x310   :  { %v508_v42 = vcvt.f32.s32 %v507_v59  ;;  %vm541_vm1 = vcmp.eq.s32.totalorder %v2231_v41, %v525_v46  ;;  %vm532_vm2 = vcmp.eq.s32.totalorder %v2231_v41, %v399_v37 }
 0x311   :  { %v2702_v12 = vsel %vm541_vm1, -inf, %v2358_v9  ;;  %v2705_v7 = vsel %vm532_vm2, -inf, %v2341_v6 }
 0x312   :  { %v511_v5 = vadd.s32 %v510_v49, %v508_v42  ;;  %620 = vmax.xlane.f32.xlu1 %v2702_v12  ;;  %602 = vmax.xlane.f32.xlu0 %v2705_v7 }
 0x314   :  { %vm540_vm3 = vcmp.eq.s32.totalorder %v2231_v41, %v511_v5 }
 0x315   :  { %v2711_v40 = vsel %vm540_vm3, -inf, %v2353_v8 }
 0x316   :  { %618 = vmax.xlane.f32.xlu0 %v2711_v40 }
 0x383   :  { %v2714_v13 = vpop.xlane.xlu1 %592 }
 0x384   :  { %vm623_vm4 = vcmp.eq.f32.partialorder %v2625_v38, %v2714_v13 }
 0x385   :  { %v2719_v6 = vsel %vm623_vm4, %v2231_v41, 128 }
 0x386   :  { %v669_v9 = vshra.s32 %v2719_v6, 16 }
 0x387   :  { %v2722_v21 = vpop.xlane.xlu1 %608  ;;  %v2724_v27 = vpop.xlane.xlu0 %590 }
 0x388   :  { %4201 = vst [vmem:[#allocation41_spill] sm:$0xff] %v2724_v27  ;;  %vm631_vm5 = vcmp.eq.f32.partialorder %v2633_v47, %v2722_v21  ;;  %vm622_vm6 = vcmp.eq.f32.partialorder %v2636_v33, %v2724_v27  ;;  %v2730_v8 = vcvt.s32.f32 %v669_v9 }
 0x389   :  { %v2733_v61 = vsel %vm631_vm5, %v2231_v41, 128  ;;  %v2736_v52 = vsel %vm622_vm6, %v2231_v41, 128 }
 0x38a   :  { %v781_v0 = vshra.s32 %v2733_v61, 16  ;;  %v655_v60 = vshra.s32 %v2736_v52, 16  ;;  %672 = vmin.xlane.f32.xlu1 %v2730_v8 }
 0x38b   :  { %v2741_v19 = vpop.xlane.xlu1 %596  ;;  %v2743_v30 = vpop.xlane.xlu0 %606 }
 0x38c   :  { %4202 = vst [vmem:[#allocation42_spill] sm:$0xff] %v2741_v19  ;;  %4203 = vst [vmem:[#allocation43_spill] sm:$0xff] %v2743_v30  ;;  %vm625_vm7 = vcmp.eq.f32.partialorder %v2645_v51, %v2741_v19  ;;  %vm630_vm8 = vcmp.eq.f32.partialorder %v2648_v48, %v2743_v30  ;;  %v2749_v36 = vcvt.s32.f32 %v781_v0  ;;  %v2751_v26 = vcvt.s32.f32 %v655_v60 }
 0x38d   :  { %v2754_v39 = vsel %vm625_vm7, %v2231_v41, 128  ;;  %v2757_v22 = vsel %vm630_vm8, %v2231_v41, 128 }
 0x38e   :  { %v697_v50 = vshra.s32 %v2754_v39, 16  ;;  %v767_v54 = vshra.s32 %v2757_v22, 16  ;;  %784 = vmin.xlane.f32.xlu1 %v2749_v36  ;;  %658 = vmin.xlane.f32.xlu0 %v2751_v26  ;;  %v766_v27 = vand.u32 65535, %v2757_v22 }
 0x38f   :  { %v2763_v1 = vpop.xlane.xlu1 %612  ;;  %v2765_v17 = vpop.xlane.xlu0 %594 }
 0x390   :  { %4204 = vst [vmem:[#allocation44_spill] sm:$0xff] %v2763_v1  ;;  %4205 = vst [vmem:[#allocation45_spill] sm:$0xff] %v2765_v17  ;;  %vm633_vm9 = vcmp.eq.f32.partialorder %v2657_v57, %v2763_v1  ;;  %vm624_vm10 = vcmp.eq.f32.partialorder %v2660_v28, %v2765_v17  ;;  %v2771_v24 = vcvt.s32.f32 %v697_v50  ;;  %v2773_v23 = vcvt.s32.f32 %v767_v54 }
 0x391   :  { %v2776_v58 = vsel %vm633_vm9, %v2231_v41, 128  ;;  %v2779_v53 = vsel %vm624_vm10, %v2231_v41, 128  ;;  %v668_v17 = vand.u32 65535, %v2719_v6  ;;  %v654_v1 = vand.u32 65535, %v2736_v52 }
 0x392   :  { %v809_v20 = vshra.s32 %v2776_v58, 16  ;;  %v683_v32 = vshra.s32 %v2779_v53, 16  ;;  %700 = vmin.xlane.f32.xlu1 %v2771_v24  ;;  %770 = vmin.xlane.f32.xlu0 %v2773_v23  ;;  %v696_v6 = vand.u32 65535, %v2754_v39  ;;  %v808_v39 = vand.u32 65535, %v2776_v58 }
 0x393   :  { %v2785_v43 = vpop.xlane.xlu1 %600  ;;  %v2787_v2 = vpop.xlane.xlu0 %610  ;;  %v656_v15 = vcvt.s32.f32 %v654_v1  ;;  %v768_v1 = vcvt.s32.f32 %v766_v27  ;;  %v682_v22 = vand.u32 65535, %v2779_v53 }
 0x394   :  { %4206 = vst [vmem:[#allocation46_spill] sm:$0xff] %v2785_v43  ;;  %4207 = vst [vmem:[#allocation47_spill] sm:$0xff] %v2787_v2  ;;  %vm627_vm11 = vcmp.eq.f32.partialorder %v2669_v63, %v2785_v43  ;;  %vm632_vm12 = vcmp.eq.f32.partialorder %v2672_v55, %v2787_v2  ;;  %v2793_v25 = vcvt.s32.f32 %v809_v20  ;;  %v2795_v31 = vcvt.s32.f32 %v683_v32 }
 0x395   :  { %v2798_v29 = vsel %vm627_vm11, %v2231_v41, 128  ;;  %v2801_v35 = vsel %vm632_vm12, %v2231_v41, 128  ;;  %v684_v27 = vcvt.s32.f32 %v682_v22 }
 0x396   :  { %v725_v44 = vshra.s32 %v2798_v29, 16  ;;  %v795_v56 = vshra.s32 %v2801_v35, 16  ;;  %812 = vmin.xlane.f32.xlu1 %v2793_v25  ;;  %686 = vmin.xlane.f32.xlu0 %v2795_v31  ;;  %v724_v58 = vand.u32 65535, %v2798_v29  ;;  %v794_v53 = vand.u32 65535, %v2801_v35 }
 0x397   :  { %v2807_v14 = vpop.xlane.xlu1 %616  ;;  %v2809_v34 = vpop.xlane.xlu0 %598 }
 0x398   :  { %4208 = vst [vmem:[#allocation48_spill] sm:$0xff] %v2807_v14  ;;  %4209 = vst [vmem:[#allocation49_spill] sm:$0xff] %v2809_v34  ;;  %vm635_vm13 = vcmp.eq.f32.partialorder %v2681_v62, %v2807_v14  ;;  %vm626_vm14 = vcmp.eq.f32.partialorder %v2684_v45, %v2809_v34  ;;  %v2815_v18 = vcvt.s32.f32 %v725_v44  ;;  %v2817_v46 = vcvt.s32.f32 %v795_v56 }
 0x399   :  { %v2820_v37 = vsel %vm635_vm13, %v2231_v41, 128  ;;  %v2823_v59 = vsel %vm626_vm14, %v2231_v41, 128 }
 0x39a   :  { %v837_v49 = vshra.s32 %v2820_v37, 16  ;;  %v711_v42 = vshra.s32 %v2823_v59, 16  ;;  %728 = vmin.xlane.f32.xlu1 %v2815_v18  ;;  %798 = vmin.xlane.f32.xlu0 %v2817_v46  ;;  %v836_v29 = vand.u32 65535, %v2820_v37  ;;  %v710_v35 = vand.u32 65535, %v2823_v59 }
 0x39b   :  { %v2829_v5 = vpop.xlane.xlu1 %604  ;;  %v2831_v9 = vpop.xlane.xlu0 %614 }
 0x39c   :  { %4210 = vst [vmem:[#allocation50_spill] sm:$0xff] %v2829_v5  ;;  %4211 = vst [vmem:[#allocation51_spill] sm:$0xff] %v2831_v9  ;;  %vm629_vm15 = vcmp.eq.f32.partialorder %v2692_v3, %v2829_v5  ;;  %vm634_vm1 = vcmp.eq.f32.partialorder %v2695_v4, %v2831_v9  ;;  %v2837_v0 = vcvt.s32.f32 %v837_v49  ;;  %v2839_v60 = vcvt.s32.f32 %v711_v42 }
 0x39d   :  { %v2842_v50 = vsel %vm629_vm15, %v2231_v41, 128  ;;  %v2845_v54 = vsel %vm634_vm1, %v2231_v41, 128  ;;  %v712_v22 = vcvt.s32.f32 %v710_v35 }
 0x39e   :  { %v753_v20 = vshra.s32 %v2842_v50, 16  ;;  %v823_v32 = vshra.s32 %v2845_v54, 16  ;;  %840 = vmin.xlane.f32.xlu1 %v2837_v0  ;;  %714 = vmin.xlane.f32.xlu0 %v2839_v60  ;;  %v752_v37 = vand.u32 65535, %v2842_v50  ;;  %v822_v59 = vand.u32 65535, %v2845_v54 }
 0x39f   :  { %v2851_v44 = vpop.xlane.xlu1 %620  ;;  %v2853_v56 = vpop.xlane.xlu0 %602 }
 0x3a0   :  { %4212 = vst [vmem:[#allocation52_spill] sm:$0xff] %v2851_v44  ;;  %4213 = vst [vmem:[#allocation53_spill] sm:$0xff] %v2853_v56  ;;  %vm637_vm2 = vcmp.eq.f32.partialorder %v2702_v12, %v2851_v44  ;;  %vm628_vm3 = vcmp.eq.f32.partialorder %v2705_v7, %v2853_v56  ;;  %v2859_v49 = vcvt.s32.f32 %v753_v20  ;;  %v2861_v42 = vcvt.s32.f32 %v823_v32 }
 0x3a1   :  { %v2864_v9 = vsel %vm637_vm2, %v2231_v41, 128  ;;  %v2867_v5 = vsel %vm628_vm3, %v2231_v41, 128 }
 0x3a2   :  { %v865_v34 = vshra.s32 %v2864_v9, 16  ;;  %v739_v14 = vshra.s32 %v2867_v5, 16  ;;  %756 = vmin.xlane.f32.xlu1 %v2859_v49  ;;  %826 = vmin.xlane.f32.xlu0 %v2861_v42  ;;  %v864_v50 = vand.u32 65535, %v2864_v9  ;;  %v738_v54 = vand.u32 65535, %v2867_v5 }
 0x3a3   :  { %v2873_v44 = vpop.xlane.xlu0 %618 }
 0x3a4   :  { %4214 = vst [vmem:[#allocation54_spill] sm:$0xff] %v2873_v44  ;;  %vm636_vm4 = vcmp.eq.f32.partialorder %v2711_v40, %v2873_v44  ;;  %v2877_v20 = vcvt.s32.f32 %v865_v34  ;;  %v2879_v32 = vcvt.s32.f32 %v739_v14  ;;  %v670_v34 = vcvt.s32.f32 %v668_v17 }
 0x3a5   :  { %v2882_v56 = vsel %vm636_vm4, %v2231_v41, 128  ;;  %v780_v14 = vand.u32 65535, %v2733_v61  ;;  %v698_v17 = vcvt.s32.f32 %v696_v6 }
 0x3a6   :  { %v851_v2 = vshra.s32 %v2882_v56, 16  ;;  %868 = vmin.xlane.f32.xlu1 %v2877_v20  ;;  %742 = vmin.xlane.f32.xlu0 %v2879_v32  ;;  %v850_v9 = vand.u32 65535, %v2882_v56 }
 0x3a7   :  { %v782_v19 = vcvt.s32.f32 %v780_v14 }
 0x3a8   :  { %v2887_v43 = vcvt.s32.f32 %v851_v2 }
 0x3aa   :  { %854 = vmin.xlane.f32.xlu0 %v2887_v43 }
 0x417   :  { %v2891_v44 = vpop.xlane.xlu1 %672 }
 0x418   :  { %vm674_vm5 = vcmp.eq.f32.partialorder %v2730_v8, %v2891_v44  ;;  %v679_v56 = vcvt.f32.s32 %v2891_v44 }
 0x419   :  { %v675_v30 = vsel %vm674_vm5, %v670_v34, inf  ;;  %v810_v34 = vcvt.s32.f32 %v808_v39  ;;  %v838_v39 = vcvt.s32.f32 %v836_v29 }
 0x41a   :  { %676 = vmin.xlane.f32.xlu1 %v675_v30  ;;  %v680_v35 = vshll.u32 %v679_v56, 16 }
 0x41b   :  { %v2897_v16 = vpop.xlane.xlu1 %784  ;;  %v2899_v2 = vpop.xlane.xlu0 %658 }
 0x41c   :  { %vm786_vm6 = vcmp.eq.f32.partialorder %v2749_v36, %v2897_v16  ;;  %vm660_vm7 = vcmp.eq.f32.partialorder %v2751_v26, %v2899_v2  ;;  %v791_v29 = vcvt.f32.s32 %v2897_v16 }
 0x41d   :  { %v787_v61 = vsel %vm786_vm6, %v782_v19, inf  ;;  %v661_v8 = vsel %vm660_vm7, %v656_v15, inf }
 0x41e   :  { %788 = vmin.xlane.f32.xlu1 %v787_v61  ;;  %662 = vmin.xlane.f32.xlu0 %v661_v8  ;;  %v726_v61 = vcvt.s32.f32 %v724_v58  ;;  %v796_v8 = vcvt.s32.f32 %v794_v53 }
 0x41f   :  { %v2907_v52 = vpop.xlane.xlu1 %700  ;;  %v2909_v30 = vpop.xlane.xlu0 %770 }
 0x420   :  { %vm702_vm8 = vcmp.eq.f32.partialorder %v2771_v24, %v2907_v52  ;;  %vm772_vm9 = vcmp.eq.f32.partialorder %v2773_v23, %v2909_v30 }
 0x421   :  { %v703_v19 = vsel %vm702_vm8, %v698_v17, inf  ;;  %v773_v15 = vsel %vm772_vm9, %v768_v1, inf }
 0x422   :  { %704 = vmin.xlane.f32.xlu1 %v703_v19  ;;  %774 = vmin.xlane.f32.xlu0 %v773_v15 }
 0x423   :  { %v2917_v36 = vpop.xlane.xlu1 %812  ;;  %v2919_v26 = vpop.xlane.xlu0 %686 }
 0x424   :  { %vm814_vm10 = vcmp.eq.f32.partialorder %v2793_v25, %v2917_v36  ;;  %vm688_vm11 = vcmp.eq.f32.partialorder %v2795_v31, %v2919_v26 }
 0x425   :  { %v815_v24 = vsel %vm814_vm10, %v810_v34, inf  ;;  %v689_v23 = vsel %vm688_vm11, %v684_v27, inf  ;;  %v754_v34 = vcvt.s32.f32 %v752_v37  ;;  %v824_v27 = vcvt.s32.f32 %v822_v59 }
 0x426   :  { %816 = vmin.xlane.f32.xlu1 %v815_v24  ;;  %690 = vmin.xlane.f32.xlu0 %v689_v23  ;;  %v866_v24 = vcvt.s32.f32 %v864_v50  ;;  %v740_v23 = vcvt.s32.f32 %v738_v54  ;;  %v777_v37 = vcvt.f32.s32 %v2909_v30  ;;  %v693_v30 = vcvt.f32.s32 %v2919_v26 }
 0x427   :  { %v2927_v14 = vpop.xlane.xlu1 %728  ;;  %v2929_v6 = vpop.xlane.xlu0 %798 }
 0x428   :  { %vm730_vm12 = vcmp.eq.f32.partialorder %v2815_v18, %v2927_v14  ;;  %vm800_vm13 = vcmp.eq.f32.partialorder %v2817_v46, %v2929_v6  ;;  %v778_v50 = vshll.u32 %v777_v37, 16  ;;  %v694_v26 = vshll.u32 %v693_v30, 16 }
 0x429   :  { %v731_v25 = vsel %vm730_vm12, %v726_v61, inf  ;;  %v801_v31 = vsel %vm800_vm13, %v796_v8, inf  ;;  %v852_v61 = vcvt.s32.f32 %v850_v9 }
 0x42a   :  { %732 = vmin.xlane.f32.xlu1 %v731_v25  ;;  %802 = vmin.xlane.f32.xlu0 %v801_v31 }
 0x42b   :  { %v2937_v17 = vpop.xlane.xlu1 %840  ;;  %v2939_v1 = vpop.xlane.xlu0 %714 }
 0x42c   :  { %vm842_vm14 = vcmp.eq.f32.partialorder %v2837_v0, %v2937_v17  ;;  %vm716_vm15 = vcmp.eq.f32.partialorder %v2839_v60, %v2939_v1 }
 0x42d   :  { %v843_v18 = vsel %vm842_vm14, %v838_v39, inf  ;;  %v717_v46 = vsel %vm716_vm15, %v712_v22, inf  ;;  %v792_v39 = vshll.u32 %v791_v29, 16  ;;  %v707_v22 = vcvt.f32.s32 %v2907_v52 }
 0x42e   :  { %844 = vmin.xlane.f32.xlu1 %v843_v18  ;;  %718 = vmin.xlane.f32.xlu0 %v717_v46  ;;  %v819_v52 = vcvt.f32.s32 %v2917_v36 }
 0x42f   :  { %v2947_v19 = vpop.xlane.xlu1 %756  ;;  %v2949_v15 = vpop.xlane.xlu0 %826 }
 0x430   :  { %vm758_vm1 = vcmp.eq.f32.partialorder %v2859_v49, %v2947_v19  ;;  %vm828_vm2 = vcmp.eq.f32.partialorder %v2861_v42, %v2949_v15  ;;  %v820_v36 = vshll.u32 %v819_v52, 16 }
 0x431   :  { %v759_v0 = vsel %vm758_vm1, %v754_v34, inf  ;;  %v829_v60 = vsel %vm828_vm2, %v824_v27, inf }
 0x432   :  { %760 = vmin.xlane.f32.xlu1 %v759_v0  ;;  %830 = vmin.xlane.f32.xlu0 %v829_v60 }
 0x433   :  { %v2957_v58 = vpop.xlane.xlu1 %868  ;;  %v2959_v53 = vpop.xlane.xlu0 %742 }
 0x434   :  { %vm870_vm3 = vcmp.eq.f32.partialorder %v2877_v20, %v2957_v58  ;;  %vm744_vm4 = vcmp.eq.f32.partialorder %v2879_v32, %v2959_v53  ;;  %v665_v32 = vcvt.f32.s32 %v2899_v2  ;;  %v708_v2 = vshll.u32 %v707_v22, 16 }
 0x435   :  { %v871_v5 = vsel %vm870_vm3, %v866_v24, inf  ;;  %v745_v49 = vsel %vm744_vm4, %v740_v23, inf }
 0x436   :  { %872 = vmin.xlane.f32.xlu1 %v871_v5  ;;  %746 = vmin.xlane.f32.xlu0 %v745_v49  ;;  %v735_v49 = vcvt.f32.s32 %v2927_v14 }
 0x437   :  { %v2966_v42 = vpop.xlane.xlu0 %854 }
 0x438   :  { %vm856_vm5 = vcmp.eq.f32.partialorder %v2887_v43, %v2966_v42  ;;  %v666_v43 = vshll.u32 %v665_v32, 16  ;;  %v736_v14 = vshll.u32 %v735_v49, 16  ;;  %v861_v49 = vcvt.f32.s32 %v2966_v42 }
 0x439   :  { %v857_v8 = vsel %vm856_vm5, %v852_v61, inf  ;;  %v805_v61 = vcvt.f32.s32 %v2929_v6 }
 0x43a   :  { %858 = vmin.xlane.f32.xlu0 %v857_v8 }
 0x43b   :  { %v806_v6 = vshll.u32 %v805_v61, 16 }
 0x4a7   :  { %v677_v20 = vpop.xlane.xlu1 %676 }
 0x4a8   :  { %v678_v25 = vcvt.f32.s32 %v677_v20 }
 0x4aa   :  { %v681_v31 = vadd.s32 %v680_v35, %v678_v25  ;;  %v847_v25 = vcvt.f32.s32 %v2937_v17 }
 0x4ab   :  { %v789_v59 = vpop.xlane.xlu1 %788  ;;  %v663_v18 = vpop.xlane.xlu0 %662 }
 0x4ac   :  { %v790_v46 = vcvt.f32.s32 %v789_v59  ;;  %v664_v34 = vcvt.f32.s32 %v663_v18  ;;  %vm879_vm6 = vcmp.eq.s32.totalorder %v2231_v41, %v681_v31  ;;  %v721_v31 = vcvt.f32.s32 %v2939_v1 }
 0x4ad   :  { %v2977_v16 = vsel %vm879_vm6, -inf, %v2625_v38  ;;  %v848_v17 = vshll.u32 %v847_v25, 16 }
 0x4ae   :  { %v793_v44 = vadd.s32 %v792_v39, %v790_v46  ;;  %v667_v27 = vadd.s32 %v666_v43, %v664_v34  ;;  %944 = vmax.xlane.f32.xlu1 %v2977_v16  ;;  %v722_v1 = vshll.u32 %v721_v31, 16  ;;  %v763_v46 = vcvt.f32.s32 %v2947_v19 }
 0x4af   :  { %v705_v54 = vpop.xlane.xlu1 %704  ;;  %v775_v0 = vpop.xlane.xlu0 %774  ;;  %v833_v34 = vcvt.f32.s32 %v2949_v15 }
 0x4b0   :  { %v706_v60 = vcvt.f32.s32 %v705_v54  ;;  %v776_v24 = vcvt.f32.s32 %v775_v0  ;;  %vm887_vm7 = vcmp.eq.s32.totalorder %v2231_v41, %v793_v44  ;;  %vm878_vm8 = vcmp.eq.s32.totalorder %v2231_v41, %v667_v27 }
 0x4b1   :  { %v2985_v38 = vsel %vm887_vm7, -inf, %v2633_v47  ;;  %v2988_v23 = vsel %vm878_vm8, -inf, %v2636_v33  ;;  %v764_v19 = vshll.u32 %v763_v46, 16  ;;  %v834_v15 = vshll.u32 %v833_v34, 16 }
 0x4b2   :  { %v709_v9 = vadd.s32 %v708_v2, %v706_v60  ;;  %v779_v5 = vadd.s32 %v778_v50, %v776_v24  ;;  %960 = vmax.xlane.f32.xlu1 %v2985_v38  ;;  %942 = vmax.xlane.f32.xlu0 %v2988_v23  ;;  %v875_v54 = vcvt.f32.s32 %v2957_v58  ;;  %v749_v0 = vcvt.f32.s32 %v2959_v53 }
 0x4b3   :  { %v817_v8 = vpop.xlane.xlu1 %816  ;;  %v691_v56 = vpop.xlane.xlu0 %690 }
 0x4b4   :  { %v818_v29 = vcvt.f32.s32 %v817_v8  ;;  %v692_v47 = vcvt.f32.s32 %v691_v56  ;;  %vm881_vm9 = vcmp.eq.s32.totalorder %v2231_v41, %v709_v9  ;;  %vm886_vm10 = vcmp.eq.s32.totalorder %v2231_v41, %v779_v5 }
 0x4b5   :  { %v2997_v33 = vsel %vm881_vm9, -inf, %v2645_v51  ;;  %v3000_v20 = vsel %vm886_vm10, -inf, %v2648_v48  ;;  %v876_v58 = vshll.u32 %v875_v54, 16  ;;  %v750_v53 = vshll.u32 %v749_v0, 16 }
 0x4b6   :  { %v821_v35 = vadd.s32 %v820_v36, %v818_v29  ;;  %v695_v32 = vadd.s32 %v694_v26, %v692_v47  ;;  %948 = vmax.xlane.f32.xlu1 %v2997_v33  ;;  %958 = vmax.xlane.f32.xlu0 %v3000_v20 }
 0x4b7   :  { %v733_v39 = vpop.xlane.xlu1 %732  ;;  %v803_v22 = vpop.xlane.xlu0 %802 }
 0x4b8   :  { %v734_v37 = vcvt.f32.s32 %v733_v39  ;;  %v804_v51 = vcvt.f32.s32 %v803_v22  ;;  %vm889_vm11 = vcmp.eq.s32.totalorder %v2231_v41, %v821_v35  ;;  %vm880_vm12 = vcmp.eq.s32.totalorder %v2231_v41, %v695_v32 }
 0x4b9   :  { %v3009_v48 = vsel %vm889_vm11, -inf, %v2657_v57  ;;  %v3012_v59 = vsel %vm880_vm12, -inf, %v2660_v28  ;;  %v862_v32 = vshll.u32 %v861_v49, 16 }
 0x4ba   :  { %v737_v18 = vadd.s32 %v736_v14, %v734_v37  ;;  %v807_v43 = vadd.s32 %v806_v6, %v804_v51  ;;  %964 = vmax.xlane.f32.xlu1 %v3009_v48  ;;  %946 = vmax.xlane.f32.xlu0 %v3012_v59 }
 0x4bb   :  { %v845_v44 = vpop.xlane.xlu1 %844  ;;  %v719_v27 = vpop.xlane.xlu0 %718 }
 0x4bc   :  { %v846_v2 = vcvt.f32.s32 %v845_v44  ;;  %v720_v57 = vcvt.f32.s32 %v719_v27  ;;  %vm883_vm13 = vcmp.eq.s32.totalorder %v2231_v41, %v737_v18  ;;  %vm888_vm14 = vcmp.eq.s32.totalorder %v2231_v41, %v807_v43 }
 0x4bd   :  { %v3021_v28 = vsel %vm883_vm13, -inf, %v2669_v63  ;;  %v3024_v50 = vsel %vm888_vm14, -inf, %v2672_v55 }
 0x4be   :  { %v849_v52 = vadd.s32 %v848_v17, %v846_v2  ;;  %v723_v30 = vadd.s32 %v722_v1, %v720_v57  ;;  %952 = vmax.xlane.f32.xlu1 %v3021_v28  ;;  %962 = vmax.xlane.f32.xlu0 %v3024_v50 }
 0x4bf   :  { %v761_v60 = vpop.xlane.xlu1 %760  ;;  %v831_v24 = vpop.xlane.xlu0 %830 }
 0x4c0   :  { %v762_v9 = vcvt.f32.s32 %v761_v60  ;;  %v832_v63 = vcvt.f32.s32 %v831_v24  ;;  %vm891_vm15 = vcmp.eq.s32.totalorder %v2231_v41, %v849_v52  ;;  %vm882_vm1 = vcmp.eq.s32.totalorder %v2231_v41, %v723_v30 }
 0x4c1   :  { %v3033_v55 = vsel %vm891_vm15, -inf, %v2681_v62  ;;  %v3036_v5 = vsel %vm882_vm1, -inf, %v2684_v45 }
 0x4c2   :  { %v765_v36 = vadd.s32 %v764_v19, %v762_v9  ;;  %v835_v26 = vadd.s32 %v834_v15, %v832_v63  ;;  %968 = vmax.xlane.f32.xlu1 %v3033_v55  ;;  %950 = vmax.xlane.f32.xlu0 %v3036_v5 }
 0x4c3   :  { %v873_v61 = vpop.xlane.xlu1 %872  ;;  %v747_v8 = vpop.xlane.xlu0 %746 }
 0x4c4   :  { %v874_v56 = vcvt.f32.s32 %v873_v61  ;;  %v748_v29 = vcvt.f32.s32 %v747_v8  ;;  %vm885_vm2 = vcmp.eq.s32.totalorder %v2231_v41, %v765_v36  ;;  %vm890_vm3 = vcmp.eq.s32.totalorder %v2231_v41, %v835_v26 }
 0x4c5   :  { %v3044_v62 = vsel %vm885_vm2, -inf, %v2692_v3  ;;  %v3047_v45 = vsel %vm890_vm3, -inf, %v2695_v4 }
 0x4c6   :  { %v877_v47 = vadd.s32 %v876_v58, %v874_v56  ;;  %v751_v35 = vadd.s32 %v750_v53, %v748_v29  ;;  %956 = vmax.xlane.f32.xlu1 %v3044_v62  ;;  %966 = vmax.xlane.f32.xlu0 %v3047_v45 }
 0x4c7   :  { %v859_v42 = vpop.xlane.xlu0 %858 }
 0x4c8   :  { %v860_v14 = vcvt.f32.s32 %v859_v42  ;;  %vm893_vm4 = vcmp.eq.s32.totalorder %v2231_v41, %v877_v47  ;;  %vm884_vm5 = vcmp.eq.s32.totalorder %v2231_v41, %v751_v35 }
 0x4c9   :  { %v3054_v6 = vsel %vm893_vm4, -inf, %v2702_v12  ;;  %v3057_v3 = vsel %vm884_vm5, -inf, %v2705_v7 }
 0x4ca   :  { %v863_v4 = vadd.s32 %v862_v32, %v860_v14  ;;  %972 = vmax.xlane.f32.xlu1 %v3054_v6  ;;  %954 = vmax.xlane.f32.xlu0 %v3057_v3 }
 0x4cc   :  { %vm892_vm6 = vcmp.eq.s32.totalorder %v2231_v41, %v863_v4 }
 0x4cd   :  { %v3063_v25 = vsel %vm892_vm6, -inf, %v2711_v40 }
 0x4ce   :  { %970 = vmax.xlane.f32.xlu0 %v3063_v25 }
 0x53b   :  { %v3066_v31 = vpop.xlane.xlu1 %944 }
 0x53c   :  { %vm975_vm7 = vcmp.eq.f32.partialorder %v2977_v16, %v3066_v31 }
 0x53d   :  { %v3071_v12 = vsel %vm975_vm7, %v2231_v41, 128 }
 0x53e   :  { %v1021_v7 = vshra.s32 %v3071_v12, 16 }
 0x53f   :  { %v3074_v39 = vpop.xlane.xlu1 %960  ;;  %v3076_v22 = vpop.xlane.xlu0 %942 }
 0x540   :  { %4215 = vst [vmem:[#allocation55_spill] sm:$0xff] %v3074_v39  ;;  %4216 = vst [vmem:[#allocation56_spill] sm:$0xff] %v3076_v22  ;;  %vm983_vm8 = vcmp.eq.f32.partialorder %v2985_v38, %v3074_v39  ;;  %vm974_vm9 = vcmp.eq.f32.partialorder %v2988_v23, %v3076_v22  ;;  %v3088_v51 = vcvt.s32.f32 %v1021_v7 }
 0x541   :  { %v3083_v40 = vsel %vm983_vm8, %v2231_v41, 128  ;;  %v3086_v37 = vsel %vm974_vm9, %v2231_v41, 128 }
 0x542   :  { %v1133_v18 = vshra.s32 %v3083_v40, 16  ;;  %v1007_v43 = vshra.s32 %v3086_v37, 16  ;;  %1024 = vmin.xlane.f32.xlu1 %v3088_v51 }
 0x543   :  { %v3093_v17 = vpop.xlane.xlu1 %948  ;;  %v3095_v1 = vpop.xlane.xlu0 %958 }
 0x544   :  { %4217 = vst [vmem:[#allocation57_spill] sm:$0xff] %v3093_v17  ;;  %4218 = vst [vmem:[#allocation58_spill] sm:$0xff] %v3095_v1  ;;  %vm977_vm10 = vcmp.eq.f32.partialorder %v2997_v33, %v3093_v17  ;;  %vm982_vm11 = vcmp.eq.f32.partialorder %v3000_v20, %v3095_v1  ;;  %v3107_v44 = vcvt.s32.f32 %v1133_v18  ;;  %v3109_v27 = vcvt.s32.f32 %v1007_v43 }
 0x545   :  { %v3102_v46 = vsel %vm977_vm10, %v2231_v41, 128  ;;  %v3105_v34 = vsel %vm982_vm11, %v2231_v41, 128 }
 0x546   :  { %v1049_v2 = vshra.s32 %v3102_v46, 16  ;;  %v1119_v57 = vshra.s32 %v3105_v34, 16  ;;  %1136 = vmin.xlane.f32.xlu1 %v3107_v44  ;;  %1010 = vmin.xlane.f32.xlu0 %v3109_v27  ;;  %v1048_v17 = vand.u32 65535, %v3102_v46 }
 0x547   :  { %v3115_v52 = vpop.xlane.xlu1 %964  ;;  %v3117_v30 = vpop.xlane.xlu0 %946 }
 0x548   :  { %4219 = vst [vmem:[#allocation59_spill] sm:$0xff] %v3115_v52  ;;  %4220 = vst [vmem:[#allocation60_spill] sm:$0xff] %v3117_v30  ;;  %vm985_vm12 = vcmp.eq.f32.partialorder %v3009_v48, %v3115_v52  ;;  %vm976_vm13 = vcmp.eq.f32.partialorder %v3012_v59, %v3117_v30  ;;  %v3129_v54 = vcvt.s32.f32 %v1049_v2  ;;  %v3131_v0 = vcvt.s32.f32 %v1119_v57 }
 0x549   :  { %v3124_v19 = vsel %vm985_vm12, %v2231_v41, 128  ;;  %v3127_v15 = vsel %vm976_vm13, %v2231_v41, 128  ;;  %v1020_v30 = vand.u32 65535, %v3071_v12 }
 0x54a   :  { %v1161_v60 = vshra.s32 %v3124_v19, 16  ;;  %v1035_v24 = vshra.s32 %v3127_v15, 16  ;;  %1052 = vmin.xlane.f32.xlu1 %v3129_v54  ;;  %1122 = vmin.xlane.f32.xlu0 %v3131_v0  ;;  %v1034_v46 = vand.u32 65535, %v3127_v15 }
 0x54b   :  { %v3137_v9 = vpop.xlane.xlu1 %952  ;;  %v3139_v63 = vpop.xlane.xlu0 %962 }
 0x54c   :  { %4221 = vst [vmem:[#allocation61_spill] sm:$0xff] %v3137_v9  ;;  %4222 = vst [vmem:[#allocation62_spill] sm:$0xff] %v3139_v63  ;;  %vm979_vm14 = vcmp.eq.f32.partialorder %v3021_v28, %v3137_v9  ;;  %vm984_vm15 = vcmp.eq.f32.partialorder %v3024_v50, %v3139_v63  ;;  %v3151_v58 = vcvt.s32.f32 %v1161_v60  ;;  %v3153_v53 = vcvt.s32.f32 %v1035_v24 }
 0x54d   :  { %v3146_v36 = vsel %vm979_vm14, %v2231_v41, 128  ;;  %v3149_v26 = vsel %vm984_vm15, %v2231_v41, 128 }
 0x54e   :  { %v1077_v49 = vshra.s32 %v3146_v36, 16  ;;  %v1147_v61 = vshra.s32 %v3149_v26, 16  ;;  %1164 = vmin.xlane.f32.xlu1 %v3151_v58  ;;  %1038 = vmin.xlane.f32.xlu0 %v3153_v53  ;;  %v1146_v15 = vand.u32 65535, %v3149_v26 }
 0x54f   :  { %v3159_v8 = vpop.xlane.xlu1 %968  ;;  %v3161_v56 = vpop.xlane.xlu0 %950 }
 0x550   :  { %4223 = vst [vmem:[#allocation63_spill] sm:$0xff] %v3159_v8  ;;  %4224 = vst [vmem:[#allocation64_spill] sm:$0xff] %v3161_v56  ;;  %vm987_vm1 = vcmp.eq.f32.partialorder %v3033_v55, %v3159_v8  ;;  %vm978_vm2 = vcmp.eq.f32.partialorder %v3036_v5, %v3161_v56  ;;  %v3173_v35 = vcvt.s32.f32 %v1077_v49  ;;  %v3175_v42 = vcvt.s32.f32 %v1147_v61 }
 0x551   :  { %v3168_v29 = vsel %vm987_vm1, %v2231_v41, 128  ;;  %v3171_v47 = vsel %vm978_vm2, %v2231_v41, 128 }
 0x552   :  { %v1189_v32 = vshra.s32 %v3168_v29, 16  ;;  %v1063_v14 = vshra.s32 %v3171_v47, 16  ;;  %1080 = vmin.xlane.f32.xlu1 %v3173_v35  ;;  %1150 = vmin.xlane.f32.xlu0 %v3175_v42  ;;  %v1062_v26 = vand.u32 65535, %v3171_v47 }
 0x553   :  { %v3181_v4 = vpop.xlane.xlu1 %956  ;;  %v3183_v7 = vpop.xlane.xlu0 %966 }
 0x554   :  { %4225 = vst [vmem:[#allocation65_spill] sm:$0xff] %v3181_v4  ;;  %4226 = vst [vmem:[#allocation66_spill] sm:$0xff] %v3183_v7  ;;  %vm981_vm3 = vcmp.eq.f32.partialorder %v3044_v62, %v3181_v4  ;;  %vm986_vm4 = vcmp.eq.f32.partialorder %v3047_v45, %v3183_v7  ;;  %v3195_v2 = vcvt.s32.f32 %v1189_v32  ;;  %v3197_v57 = vcvt.s32.f32 %v1063_v14 }
 0x555   :  { %v3190_v18 = vsel %vm981_vm3, %v2231_v41, 128  ;;  %v3193_v43 = vsel %vm986_vm4, %v2231_v41, 128 }
 0x556   :  { %v1105_v60 = vshra.s32 %v3190_v18, 16  ;;  %v1175_v24 = vshra.s32 %v3193_v43, 16  ;;  %1192 = vmin.xlane.f32.xlu1 %v3195_v2  ;;  %1066 = vmin.xlane.f32.xlu0 %v3197_v57  ;;  %v1174_v47 = vand.u32 65535, %v3193_v43 }
 0x557   :  { %v3203_v49 = vpop.xlane.xlu1 %972  ;;  %v3205_v61 = vpop.xlane.xlu0 %954 }
 0x558   :  { %4227 = vst [vmem:[#allocation67_spill] sm:$0xff] %v3203_v49  ;;  %4228 = vst [vmem:[#allocation68_spill] sm:$0xff] %v3205_v61  ;;  %vm989_vm5 = vcmp.eq.f32.partialorder %v3054_v6, %v3203_v49  ;;  %vm980_vm6 = vcmp.eq.f32.partialorder %v3057_v3, %v3205_v61  ;;  %v3217_v7 = vcvt.s32.f32 %v1105_v60  ;;  %v3219_v4 = vcvt.s32.f32 %v1175_v24 }
 0x559   :  { %v3212_v32 = vsel %vm989_vm5, %v2231_v41, 128  ;;  %v3215_v14 = vsel %vm980_vm6, %v2231_v41, 128 }
 0x55a   :  { %v1217_v56 = vshra.s32 %v3212_v32, 16  ;;  %v1091_v8 = vshra.s32 %v3215_v14, 16  ;;  %1108 = vmin.xlane.f32.xlu1 %v3217_v7  ;;  %1178 = vmin.xlane.f32.xlu0 %v3219_v4  ;;  %v1090_v43 = vand.u32 65535, %v3215_v14 }
 0x55b   :  { %v3225_v49 = vpop.xlane.xlu0 %970 }
 0x55c   :  { %4229 = vst [vmem:[#allocation69_spill] sm:$0xff] %v3225_v49  ;;  %vm988_vm7 = vcmp.eq.f32.partialorder %v3063_v25, %v3225_v49  ;;  %v3229_v61 = vcvt.s32.f32 %v1217_v56  ;;  %v3234_v24 = vcvt.s32.f32 %v1091_v8  ;;  %v1132_v56 = vand.u32 65535, %v3083_v40 }
 0x55d   :  { %v3232_v60 = vsel %vm988_vm7, %v2231_v41, 128  ;;  %v1006_v49 = vand.u32 65535, %v3086_v37  ;;  %v1022_v8 = vcvt.s32.f32 %v1020_v30 }
 0x55e   :  { %v1203_v63 = vshra.s32 %v3232_v60, 16  ;;  %1220 = vmin.xlane.f32.xlu1 %v3229_v61  ;;  %1094 = vmin.xlane.f32.xlu0 %v3234_v24  ;;  %v1134_v12 = vcvt.s32.f32 %v1132_v56  ;;  %v1050_v56 = vcvt.s32.f32 %v1048_v17 }
 0x55f   :  { %v1008_v40 = vcvt.s32.f32 %v1006_v49 }
 0x560   :  { %v3239_v9 = vcvt.s32.f32 %v1203_v63  ;;  %v1118_v63 = vand.u32 65535, %v3105_v34 }
 0x562   :  { %1206 = vmin.xlane.f32.xlu0 %v3239_v9  ;;  %v1120_v49 = vcvt.s32.f32 %v1118_v63  ;;  %v1036_v63 = vcvt.s32.f32 %v1034_v46 }
 0x5cf   :  { %v3245_v52 = vpop.xlane.xlu1 %1024 }
 0x5d0   :  { %vm1026_vm8 = vcmp.eq.f32.partialorder %v3088_v51, %v3245_v52 }
 0x5d1   :  { %v1027_v1 = vsel %vm1026_vm8, %v1022_v8, inf }
 0x5d2   :  { %1028 = vmin.xlane.f32.xlu1 %v1027_v1  ;;  %v1160_v1 = vand.u32 65535, %v3124_v19  ;;  %v1076_v19 = vand.u32 65535, %v3146_v36  ;;  %v1188_v36 = vand.u32 65535, %v3168_v29  ;;  %v1104_v29 = vand.u32 65535, %v3190_v18 }
 0x5d3   :  { %v3251_v22 = vpop.xlane.xlu1 %1136  ;;  %v3253_v39 = vpop.xlane.xlu0 %1010  ;;  %v1216_v18 = vand.u32 65535, %v3212_v32  ;;  %v1202_v32 = vand.u32 65535, %v3232_v60 }
 0x5d4   :  { %vm1138_vm9 = vcmp.eq.f32.partialorder %v3107_v44, %v3251_v22  ;;  %vm1012_vm10 = vcmp.eq.f32.partialorder %v3109_v27, %v3253_v39  ;;  %v1162_v17 = vcvt.s32.f32 %v1160_v1  ;;  %v1148_v1 = vcvt.s32.f32 %v1146_v15 }
 0x5d5   :  { %v1139_v37 = vsel %vm1138_vm9, %v1134_v12, inf  ;;  %v1013_v51 = vsel %vm1012_vm10, %v1008_v40, inf  ;;  %v1106_v15 = vcvt.s32.f32 %v1104_v29 }
 0x5d6   :  { %1140 = vmin.xlane.f32.xlu1 %v1139_v37  ;;  %1014 = vmin.xlane.f32.xlu0 %v1013_v51  ;;  %v1078_v51 = vcvt.s32.f32 %v1076_v19 }
 0x5d7   :  { %v3261_v34 = vpop.xlane.xlu1 %1052  ;;  %v3263_v30 = vpop.xlane.xlu0 %1122 }
 0x5d8   :  { %vm1054_vm11 = vcmp.eq.f32.partialorder %v3129_v54, %v3261_v34  ;;  %vm1124_vm12 = vcmp.eq.f32.partialorder %v3131_v0, %v3263_v30 }
 0x5d9   :  { %v1055_v44 = vsel %vm1054_vm11, %v1050_v56, inf  ;;  %v1125_v27 = vsel %vm1124_vm12, %v1120_v49, inf  ;;  %v1190_v49 = vcvt.s32.f32 %v1188_v36 }
 0x5da   :  { %1056 = vmin.xlane.f32.xlu1 %v1055_v44  ;;  %1126 = vmin.xlane.f32.xlu0 %v1125_v27  ;;  %v1064_v44 = vcvt.s32.f32 %v1062_v26  ;;  %v1204_v26 = vcvt.s32.f32 %v1202_v32 }
 0x5db   :  { %v3271_v8 = vpop.xlane.xlu1 %1164  ;;  %v3273_v12 = vpop.xlane.xlu0 %1038 }
 0x5dc   :  { %vm1166_vm13 = vcmp.eq.f32.partialorder %v3151_v58, %v3271_v8  ;;  %vm1040_vm14 = vcmp.eq.f32.partialorder %v3153_v53, %v3273_v12 }
 0x5dd   :  { %v1167_v54 = vsel %vm1166_vm13, %v1162_v17, inf  ;;  %v1041_v0 = vsel %vm1040_vm14, %v1036_v63, inf  ;;  %v1176_v17 = vcvt.s32.f32 %v1174_v47 }
 0x5de   :  { %1168 = vmin.xlane.f32.xlu1 %v1167_v54  ;;  %1042 = vmin.xlane.f32.xlu0 %v1041_v0  ;;  %v1218_v54 = vcvt.s32.f32 %v1216_v18  ;;  %v1092_v0 = vcvt.s32.f32 %v1090_v43 }
 0x5df   :  { %v3281_v40 = vpop.xlane.xlu1 %1080  ;;  %v3283_v37 = vpop.xlane.xlu0 %1150 }
 0x5e0   :  { %vm1082_vm15 = vcmp.eq.f32.partialorder %v3173_v35, %v3281_v40  ;;  %vm1152_vm1 = vcmp.eq.f32.partialorder %v3175_v42, %v3283_v37 }
 0x5e1   :  { %v1083_v58 = vsel %vm1082_vm15, %v1078_v51, inf  ;;  %v1153_v53 = vsel %vm1152_vm1, %v1148_v1, inf  ;;  %v1031_v51 = vcvt.f32.s32 %v3245_v52  ;;  %v1143_v1 = vcvt.f32.s32 %v3251_v22 }
 0x5e2   :  { %1084 = vmin.xlane.f32.xlu1 %v1083_v58  ;;  %1154 = vmin.xlane.f32.xlu0 %v1153_v53 }
 0x5e3   :  { %v3291_v46 = vpop.xlane.xlu1 %1192  ;;  %v3293_v56 = vpop.xlane.xlu0 %1066  ;;  %v1032_v58 = vshll.u32 %v1031_v51, 16  ;;  %v1144_v47 = vshll.u32 %v1143_v1, 16 }
 0x5e4   :  { %vm1194_vm2 = vcmp.eq.f32.partialorder %v3195_v2, %v3291_v46  ;;  %vm1068_vm3 = vcmp.eq.f32.partialorder %v3197_v57, %v3293_v56 }
 0x5e5   :  { %v1195_v35 = vsel %vm1194_vm2, %v1190_v49, inf  ;;  %v1069_v42 = vsel %vm1068_vm3, %v1064_v44, inf  ;;  %v1059_v49 = vcvt.f32.s32 %v3261_v34  ;;  %v1129_v44 = vcvt.f32.s32 %v3263_v30 }
 0x5e6   :  { %1196 = vmin.xlane.f32.xlu1 %v1195_v35  ;;  %1070 = vmin.xlane.f32.xlu0 %v1069_v42  ;;  %v1171_v34 = vcvt.f32.s32 %v3271_v8  ;;  %v1045_v30 = vcvt.f32.s32 %v3273_v12 }
 0x5e7   :  { %v3301_v27 = vpop.xlane.xlu1 %1108  ;;  %v3303_v19 = vpop.xlane.xlu0 %1178 }
 0x5e8   :  { %vm1110_vm4 = vcmp.eq.f32.partialorder %v3217_v7, %v3301_v27  ;;  %vm1180_vm5 = vcmp.eq.f32.partialorder %v3219_v4, %v3303_v19  ;;  %v1172_v8 = vshll.u32 %v1171_v34, 16  ;;  %v1046_v12 = vshll.u32 %v1045_v30, 16 }
 0x5e9   :  { %v1111_v2 = vsel %vm1110_vm4, %v1106_v15, inf  ;;  %v1181_v57 = vsel %vm1180_vm5, %v1176_v17, inf  ;;  %v1130_v17 = vshll.u32 %v1129_v44, 16 }
 0x5ea   :  { %1112 = vmin.xlane.f32.xlu1 %v1111_v2  ;;  %1182 = vmin.xlane.f32.xlu0 %v1181_v57 }
 0x5eb   :  { %v3310_v63 = vpop.xlane.xlu1 %1220  ;;  %v3312_v14 = vpop.xlane.xlu0 %1094 }
 0x5ec   :  { %vm1222_vm6 = vcmp.eq.f32.partialorder %v3229_v61, %v3310_v63  ;;  %vm1096_vm7 = vcmp.eq.f32.partialorder %v3234_v24, %v3312_v14  ;;  %v1017_v24 = vcvt.f32.s32 %v3253_v39  ;;  %v1060_v39 = vshll.u32 %v1059_v49, 16 }
 0x5ed   :  { %v1223_v7 = vsel %vm1222_vm6, %v1218_v54, inf  ;;  %v1097_v4 = vsel %vm1096_vm7, %v1092_v0, inf }
 0x5ee   :  { %1224 = vmin.xlane.f32.xlu1 %v1223_v7  ;;  %1098 = vmin.xlane.f32.xlu0 %v1097_v4 }
 0x5ef   :  { %v3318_v36 = vpop.xlane.xlu0 %1206 }
 0x5f0   :  { %vm1208_vm8 = vcmp.eq.f32.partialorder %v3239_v9, %v3318_v36  ;;  %v1018_v9 = vshll.u32 %v1017_v24, 16 }
 0x5f1   :  { %v1209_v60 = vsel %vm1208_vm8, %v1204_v26, inf  ;;  %v1087_v26 = vcvt.f32.s32 %v3281_v40 }
 0x5f2   :  { %1210 = vmin.xlane.f32.xlu0 %v1209_v60  ;;  %v1157_v60 = vcvt.f32.s32 %v3283_v37 }
 0x5f3   :  { %v1088_v40 = vshll.u32 %v1087_v26, 16 }
 0x5f4   :  { %v1158_v37 = vshll.u32 %v1157_v60, 16  ;;  %v1213_v60 = vcvt.f32.s32 %v3318_v36 }
 0x65f   :  { %v1029_v61 = vpop.xlane.xlu1 %1028 }
 0x660   :  { %v1030_v53 = vcvt.f32.s32 %v1029_v61 }
 0x662   :  { %v1033_v29 = vadd.s32 %v1032_v58, %v1030_v53 }
 0x663   :  { %v1141_v35 = vpop.xlane.xlu1 %1140  ;;  %v1015_v42 = vpop.xlane.xlu0 %1014 }
 0x664   :  { %v1142_v18 = vcvt.f32.s32 %v1141_v35  ;;  %v1016_v43 = vcvt.f32.s32 %v1015_v42  ;;  %vm1231_vm9 = vcmp.eq.s32.totalorder %v2231_v41, %v1033_v29  ;;  %v1199_v29 = vcvt.f32.s32 %v3291_v46 }
 0x665   :  { %v3329_v22 = vsel %vm1231_vm9, -inf, %v2977_v16 }
 0x666   :  { %v1145_v52 = vadd.s32 %v1144_v47, %v1142_v18  ;;  %v1019_v15 = vadd.s32 %v1018_v9, %v1016_v43  ;;  %1296 = vmax.xlane.f32.xlu1 %v3329_v22  ;;  %v1073_v47 = vcvt.f32.s32 %v3293_v56  ;;  %v1200_v46 = vshll.u32 %v1199_v29, 16 }
 0x667   :  { %v1057_v2 = vpop.xlane.xlu1 %1056  ;;  %v1127_v57 = vpop.xlane.xlu0 %1126  ;;  %v1115_v43 = vcvt.f32.s32 %v3301_v27 }
 0x668   :  { %v1058_v32 = vcvt.f32.s32 %v1057_v2  ;;  %v1128_v54 = vcvt.f32.s32 %v1127_v57  ;;  %vm1239_vm10 = vcmp.eq.s32.totalorder %v2231_v41, %v1145_v52  ;;  %vm1230_vm11 = vcmp.eq.s32.totalorder %v2231_v41, %v1019_v15 }
 0x669   :  { %v3337_v16 = vsel %vm1239_vm10, -inf, %v2985_v38  ;;  %v3340_v0 = vsel %vm1230_vm11, -inf, %v2988_v23  ;;  %v1074_v56 = vshll.u32 %v1073_v47, 16  ;;  %v1185_v52 = vcvt.f32.s32 %v3303_v19 }
 0x66a   :  { %v1061_v7 = vadd.s32 %v1060_v39, %v1058_v32  ;;  %v1131_v4 = vadd.s32 %v1130_v17, %v1128_v54  ;;  %1312 = vmax.xlane.f32.xlu1 %v3337_v16  ;;  %1294 = vmax.xlane.f32.xlu0 %v3340_v0  ;;  %v1116_v27 = vshll.u32 %v1115_v43, 16  ;;  %v1227_v57 = vcvt.f32.s32 %v3310_v63  ;;  %v4243_v43 = vld [vmem:[#allocation27_spill] sm:$0xff] }
 0x66b   :  { %v1169_v51 = vpop.xlane.xlu1 %1168  ;;  %v1043_v1 = vpop.xlane.xlu0 %1042  ;;  %v1186_v19 = vshll.u32 %v1185_v52, 16  ;;  %v1101_v32 = vcvt.f32.s32 %v3312_v14 }
 0x66c   :  { %v1170_v61 = vcvt.f32.s32 %v1169_v51  ;;  %v1044_v38 = vcvt.f32.s32 %v1043_v1  ;;  %vm1233_vm12 = vcmp.eq.s32.totalorder %v2231_v41, %v1061_v7  ;;  %vm1238_vm13 = vcmp.eq.s32.totalorder %v2231_v41, %v1131_v4 }
 0x66d   :  { %v3349_v23 = vsel %vm1233_vm12, -inf, %v2997_v33  ;;  %v3352_v58 = vsel %vm1238_vm13, -inf, %v3000_v20  ;;  %v1228_v63 = vshll.u32 %v1227_v57, 16  ;;  %v1102_v14 = vshll.u32 %v1101_v32, 16 }
 0x66e   :  { %v1173_v24 = vadd.s32 %v1172_v8, %v1170_v61  ;;  %v1047_v53 = vadd.s32 %v1046_v12, %v1044_v38  ;;  %1300 = vmax.xlane.f32.xlu1 %v3349_v23  ;;  %1310 = vmax.xlane.f32.xlu0 %v3352_v58 }
 0x66f   :  { %v1085_v49 = vpop.xlane.xlu1 %1084  ;;  %v1155_v44 = vpop.xlane.xlu0 %1154 }
 0x670   :  { %v1086_v35 = vcvt.f32.s32 %v1085_v49  ;;  %v1156_v33 = vcvt.f32.s32 %v1155_v44  ;;  %vm1241_vm14 = vcmp.eq.s32.totalorder %v2231_v41, %v1173_v24  ;;  %vm1232_vm15 = vcmp.eq.s32.totalorder %v2231_v41, %v1047_v53 }
 0x671   :  { %v3361_v20 = vsel %vm1241_vm14, -inf, %v3009_v48  ;;  %v3364_v42 = vsel %vm1232_vm15, -inf, %v3012_v59  ;;  %v911_v49 = vmul.f32 %v2714_v13, %v2714_v13 }
 0x672   :  { %4230 = vst [vmem:[#allocation70_spill] sm:$0xff] %v3361_v20  ;;  %4231 = vst [vmem:[#allocation71_spill] sm:$0xff] %v3364_v42  ;;  %v1089_v9 = vadd.s32 %v1088_v40, %v1086_v35  ;;  %v1159_v18 = vadd.s32 %v1158_v37, %v1156_v33  ;;  %1316 = vmax.xlane.f32.xlu1 %v3361_v20  ;;  %1298 = vmax.xlane.f32.xlu0 %v3364_v42  ;;  %v1214_v40 = vshll.u32 %v1213_v60, 16 }
 0x673   :  { %v1197_v15 = vpop.xlane.xlu1 %1196  ;;  %v1071_v39 = vpop.xlane.xlu0 %1070  ;;  %v919_v35 = vmul.f32 %v2722_v21, %v2722_v21  ;;  %v567_v33 = vmul.f32 %v2362_v10, %v2362_v10 }
 0x674   :  { %v1198_v17 = vcvt.f32.s32 %v1197_v15  ;;  %v1072_v48 = vcvt.f32.s32 %v1071_v39  ;;  %vm1235_vm1 = vcmp.eq.s32.totalorder %v2231_v41, %v1089_v9  ;;  %vm1240_vm2 = vcmp.eq.s32.totalorder %v2231_v41, %v1159_v18  ;;  %v4244_v15 = vld [vmem:[#allocation56_spill] sm:$0xff] }
 0x675   :  { %v3373_v59 = vsel %vm1235_vm1, -inf, %v3021_v28  ;;  %v3376_v34 = vsel %vm1240_vm2, -inf, %v3024_v50  ;;  %v935_v21 = vadd.f32 %v919_v35, %v567_v33  ;;  %v1262_v10 = vmul.f32 %v4244_v15, %v4244_v15 }
 0x676   :  { %4232 = vst [vmem:[#allocation72_spill] sm:$0xff] %v3373_v59  ;;  %4233 = vst [vmem:[#allocation73_spill] sm:$0xff] %v3376_v34  ;;  %v1201_v30 = vadd.s32 %v1200_v46, %v1198_v17  ;;  %v1075_v2 = vadd.s32 %v1074_v56, %v1072_v48  ;;  %1304 = vmax.xlane.f32.xlu1 %v3373_v59  ;;  %1314 = vmax.xlane.f32.xlu0 %v3376_v34  ;;  %v4242_v56 = vld [vmem:[#allocation55_spill] sm:$0xff]  ;;  %v4245_v48 = vld [vmem:[#allocation42_spill] sm:$0xff] }
 0x677   :  { %v1113_v54 = vpop.xlane.xlu1 %1112  ;;  %v1183_v7 = vpop.xlane.xlu0 %1182  ;;  %v1271_v13 = vmul.f32 %v4242_v56, %v4242_v56  ;;  %v4253_v56 = vld [vmem:[#allocation59_spill] sm:$0xff] }
 0x678   :  { %v1114_v4 = vcvt.f32.s32 %v1113_v54  ;;  %v1184_v28 = vcvt.f32.s32 %v1183_v7  ;;  %vm1243_vm3 = vcmp.eq.s32.totalorder %v2231_v41, %v1201_v30  ;;  %vm1234_vm4 = vcmp.eq.s32.totalorder %v2231_v41, %v1075_v2  ;;  %v4247_v7 = vld [vmem:[#allocation57_spill] sm:$0xff] }
 0x679   :  { %v3385_v50 = vsel %vm1243_vm3, -inf, %v3033_v55  ;;  %v3388_v8 = vsel %vm1234_vm4, -inf, %v3036_v5  ;;  %v913_v30 = vmul.f32 %v4245_v48, %v4245_v48  ;;  %v1287_v54 = vadd.f32 %v1271_v13, %v935_v21 }
 0x67a   :  { %4234 = vst [vmem:[#allocation74_spill] sm:$0xff] %v3385_v50  ;;  %4235 = vst [vmem:[#allocation75_spill] sm:$0xff] %v3388_v8  ;;  %v1117_v12 = vadd.s32 %v1116_v27, %v1114_v4  ;;  %v1187_v26 = vadd.s32 %v1186_v19, %v1184_v28  ;;  %1320 = vmax.xlane.f32.xlu1 %v3385_v50  ;;  %1302 = vmax.xlane.f32.xlu0 %v3388_v8  ;;  %v4246_v19 = vld [vmem:[#allocation28_spill] sm:$0xff] }
 0x67b   :  { %v1225_v51 = vpop.xlane.xlu1 %1224  ;;  %v1099_v1 = vpop.xlane.xlu0 %1098  ;;  %v561_v57 = vmul.f32 %v4246_v19, %v4246_v19  ;;  %v1265_v4 = vmul.f32 %v4247_v7, %v4247_v7  ;;  %v1273_v13 = vmul.f32 %v4253_v56, %v4253_v56  ;;  %v4256_v7 = vld [vmem:[#allocation46_spill] sm:$0xff] }
 0x67c   :  { %v1226_v61 = vcvt.f32.s32 %v1225_v51  ;;  %v1100_v38 = vcvt.f32.s32 %v1099_v1  ;;  %vm1237_vm5 = vcmp.eq.s32.totalorder %v2231_v41, %v1117_v12  ;;  %vm1242_vm6 = vcmp.eq.s32.totalorder %v2231_v41, %v1187_v26  ;;  %v4248_v26 = vld [vmem:[#allocation43_spill] sm:$0xff]  ;;  %v4249_v1 = vld [vmem:[#allocation29_spill] sm:$0xff] }
 0x67d   :  { %v3396_v55 = vsel %vm1237_vm5, -inf, %v3044_v62  ;;  %v3399_v5 = vsel %vm1242_vm6, -inf, %v3047_v45 }
 0x67e   :  { %4236 = vst [vmem:[#allocation76_spill] sm:$0xff] %v3396_v55  ;;  %4237 = vst [vmem:[#allocation77_spill] sm:$0xff] %v3399_v5  ;;  %v1229_v24 = vadd.s32 %v1228_v63, %v1226_v61  ;;  %v1103_v53 = vadd.s32 %v1102_v14, %v1100_v38  ;;  %1308 = vmax.xlane.f32.xlu1 %v3396_v55  ;;  %1318 = vmax.xlane.f32.xlu0 %v3399_v5 }
 0x67f   :  { %v1211_v36 = vpop.xlane.xlu0 %1210  ;;  %v918_v63 = vmul.f32 %v4248_v26, %v4248_v26  ;;  %v566_v61 = vmul.f32 %v4249_v1, %v4249_v1  ;;  %v929_v38 = vadd.f32 %v913_v30, %v561_v57 }
 0x680   :  { %v1212_v37 = vcvt.f32.s32 %v1211_v36  ;;  %vm1245_vm7 = vcmp.eq.s32.totalorder %v2231_v41, %v1229_v24  ;;  %vm1236_vm8 = vcmp.eq.s32.totalorder %v2231_v41, %v1103_v53 }
 0x681   :  { %v3406_v29 = vsel %vm1245_vm7, -inf, %v3054_v6  ;;  %v3409_v62 = vsel %vm1236_vm8, -inf, %v3057_v3  ;;  %v559_v6 = vmul.f32 %v2364_v11, %v2364_v11  ;;  %v1263_v3 = vmul.f32 %v3066_v31, %v3066_v31 }
 0x682   :  { %4238 = vst [vmem:[#allocation78_spill] sm:$0xff] %v3406_v29  ;;  %4239 = vst [vmem:[#allocation79_spill] sm:$0xff] %v3409_v62  ;;  %v1215_v45 = vadd.s32 %v1214_v40, %v1212_v37  ;;  %1324 = vmax.xlane.f32.xlu1 %v3406_v29  ;;  %1306 = vmax.xlane.f32.xlu0 %v3409_v62  ;;  %v558_v31 = vmul.f32 %v4243_v43, %v4243_v43  ;;  %v4250_v40 = vld [vmem:[#allocation58_spill] sm:$0xff] }
 0x683   :  { %v927_v44 = vadd.f32 %v911_v49, %v559_v6  ;;  %v1270_v37 = vmul.f32 %v4250_v40, %v4250_v40  ;;  %v1281_v33 = vadd.f32 %v1265_v4, %v929_v38  ;;  %v915_v4 = vmul.f32 %v4256_v7, %v4256_v7  ;;  %v4259_v40 = vld [vmem:[#allocation61_spill] sm:$0xff] }
 0x684   :  { %vm1244_vm9 = vcmp.eq.s32.totalorder %v2231_v41, %v1215_v45  ;;  %v4264_v7 = vld [vmem:[#allocation49_spill] sm:$0xff] }
 0x685   :  { %v3415_v47 = vsel %vm1244_vm9, -inf, %v3063_v25  ;;  %v4241_v25 = vld [vmem:[#allocation41_spill] sm:$0xff]  ;;  %v1279_v46 = vadd.f32 %v1263_v3, %v927_v44  ;;  %v4251_v44 = vld [vmem:[#allocation44_spill] sm:$0xff] }
 0x686   :  { %4240 = vst [vmem:[#allocation80_spill] sm:$0xff] %v3415_v47  ;;  %1322 = vmax.xlane.f32.xlu0 %v3415_v47  ;;  %v910_v9 = vmul.f32 %v4241_v25, %v4241_v25  ;;  %v921_v35 = vmul.f32 %v4251_v44, %v4251_v44  ;;  %v4252_v25 = vld [vmem:[#allocation30_spill] sm:$0xff] }
 0x688   :  { %v926_v32 = vadd.f32 %v910_v9, %v558_v31  ;;  %v569_v9 = vmul.f32 %v4252_v25, %v4252_v25 }
 0x68a   :  { %v1278_v14 = vadd.f32 %v1262_v10, %v926_v32  ;;  %v937_v10 = vadd.f32 %v921_v35, %v569_v9 }
 0x6f3   :  { %v1297_v18 = vpop.xlane.xlu1 %1296 }
 0x6f4   :  { %vm1327_vm10 = vcmp.eq.f32.partialorder %v3329_v22, %v1297_v18  ;;  %v1615_v11 = vmul.f32 %v1297_v18, %v1297_v18  ;;  %v934_v18 = vadd.f32 %v918_v63, %v566_v61 }
 0x6f5   :  { %v3436_v52 = vsel %vm1327_vm10, %v2231_v41, 128 }
 0x6f6   :  { %v1373_v39 = vshra.s32 %v3436_v52, 16  ;;  %v3441_v17 = vadd.f32 %v1615_v11, %v1279_v46  ;;  %v1286_v31 = vadd.f32 %v1270_v37, %v934_v18  ;;  %v1267_v37 = vmul.f32 %v4259_v40, %v4259_v40 }
 0x6f7   :  { %v1313_v2 = vpop.xlane.xlu1 %1312  ;;  %v1295_v27 = vpop.xlane.xlu0 %1294 }
 0x6f8   :  { %vm1335_vm11 = vcmp.eq.f32.partialorder %v3337_v16, %v1313_v2  ;;  %v1623_v28 = vmul.f32 %v1313_v2, %v1313_v2  ;;  %vm1326_vm12 = vcmp.eq.f32.partialorder %v3340_v0, %v1295_v27  ;;  %v1614_v12 = vmul.f32 %v1295_v27, %v1295_v27  ;;  %v4255_v27 = vld [vmem:[#allocation32_spill] sm:$0xff] }
 0x6f9   :  { %v3454_v60 = vsel %vm1335_vm11, %v2231_v41, 128  ;;  %v3456_v51 = vcvt.s32.f32 %v1373_v39  ;;  %v3463_v53 = vsel %vm1326_vm12, %v2231_v41, 128  ;;  %v4254_v39 = vld [vmem:[#allocation45_spill] sm:$0xff]  ;;  %v560_v19 = vmul.f32 %v4255_v27, %v4255_v27 }
 0x6fa   :  { %v3460_v24 = vadd.f32 %v1623_v28, %v1287_v54  ;;  %v1485_v45 = vshra.s32 %v3454_v60, 16  ;;  %v3468_v49 = vadd.f32 %v1614_v12, %v1278_v14  ;;  %v1359_v46 = vshra.s32 %v3463_v53, 16  ;;  %v4257_v12 = vld [vmem:[#allocation60_spill] sm:$0xff]  ;;  %v4258_v14 = vld [vmem:[#allocation33_spill] sm:$0xff] }
 0x6fb   :  { %v1301_v36 = vpop.xlane.xlu1 %1300  ;;  %1376 = vmin.xlane.f32.xlu1 %v3456_v51  ;;  %v1311_v3 = vpop.xlane.xlu0 %1310  ;;  %v912_v48 = vmul.f32 %v4254_v39, %v4254_v39  ;;  %v1289_v28 = vadd.f32 %v1273_v13, %v937_v10  ;;  %v1264_v26 = vmul.f32 %v4257_v12, %v4257_v12  ;;  %v563_v1 = vmul.f32 %v4258_v14, %v4258_v14  ;;  %v4263_v39 = vld [vmem:[#allocation48_spill] sm:$0xff] }
 0x6fc   :  { %v1617_v6 = vmul.f32 %v1301_v36, %v1301_v36  ;;  %vm1329_vm13 = vcmp.eq.f32.partialorder %v3349_v23, %v1301_v36  ;;  %vm1334_vm14 = vcmp.eq.f32.partialorder %v3352_v58, %v1311_v3  ;;  %v1622_v43 = vmul.f32 %v1311_v3, %v1311_v3 }
 0x6fd   :  { %v3482_v21 = vcvt.s32.f32 %v1485_v45  ;;  %v3487_v30 = vsel %vm1329_vm13, %v2231_v41, 128  ;;  %v3490_v2 = vsel %vm1334_vm14, %v2231_v41, 128  ;;  %v3497_v32 = vcvt.s32.f32 %v1359_v46 }
 0x6fe   :  { %v3479_v11 = vadd.f32 %v1617_v6, %v1281_v33  ;;  %v3494_v57 = vadd.f32 %v1622_v43, %v1286_v31  ;;  %v1401_v61 = vshra.s32 %v3487_v30, 16  ;;  %v1471_v38 = vshra.s32 %v3490_v2, 16  ;;  %v4260_v6 = vld [vmem:[#allocation31_spill] sm:$0xff] }
 0x6ff   :  { %v1317_v15 = vpop.xlane.xlu1 %1316  ;;  %1488 = vmin.xlane.f32.xlu1 %v3482_v21  ;;  %v1299_v54 = vpop.xlane.xlu0 %1298  ;;  %1362 = vmin.xlane.f32.xlu0 %v3497_v32  ;;  %v928_v36 = vadd.f32 %v912_v48, %v560_v19  ;;  %v568_v3 = vmul.f32 %v4260_v6, %v4260_v6  ;;  %v931_v35 = vadd.f32 %v915_v4, %v563_v1  ;;  %v4261_v33 = vld [vmem:[#allocation47_spill] sm:$0xff]  ;;  %v4266_v1 = vld [vmem:[#allocation34_spill] sm:$0xff]  ;;  %2045 = vrsqrt.f32 %v3441_v17 }
 0x700   :  { %v1625_v63 = vmul.f32 %v1317_v15, %v1317_v15  ;;  %vm1337_vm15 = vcmp.eq.f32.partialorder %v3361_v20, %v1317_v15  ;;  %vm1328_vm1 = vcmp.eq.f32.partialorder %v3364_v42, %v1299_v54  ;;  %v920_v25 = vmul.f32 %v4261_v33, %v4261_v33  ;;  %v4262_v15 = vld [vmem:[#allocation35_spill] sm:$0xff] }
 0x701   :  { %v1280_v9 = vadd.f32 %v1264_v26, %v928_v36  ;;  %v3519_v18 = vsel %vm1337_vm15, %v2231_v41, 128  ;;  %v3522_v46 = vsel %vm1328_vm1, %v2231_v41, 128  ;;  %v1616_v56 = vmul.f32 %v1299_v54, %v1299_v54  ;;  %v4267_v36 = vld [vmem:[#allocation63_spill] sm:$0xff] }
 0x702   :  { %v3511_v45 = vadd.f32 %v1625_v63, %v1289_v28  ;;  %v3524_v13 = vcvt.s32.f32 %v1401_v61  ;;  %v3526_v43 = vcvt.s32.f32 %v1471_v38  ;;  %v571_v10 = vmul.f32 %v4262_v15, %v4262_v15  ;;  %v4265_v28 = vld [vmem:[#allocation62_spill] sm:$0xff]  ;;  %v4269_v15 = vld [vmem:[#allocation64_spill] sm:$0xff] }
 0x703   :  { %v1305_v44 = vpop.xlane.xlu1 %1304  ;;  %v1315_v31 = vpop.xlane.xlu0 %1314  ;;  %v923_v48 = vmul.f32 %v4263_v39, %v4263_v39  ;;  %v1283_v27 = vadd.f32 %v1267_v37, %v931_v35  ;;  %v914_v4 = vmul.f32 %v4264_v7, %v4264_v7  ;;  %v1272_v12 = vmul.f32 %v4265_v28, %v4265_v28  ;;  %v4268_v37 = vld [vmem:[#allocation37_spill] sm:$0xff]  ;;  %v4270_v28 = vld [vmem:[#allocation50_spill] sm:$0xff] }
 0x704   :  { %v1619_v19 = vmul.f32 %v1305_v44, %v1305_v44  ;;  %v3536_v54 = vadd.f32 %v1616_v56, %v1280_v9  ;;  %1404 = vmin.xlane.f32.xlu1 %v3524_v13  ;;  %1474 = vmin.xlane.f32.xlu0 %v3526_v43  ;;  %v1513_v26 = vshra.s32 %v3519_v18, 16  ;;  %v1387_v63 = vshra.s32 %v3522_v46, 16 }
 0x705   :  { %vm1331_vm2 = vcmp.eq.f32.partialorder %v3373_v59, %v1305_v44  ;;  %v562_v61 = vmul.f32 %v4266_v1, %v4266_v1  ;;  %v936_v38 = vadd.f32 %v920_v25, %v568_v3  ;;  %v1275_v40 = vmul.f32 %v4267_v36, %v4267_v36 }
 0x706   :  { %v3543_v14 = vadd.f32 %v1619_v19, %v1283_v27  ;;  %vm1336_vm3 = vcmp.eq.f32.partialorder %v3376_v34, %v1315_v31  ;;  %v565_v6 = vmul.f32 %v4268_v37, %v4268_v37  ;;  %v939_v35 = vadd.f32 %v923_v48, %v571_v10 }
 0x707   :  { %v1321_v33 = vpop.xlane.xlu1 %1320  ;;  %v930_v9 = vadd.f32 %v914_v4, %v562_v61  ;;  %v1288_v56 = vadd.f32 %v1272_v12, %v936_v38  ;;  %v1266_v44 = vmul.f32 %v4269_v15, %v4269_v15  ;;  %v3555_v39 = vsel %vm1331_vm2, %v2231_v41, 128  ;;  %v1303_v27 = vpop.xlane.xlu0 %1302  ;;  %v4271_v4 = vld [vmem:[#allocation65_spill] sm:$0xff]  ;;  %v4272_v15 = vld [vmem:[#allocation51_spill] sm:$0xff] }
 0x708   :  { %v3558_v3 = vsel %vm1336_vm3, %v2231_v41, 128  ;;  %v1624_v25 = vmul.f32 %v1315_v31, %v1315_v31  ;;  %v3560_v19 = vcvt.s32.f32 %v1513_v26  ;;  %v3562_v7 = vcvt.s32.f32 %v1387_v63 }
 0x709   :  { %v917_v10 = vmul.f32 %v4270_v28, %v4270_v28  ;;  %v1291_v48 = vadd.f32 %v1275_v40, %v939_v35  ;;  %v1269_v12 = vmul.f32 %v4271_v4, %v4271_v4  ;;  %v1627_v1 = vmul.f32 %v1321_v33, %v1321_v33 }
 0x70a   :  { %v3568_v61 = vadd.f32 %v1624_v25, %v1288_v56  ;;  %1516 = vmin.xlane.f32.xlu1 %v3560_v19  ;;  %1390 = vmin.xlane.f32.xlu0 %v3562_v7  ;;  %vm1339_vm4 = vcmp.eq.f32.partialorder %v3385_v50, %v1321_v33  ;;  %v1618_v31 = vmul.f32 %v1303_v27, %v1303_v27  ;;  %v1429_v26 = vshra.s32 %v3555_v39, 16 }
 0x70b   :  { %v1499_v63 = vshra.s32 %v3558_v3, 16  ;;  %v3575_v38 = vadd.f32 %v1627_v1, %v1291_v48  ;;  %vm1330_vm5 = vcmp.eq.f32.partialorder %v3388_v8, %v1303_v27  ;;  %v1282_v36 = vadd.f32 %v1266_v44, %v930_v9  ;;  %v1309_v40 = vpop.xlane.xlu1 %1308  ;;  %v1319_v56 = vpop.xlane.xlu0 %1318  ;;  %v4273_v44 = vld [vmem:[#allocation36_spill] sm:$0xff]  ;;  %v4274_v27 = vld [vmem:[#allocation66_spill] sm:$0xff] }
 0x70c   :  { %v933_v37 = vadd.f32 %v917_v10, %v565_v6  ;;  %v3579_v35 = vsel %vm1339_vm4, %v2231_v41, 128  ;;  %v922_v25 = vmul.f32 %v4272_v15, %v4272_v15  ;;  %v3584_v33 = vsel %vm1330_vm5, %v2231_v41, 128 }
 0x70d   :  { %v3586_v28 = vadd.f32 %v1618_v31, %v1282_v36  ;;  %v3588_v48 = vcvt.s32.f32 %v1429_v26  ;;  %v3590_v1 = vcvt.s32.f32 %v1499_v63  ;;  %v1621_v9 = vmul.f32 %v1309_v40, %v1309_v40  ;;  %v4275_v63 = vld [vmem:[#allocation38_spill] sm:$0xff] }
 0x70e   :  { %v1285_v4 = vadd.f32 %v1269_v12, %v933_v37  ;;  %v570_v6 = vmul.f32 %v4273_v44, %v4273_v44  ;;  %v1274_v10 = vmul.f32 %v4274_v27, %v4274_v27  ;;  %v1541_v8 = vshra.s32 %v3579_v35, 16  ;;  %v4276_v44 = vld [vmem:[#allocation53_spill] sm:$0xff] }
 0x70f   :  { %vm1333_vm6 = vcmp.eq.f32.partialorder %v3396_v55, %v1309_v40  ;;  %v1415_v15 = vshra.s32 %v3584_v33, 16  ;;  %1432 = vmin.xlane.f32.xlu1 %v3588_v48  ;;  %1502 = vmin.xlane.f32.xlu0 %v3590_v1  ;;  %vm1338_vm7 = vcmp.eq.f32.partialorder %v3399_v5, %v1319_v56  ;;  %v3604_v26 = vpop.xlane.xlu1 %1324  ;;  %v564_v36 = vmul.f32 %v4275_v63, %v4275_v63  ;;  %v1307_v40 = vpop.xlane.xlu0 %1306 }
 0x710   :  { %v3601_v12 = vadd.f32 %v1621_v9, %v1285_v4  ;;  %v938_v31 = vadd.f32 %v922_v25, %v570_v6  ;;  %v3609_v37 = vsel %vm1333_vm6, %v2231_v41, 128  ;;  %v916_v27 = vmul.f32 %v4276_v44, %v4276_v44  ;;  %v4277_v4 = vld [vmem:[#allocation68_spill] sm:$0xff] }
 0x711   :  { %v1626_v50 = vmul.f32 %v1319_v56, %v1319_v56  ;;  %v3613_v34 = vcvt.s32.f32 %v1541_v8  ;;  %v1268_v25 = vmul.f32 %v4277_v4, %v4277_v4  ;;  %v3618_v9 = vsel %vm1338_vm7, %v2231_v41, 128 }
 0x712   :  { %v1290_v55 = vadd.f32 %v1274_v10, %v938_v31  ;;  %v3620_v6 = vcvt.s32.f32 %v1415_v15  ;;  %vm1341_vm8 = vcmp.eq.f32.partialorder %v3406_v29, %v3604_v26  ;;  %v1457_v63 = vshra.s32 %v3609_v37, 16 }
 0x713   :  { %1544 = vmin.xlane.f32.xlu1 %v3613_v34  ;;  %v3629_v8 = vsel %vm1341_vm8, %v2231_v41, 128  ;;  %vm1332_vm9 = vcmp.eq.f32.partialorder %v3409_v62, %v1307_v40  ;;  %v932_v56 = vadd.f32 %v916_v27, %v564_v36  ;;  %v1527_v10 = vshra.s32 %v3618_v9, 16  ;;  %v3638_v44 = vpop.xlane.xlu0 %1322 }
 0x714   :  { %v3625_v5 = vadd.f32 %v1626_v50, %v1290_v55  ;;  %1418 = vmin.xlane.f32.xlu0 %v3620_v6  ;;  %v1569_v15 = vshra.s32 %v3629_v8, 16  ;;  %v3636_v31 = vsel %vm1332_vm9, %v2231_v41, 128  ;;  %v1620_v55 = vmul.f32 %v1307_v40, %v1307_v40 }
 0x715   :  { %v1284_v50 = vadd.f32 %v1268_v25, %v932_v56  ;;  %v3640_v4 = vcvt.s32.f32 %v1457_v63  ;;  %v1443_v29 = vshra.s32 %v3636_v31, 16  ;;  %v3646_v36 = vcvt.s32.f32 %v1527_v10 }
 0x716   :  { %vm1340_vm10 = vcmp.eq.f32.partialorder %v3415_v47, %v3638_v44  ;;  %v3653_v62 = vcvt.s32.f32 %v1569_v15  ;;  %v1372_v56 = vand.u32 65535, %v3436_v52  ;;  %2047 = vrsqrt.f32 %v3460_v24 }
 0x717   :  { %v3643_v59 = vadd.f32 %v1620_v55, %v1284_v50  ;;  %1460 = vmin.xlane.f32.xlu1 %v3640_v4  ;;  %v3651_v27 = vsel %vm1340_vm10, %v2231_v41, 128  ;;  %v3658_v25 = vcvt.s32.f32 %v1443_v29  ;;  %v1484_v50 = vand.u32 65535, %v3454_v60 }
 0x718   :  { %1530 = vmin.xlane.f32.xlu0 %v3646_v36  ;;  %v1555_v40 = vshra.s32 %v3651_v27, 16  ;;  %v1374_v15 = vcvt.s32.f32 %v1372_v56  ;;  %v1358_v29 = vand.u32 65535, %v3463_v53  ;;  %v1400_v60 = vand.u32 65535, %v3487_v30 }
 0x719   :  { %v1512_v30 = vand.u32 65535, %v3519_v18  ;;  %v1428_v18 = vand.u32 65535, %v3555_v39  ;;  %v1414_v39 = vand.u32 65535, %v3584_v33  ;;  %2049 = vrsqrt.f32 %v3468_v49 }
 0x71a   :  { %v3661_v63 = vcvt.s32.f32 %v1555_v40  ;;  %v1486_v40 = vcvt.s32.f32 %v1484_v50  ;;  %v1360_v20 = vcvt.s32.f32 %v1358_v29  ;;  %v1402_v50 = vcvt.s32.f32 %v1400_v60 }
 0x71b   :  { %1572 = vmin.xlane.f32.xlu1 %v3653_v62  ;;  %2051 = vrsqrt.f32 %v3479_v11 }
 0x71c   :  { %1446 = vmin.xlane.f32.xlu0 %v3658_v25  ;;  %2053 = vrsqrt.f32 %v3494_v57 }
 0x71d   :  { %2055 = vrsqrt.f32 %v3511_v45 }
 0x71e   :  { %2057 = vrsqrt.f32 %v3536_v54 }
 0x71f   :  { %2059 = vrsqrt.f32 %v3543_v14 }
 0x720   :  { %1558 = vmin.xlane.f32.xlu0 %v3661_v63  ;;  %2061 = vrsqrt.f32 %v3568_v61 }
 0x721   :  { %2063 = vrsqrt.f32 %v3575_v38 }
 0x722   :  { %2065 = vrsqrt.f32 %v3586_v28 }
 0x723   :  { %2067 = vrsqrt.f32 %v3601_v12 }
 0x724   :  { %2069 = vrsqrt.f32 %v3625_v5 }
 0x788   :  { %v3665_v10 = vpop.xlane.xlu1 %1376 }
 0x789   :  { %vm1378_vm11 = vcmp.eq.f32.partialorder %v3456_v51, %v3665_v10  ;;  %v1470_v51 = vand.u32 65535, %v3490_v2  ;;  %v1386_v2 = vand.u32 65535, %v3522_v46  ;;  %v1498_v46 = vand.u32 65535, %v3558_v3 }
 0x78a   :  { %v1379_v55 = vsel %vm1378_vm11, %v1374_v15, inf }
 0x78b   :  { %1380 = vmin.xlane.f32.xlu1 %v1379_v55 }
 0x78c   :  { %v3671_v47 = vpop.xlane.xlu1 %1488  ;;  %v3675_v42 = vpop.xlane.xlu0 %1362 }
 0x78d   :  { %vm1490_vm12 = vcmp.eq.f32.partialorder %v3482_v21, %v3671_v47  ;;  %vm1364_vm13 = vcmp.eq.f32.partialorder %v3497_v32, %v3675_v42  ;;  %v1472_v21 = vcvt.s32.f32 %v1470_v51 }
 0x78e   :  { %v1491_v52 = vsel %vm1490_vm12, %v1486_v40, inf  ;;  %v1365_v56 = vsel %vm1364_vm13, %v1360_v20, inf  ;;  %v1514_v40 = vcvt.s32.f32 %v1512_v30  ;;  %v1526_v30 = vand.u32 65535, %v3618_v9 }
 0x78f   :  { %1492 = vmin.xlane.f32.xlu1 %v1491_v52  ;;  %1366 = vmin.xlane.f32.xlu0 %v1365_v56  ;;  %v1388_v52 = vcvt.s32.f32 %v1386_v2  ;;  %v1430_v56 = vcvt.s32.f32 %v1428_v18  ;;  %v1568_v2 = vand.u32 65535, %v3629_v8  ;;  %vm1703_vm12 = vcmp.eq.f32.partialorder %v3441_v17, inf }
 0x790   :  { %vm1705_vm13 = vcmp.eq.f32.partialorder %v3441_v17, 0.0 }
 0x791   :  { %v3681_v53 = vpop.xlane.xlu1 %1404  ;;  %v3683_v15 = vpop.xlane.xlu0 %1474  ;;  %v1570_v8 = vcvt.s32.f32 %v1568_v2 }
 0x792   :  { %vm1406_vm14 = vcmp.eq.f32.partialorder %v3524_v13, %v3681_v53  ;;  %vm1476_vm15 = vcmp.eq.f32.partialorder %v3526_v43, %v3683_v15 }
 0x793   :  { %v1407_v32 = vsel %vm1406_vm14, %v1402_v50, inf  ;;  %v1477_v55 = vsel %vm1476_vm15, %v1472_v21, inf  ;;  %v1500_v50 = vcvt.s32.f32 %v1498_v46  ;;  %v1540_v21 = vand.u32 65535, %v3579_v35 }
 0x794   :  { %1408 = vmin.xlane.f32.xlu1 %v1407_v32  ;;  %1478 = vmin.xlane.f32.xlu0 %v1477_v55  ;;  %v1416_v35 = vcvt.s32.f32 %v1414_v39  ;;  %v2046_v39 = vpop.eup %2045  ;;  %vm1759_vm14 = vcmp.eq.f32.partialorder %v3460_v24, inf  ;;  %vm1696_vm15 = vcmp.eq.f32.partialorder %v3468_v49, inf }
 0x795   :  { %v1542_v32 = vcvt.s32.f32 %v1540_v21 }
 0x797   :  { %v3691_v20 = vpop.xlane.xlu1 %1516  ;;  %v3693_v29 = vpop.xlane.xlu0 %1390 }
 0x798   :  { %vm1518_vm1 = vcmp.eq.f32.partialorder %v3560_v19, %v3691_v20  ;;  %vm1392_vm2 = vcmp.eq.f32.partialorder %v3562_v7, %v3693_v29 }
 0x799   :  { %v1519_v13 = vsel %vm1518_vm1, %v1514_v40, inf  ;;  %v1393_v43 = vsel %vm1392_vm2, %v1388_v52, inf  ;;  %vm1761_vm1 = vcmp.eq.f32.partialorder %v3460_v24, 0.0  ;;  %vm1717_vm2 = vcmp.eq.f32.partialorder %v3479_v11, inf }
 0x79a   :  { %1520 = vmin.xlane.f32.xlu1 %v1519_v13  ;;  %1394 = vmin.xlane.f32.xlu0 %v1393_v43 }
 0x79c   :  { %v3701_v60 = vpop.xlane.xlu1 %1432  ;;  %v3703_v51 = vpop.xlane.xlu0 %1502 }
 0x79d   :  { %vm1434_vm3 = vcmp.eq.f32.partialorder %v3588_v48, %v3701_v60  ;;  %vm1504_vm4 = vcmp.eq.f32.partialorder %v3590_v1, %v3703_v51  ;;  %v1456_v48 = vand.u32 65535, %v3609_v37 }
 0x79e   :  { %v1435_v19 = vsel %vm1434_vm3, %v1430_v56, inf  ;;  %v1505_v3 = vsel %vm1504_vm4, %v1500_v50, inf  ;;  %vm1698_vm3 = vcmp.eq.f32.partialorder %v3468_v49, 0.0  ;;  %vm1752_vm4 = vcmp.eq.f32.partialorder %v3494_v57, inf }
 0x79f   :  { %1436 = vmin.xlane.f32.xlu1 %v1435_v19  ;;  %1506 = vmin.xlane.f32.xlu0 %v1505_v3  ;;  %v1458_v52 = vcvt.s32.f32 %v1456_v48  ;;  %v4280_v19 = vld [vmem:[#allocation39_spill] sm:$0xff]  ;;  %v4282_v48 = vld [vmem:[#allocation40_spill] sm:$0xff] }
 0x7a0   :  { %v3711_v7 = vpop.xlane.xlu1 %1544  ;;  %v573_v3 = vmul.f32 %v4280_v19, %v4280_v19 }
 0x7a1   :  { %vm1546_vm5 = vcmp.eq.f32.partialorder %v3613_v34, %v3711_v7  ;;  %v3715_v55 = vpop.xlane.xlu0 %1418  ;;  %v1442_v34 = vand.u32 65535, %v3636_v31 }
 0x7a2   :  { %vm1420_vm6 = vcmp.eq.f32.partialorder %v3620_v6, %v3715_v55  ;;  %v1547_v1 = vsel %vm1546_vm5, %v1542_v32, inf  ;;  %v1528_v6 = vcvt.s32.f32 %v1526_v30  ;;  %v4281_v32 = vld [vmem:[#allocation67_spill] sm:$0xff]  ;;  %vm1773_vm5 = vcmp.eq.f32.partialorder %v3511_v45, inf }
 0x7a3   :  { %1548 = vmin.xlane.f32.xlu1 %v1547_v1  ;;  %v1421_v33 = vsel %vm1420_vm6, %v1416_v35, inf  ;;  %v1444_v46 = vcvt.s32.f32 %v1442_v34  ;;  %v1277_v35 = vmul.f32 %v4281_v32, %v4281_v32  ;;  %v572_v1 = vmul.f32 %v4282_v48, %v4282_v48 }
 0x7a4   :  { %1422 = vmin.xlane.f32.xlu0 %v1421_v33  ;;  %v3722_v40 = vpop.xlane.xlu1 %1460  ;;  %v4283_v33 = vld [vmem:[#allocation69_spill] sm:$0xff]  ;;  %v1755_v32 = vand.u32 2147483648, %v3494_v57  ;;  %vm1710_vm6 = vcmp.eq.f32.partialorder %v3536_v54, inf }
 0x7a5   :  { %vm1462_vm7 = vcmp.eq.f32.partialorder %v3640_v4, %v3722_v40  ;;  %v3727_v37 = vpop.xlane.xlu0 %1530  ;;  %v1554_v4 = vand.u32 65535, %v3651_v27  ;;  %v1276_v30 = vmul.f32 %v4283_v33, %v4283_v33 }
 0x7a6   :  { %v1463_v13 = vsel %vm1462_vm7, %v1458_v52, inf  ;;  %vm1532_vm8 = vcmp.eq.f32.partialorder %v3646_v36, %v3727_v37  ;;  %v2048_v52 = vpop.eup %2047  ;;  %vm1731_vm7 = vcmp.eq.f32.partialorder %v3543_v14, inf }
 0x7a7   :  { %1464 = vmin.xlane.f32.xlu1 %v1463_v13  ;;  %v1533_v9 = vsel %vm1532_vm8, %v1528_v6, inf  ;;  %v1556_v50 = vcvt.s32.f32 %v1554_v4  ;;  %v1702_v13 = vmul.f32 %v2046_v39, %v3441_v17  ;;  %v2050_v6 = vpop.eup %2049  ;;  %v1720_v39 = vand.u32 2147483648, %v3479_v11 }
 0x7a8   :  { %v3731_v43 = vpop.xlane.xlu1 %1572  ;;  %1534 = vmin.xlane.f32.xlu0 %v1533_v9  ;;  %vm1719_vm8 = vcmp.eq.f32.partialorder %v3479_v11, 0.0 }
 0x7a9   :  { %vm1574_vm9 = vcmp.eq.f32.partialorder %v3653_v62, %v3731_v43  ;;  %v3736_v18 = vpop.xlane.xlu0 %1446  ;;  %v4278_v62 = vld [vmem:[#allocation52_spill] sm:$0xff] }
 0x7aa   :  { %v1575_v31 = vsel %vm1574_vm9, %v1570_v8, inf  ;;  %vm1448_vm10 = vcmp.eq.f32.partialorder %v3658_v25, %v3736_v18  ;;  %v925_v27 = vmul.f32 %v4278_v62, %v4278_v62  ;;  %v4279_v25 = vld [vmem:[#allocation54_spill] sm:$0xff]  ;;  %v2052_v8 = vpop.eup %2051  ;;  %v1699_v62 = vand.u32 2147483648, %v3468_v49 }
 0x7ab   :  { %1576 = vmin.xlane.f32.xlu1 %v1575_v31  ;;  %v1449_v36 = vsel %vm1448_vm10, %v1444_v46, inf  ;;  %v2054_v31 = vpop.eup %2053  ;;  %v1706_v46 = vand.u32 2147483648, %v3441_v17  ;;  %v1716_v19 = vmul.f32 %v2052_v8, %v3479_v11  ;;  %vm1766_vm9 = vcmp.eq.f32.partialorder %v3568_v61, inf }
 0x7ac   :  { %1450 = vmin.xlane.f32.xlu0 %v1449_v36  ;;  %v941_v2 = vadd.f32 %v925_v27, %v573_v3  ;;  %v1762_v36 = vand.u32 2147483648, %v3460_v24  ;;  %v1629_v27 = vmul.f32 %v3604_v26, %v3604_v26  ;;  %v1751_v3 = vmul.f32 %v2054_v31, %v3494_v57 }
 0x7ad   :  { %v3740_v56 = vpop.xlane.xlu0 %1558  ;;  %vm1754_vm10 = vcmp.eq.f32.partialorder %v3494_v57, 0.0 }
 0x7ae   :  { %vm1560_vm11 = vcmp.eq.f32.partialorder %v3661_v63, %v3740_v56  ;;  %v924_v63 = vmul.f32 %v4279_v25, %v4279_v25  ;;  %v1293_v9 = vadd.f32 %v1277_v35, %v941_v2  ;;  %v2056_v25 = vpop.eup %2055  ;;  %v1776_v35 = vand.u32 2147483648, %v3511_v45 }
 0x7af   :  { %v1561_v21 = vsel %vm1560_vm11, %v1556_v50, inf  ;;  %v1704_v50 = vsel %vm1703_vm12, %v3441_v17, %v1702_v13  ;;  %v2058_v26 = vpop.eup %2057  ;;  %v1713_v17 = vand.u32 2147483648, %v3536_v54  ;;  %v1718_v13 = vsel %vm1717_vm2, %v3479_v11, %v1716_v19 }
 0x7b0   :  { %1562 = vmin.xlane.f32.xlu0 %v1561_v21  ;;  %v940_v34 = vadd.f32 %v924_v63, %v572_v1  ;;  %v1758_v21 = vmul.f32 %v2048_v52, %v3460_v24  ;;  %v1695_v63 = vmul.f32 %v2050_v6, %v3468_v49  ;;  %v1707_v48 = vsel %vm1705_vm13, %v1706_v46, %v1704_v50  ;;  %v2060_v1 = vpop.eup %2059 }
 0x7b1   :  { %v3800_v2 = vadd.f32 %v1629_v27, %v1293_v9  ;;  %v1753_v6 = vsel %vm1752_vm4, %v3494_v57, %v1751_v3  ;;  %v1734_v9 = vand.u32 2147483648, %v3543_v14  ;;  %v1807_v8 = vmax.f32 %v1707_v48, 1e-12 }
 0x7b2   :  { %v3766_v4 = vadd.f32 %v1276_v30, %v940_v34  ;;  %v1760_v33 = vsel %vm1759_vm14, %v3460_v24, %v1758_v21  ;;  %v1772_v30 = vmul.f32 %v2056_v25, %v3511_v45  ;;  %v1697_v52 = vsel %vm1696_vm15, %v3468_v49, %v1695_v63  ;;  %v2062_v34 = vpop.eup %2061 }
 0x7b3   :  { %v1709_v31 = vmul.f32 %v2058_v26, %v3536_v54  ;;  %v1730_v46 = vmul.f32 %v2060_v1, %v3543_v14  ;;  %v1769_v50 = vand.u32 2147483648, %v3568_v61  ;;  %v2064_v21 = vpop.eup %2063  ;;  %vm1787_vm11 = vcmp.eq.f32.partialorder %v3575_v38, inf }
 0x7b4   :  { %v3824_v27 = vsel %vm1773_vm5, %v3511_v45, %v1772_v30  ;;  %2071 = vrsqrt.f32 %v3800_v2  ;;  %v1383_v25 = vcvt.f32.s32 %v3665_v10  ;;  %v1765_v63 = vmul.f32 %v2062_v34, %v3568_v61  ;;  %v2066_v1 = vpop.eup %2065 }
 0x7b5   :  { %2073 = vrsqrt.f32 %v3643_v59  ;;  %v1628_v19 = vmul.f32 %v3638_v44, %v3638_v44  ;;  %v1763_v3 = vsel %vm1761_vm1, %v1762_v36, %v1760_v33  ;;  %v1790_v26 = vand.u32 2147483648, %v3575_v38  ;;  %v2068_v30 = vpop.eup %2067 }
 0x7b6   :  { %vm1724_vm12 = vcmp.eq.f32.partialorder %v3586_v28, inf  ;;  %2075 = vrcp.f32 %v1807_v8  ;;  %v3841_v10 = vsel %vm1710_vm6, %v3536_v54, %v1709_v31  ;;  %v3846_v44 = vsel %vm1731_vm7, %v3543_v14, %v1730_v46  ;;  %v2070_v49 = vpop.eup %2069 }
 0x7b7   :  { %v1786_v24 = vmul.f32 %v2064_v21, %v3575_v38  ;;  %v1700_v33 = vsel %vm1698_vm3, %v1699_v62, %v1697_v52  ;;  %vm1745_vm13 = vcmp.eq.f32.partialorder %v3601_v12, inf  ;;  %v1384_v34 = vshll.u32 %v1383_v25, 16 }
 0x7b8   :  { %v1815_v48 = vmax.f32 %v1763_v3, 1e-12  ;;  %v3855_v31 = vsel %vm1766_vm9, %v3568_v61, %v1765_v63  ;;  %vm1780_vm14 = vcmp.eq.f32.partialorder %v3625_v5, inf  ;;  %v3860_v21 = vadd.f32 %v1628_v19, %v3766_v4 }
 0x7b9   :  { %vm1775_vm15 = vcmp.eq.f32.partialorder %v3511_v45, 0.0  ;;  %v1783_v62 = vand.u32 2147483648, %v3625_v5  ;;  %v1495_v52 = vcvt.f32.s32 %v3671_v47  ;;  %v1806_v3 = vmax.f32 %v1700_v33, 1e-12 }
 0x7ba   :  { %vm1712_vm1 = vcmp.eq.f32.partialorder %v3536_v54, 0.0  ;;  %v3869_v63 = vsel %vm1787_vm11, %v3575_v38, %v1786_v24  ;;  %v1744_v4 = vmul.f32 %v2068_v30, %v3601_v12  ;;  %v1804_v19 = vand.u32 2147483648, %v3800_v2 }
 0x7bb   :  { %v1369_v46 = vcvt.f32.s32 %v3675_v42  ;;  %2077 = vrcp.f32 %v1815_v48  ;;  %v1721_v47 = vsel %vm1719_vm8, %v1720_v39, %v1718_v13  ;;  %v1779_v33 = vmul.f32 %v2070_v49, %v3625_v5  ;;  %v4284_v49 = vld [vmem:[#allocation11_spill] sm:$0xff] }
 0x7bc   :  { %2079 = vrsqrt.f32 %v3860_v21  ;;  %v1756_v42 = vsel %vm1754_vm10, %v1755_v32, %v1753_v6  ;;  %vm1733_vm3 = vcmp.eq.f32.partialorder %v3543_v14, 0.0  ;;  %vm1801_vm4 = vcmp.eq.f32.partialorder %v3800_v2, inf }
 0x7bd   :  { %v1496_v48 = vshll.u32 %v1495_v52, 16  ;;  %2081 = vrcp.f32 %v1806_v3  ;;  %v3897_v57 = vsel %vm1745_vm13, %v3601_v12, %v1744_v4  ;;  %v1809_v6 = vmax.f32 %v1721_v47, 1e-12 }
 0x7be   :  { %v2072_v30 = vpop.eup %2071  ;;  %vm1768_vm7 = vcmp.eq.f32.partialorder %v3568_v61, 0.0  ;;  %vm1738_vm8 = vcmp.eq.f32.partialorder %v3643_v59, inf  ;;  %v1481_v4 = vcvt.f32.s32 %v3683_v15  ;;  %v3910_v47 = vsel %vm1780_vm14, %v3625_v5, %v1779_v33 }
 0x7bf   :  { %v2074_v39 = vpop.eup %2073  ;;  %v1797_v32 = vand.u32 2147483648, %v3860_v21  ;;  %vm1789_vm10 = vcmp.eq.f32.partialorder %v3575_v38, 0.0  ;;  %v1777_v33 = vsel %vm1775_vm15, %v1776_v35, %v3824_v27  ;;  %2083 = vrcp.f32 %v1809_v6 }
 0x7c0   :  { %vm1726_vm13 = vcmp.eq.f32.partialorder %v3586_v28, 0.0  ;;  %vm1747_vm14 = vcmp.eq.f32.partialorder %v3601_v12, 0.0  ;;  %v1770_v14 = vsel %vm1768_vm7, %v1769_v50, %v3855_v31  ;;  %vm1803_vm7 = vcmp.eq.f32.partialorder %v3800_v2, 0.0 }
 0x7c1   :  { %v4288_v38 = vand.u32 2147483648, %v3586_v28 }
 0x818   :  { %v1381_v36 = vpop.xlane.xlu1 %1380 }
 0x819   :  { %v1382_v8 = vcvt.f32.s32 %v1381_v36  ;;  %v1723_v36 = vmul.f32 %v2066_v1, %v3586_v28 }
 0x81b   :  { %v1385_v25 = vadd.s32 %v1384_v34, %v1382_v8  ;;  %v2076_v34 = vpop.eup %2075  ;;  %v1370_v8 = vshll.u32 %v1369_v46, 16 }
 0x81c   :  { %v1493_v24 = vpop.xlane.xlu1 %1492  ;;  %v1367_v13 = vpop.xlane.xlu0 %1366 }
 0x81d   :  { %vm1583_vm2 = vcmp.eq.s32.totalorder %v2231_v41, %v1385_v25  ;;  %v1494_v11 = vcvt.f32.s32 %v1493_v24  ;;  %v1368_v3 = vcvt.f32.s32 %v1367_v13  ;;  %v1814_v24 = vmax.f32 %v1756_v42, 1e-12 }
 0x81e   :  { %v1599_v1 = vsel %vm1583_vm2, -inf, %v3329_v22  ;;  %v3892_v22 = vsel %vm1724_vm12, %v3586_v28, %v1723_v36  ;;  %v1411_v36 = vcvt.f32.s32 %v3681_v53  ;;  %v1737_v53 = vmul.f32 %v2074_v39, %v3643_v59  ;;  %v4285_v39 = vld [vmem:[#allocation12_spill] sm:$0xff] }
 0x81f   :  { %vm1647_vm5 = vcmp.eq.f32.partialorder %v1599_v1, -inf  ;;  %v1497_v25 = vadd.s32 %v1496_v48, %v1494_v11  ;;  %v1371_v46 = vadd.s32 %v1370_v8, %v1368_v3  ;;  %v1800_v48 = vmul.f32 %v2072_v30, %v3800_v2  ;;  %v2078_v11 = vpop.eup %2077 }
 0x820   :  { %vm1663_vm6 = vmand %vm1647_vm5, %vm219_vm0  ;;  %v1714_v42 = vsel %vm1712_vm1, %v1713_v17, %v3841_v10  ;;  %v1482_v30 = vshll.u32 %v1481_v4, 16  ;;  %2085 = vrcp.f32 %v1814_v24  ;;  %v2080_v10 = vpop.eup %2079  ;;  %v1735_v8 = vsel %vm1733_vm3, %v1734_v9, %v3846_v44 }
 0x821   :  { %v1679_v52 = vsel %vm1663_vm6, %v4284_v49, 0.0  ;;  %vm1591_vm9 = vcmp.eq.s32.totalorder %v2231_v41, %v1497_v25  ;;  %vm1582_vm12 = vcmp.eq.s32.totalorder %v2231_v41, %v1371_v46  ;;  %v1409_v35 = vpop.xlane.xlu1 %1408  ;;  %v1479_v27 = vpop.xlane.xlu0 %1478  ;;  %v3938_v6 = vsel %vm1801_vm4, %v3800_v2, %v1800_v48 }
 0x822   :  { %v1855_v1 = vmul.f32 %v2076_v34, %v1679_v52  ;;  %v1607_v15 = vsel %vm1591_vm9, -inf, %v3337_v16  ;;  %v1412_v16 = vshll.u32 %v1411_v36, 16  ;;  %v1598_v45 = vsel %vm1582_vm12, -inf, %v3340_v0  ;;  %v2082_v49 = vpop.eup %2081  ;;  %v4286_v52 = vld [vmem:[#allocation13_spill] sm:$0xff] }
 0x823   :  { %vm1655_vm11 = vcmp.eq.f32.partialorder %v1607_v15, -inf  ;;  %vm1646_vm15 = vcmp.eq.f32.partialorder %v1598_v45, -inf  ;;  %v1410_v54 = vcvt.f32.s32 %v1409_v35  ;;  %v1480_v17 = vcvt.f32.s32 %v1479_v27 }
 0x824   :  { %1871 = vst [vmem:[#allocation7 + $0x8] sm:$0xff] %v1855_v1  ;;  %vm1671_vm2 = vmand %vm1655_vm11, %vm219_vm0  ;;  %v1817_v0 = vmax.f32 %v1777_v33, 1e-12  ;;  %vm1794_vm5 = vcmp.eq.f32.partialorder %v3860_v21, inf  ;;  %v1808_v4 = vmax.f32 %v1714_v42, 1e-12  ;;  %v1523_v1 = vcvt.f32.s32 %v3691_v20  ;;  %v2084_v33 = vpop.eup %2083 }
 0x825   :  { %v1687_v13 = vsel %vm1671_vm2, %v4285_v39, 0.0  ;;  %vm1662_vm1 = vmand %vm1646_vm15, %vm219_vm0  ;;  %v1413_v3 = vadd.s32 %v1412_v16, %v1410_v54  ;;  %v1483_v36 = vadd.s32 %v1482_v30, %v1480_v17  ;;  %v1397_v24 = vcvt.f32.s32 %v3693_v29  ;;  %v4287_v42 = vld [vmem:[#allocation15_spill] sm:$0xff] }
 0x826   :  { %v1863_v34 = vmul.f32 %v2078_v11, %v1687_v13  ;;  %v1678_v25 = vsel %vm1662_vm1, %v4286_v52, 0.0  ;;  %vm1782_vm3 = vcmp.eq.f32.partialorder %v3625_v5, 0.0  ;;  %v3960_v9 = vsel %vm1738_vm8, %v3643_v59, %v1737_v53  ;;  %v4290_v11 = vld [vmem:[#allocation14_spill] sm:$0xff] }
 0x827   :  { %v1854_v46 = vmul.f32 %v2082_v49, %v1678_v25  ;;  %vm1585_vm4 = vcmp.eq.s32.totalorder %v2231_v41, %v1413_v3  ;;  %vm1590_vm6 = vcmp.eq.s32.totalorder %v2231_v41, %v1483_v36  ;;  %v1811_v20 = vmax.f32 %v1735_v8, 1e-12  ;;  %v1521_v50 = vpop.xlane.xlu1 %1520  ;;  %v1395_v31 = vpop.xlane.xlu0 %1394  ;;  %v4292_v8 = vld [vmem:[#allocation71_spill] sm:$0xff] }
 0x828   :  { %1879 = vst [vmem:[#allocation7 + $0x48] sm:$0xff] %v1863_v34  ;;  %v1793_v29 = vmul.f32 %v2080_v10, %v3860_v21  ;;  %v1601_v44 = vsel %vm1585_vm4, -inf, %v3349_v23  ;;  %v1606_v61 = vsel %vm1590_vm6, -inf, %v3352_v58  ;;  %2087 = vrcp.f32 %v1817_v0 }
 0x829   :  { %1870 = vst [vmem:[#allocation7] sm:$0xff] %v1854_v46  ;;  %vm1649_vm9 = vcmp.eq.f32.partialorder %v1601_v44, -inf  ;;  %vm1654_vm11 = vcmp.eq.f32.partialorder %v1606_v61, -inf  ;;  %2089 = vrcp.f32 %v1808_v4  ;;  %v1791_v48 = vsel %vm1789_vm10, %v1790_v26, %v3869_v63  ;;  %v4294_v44 = vld [vmem:[#allocation17_spill] sm:$0xff] }
 0x82a   :  { %v1524_v53 = vshll.u32 %v1523_v1, 16  ;;  %v1398_v15 = vshll.u32 %v1397_v24, 16  ;;  %vm1665_vm8 = vmand %vm1649_vm9, %vm219_vm0  ;;  %v1522_v23 = vcvt.f32.s32 %v1521_v50  ;;  %v1396_v58 = vcvt.f32.s32 %v1395_v31  ;;  %v2086_v35 = vpop.eup %2085 }
 0x82b   :  { %vm1740_vm12 = vcmp.eq.f32.partialorder %v3643_v59, 0.0  ;;  %v1681_v16 = vsel %vm1665_vm8, %v4287_v42, 0.0  ;;  %vm1670_vm2 = vmand %vm1654_vm11, %vm219_vm0  ;;  %v1816_v30 = vmax.f32 %v1770_v14, 1e-12  ;;  %v1728_v26 = vsel %vm1726_vm13, %v4288_v38, %v3892_v22 }
 0x82c   :  { %v4289_v63 = vand.u32 2147483648, %v3601_v12  ;;  %v1857_v27 = vmul.f32 %v2084_v33, %v1681_v16  ;;  %v1686_v39 = vsel %vm1670_vm2, %v4290_v11, 0.0  ;;  %v1525_v13 = vadd.s32 %v1524_v53, %v1522_v23  ;;  %v1437_v49 = vpop.xlane.xlu1 %1436  ;;  %v1507_v52 = vpop.xlane.xlu0 %1506 }
 0x82d   :  { %v1399_v54 = vadd.s32 %v1398_v15, %v1396_v58  ;;  %v1439_v17 = vcvt.f32.s32 %v3701_v60  ;;  %v1509_v10 = vcvt.f32.s32 %v3703_v51  ;;  %v1862_v34 = vmul.f32 %v2086_v35, %v1686_v39  ;;  %v4296_v15 = vld [vmem:[#allocation72_spill] sm:$0xff]  ;;  %v4297_v58 = vld [vmem:[#allocation73_spill] sm:$0xff] }
 0x82e   :  { %v3989_v45 = vsel %vm1747_vm14, %v4289_v63, %v3897_v57  ;;  %v1819_v28 = vmax.f32 %v1791_v48, 1e-12  ;;  %v3997_v22 = vsel %vm1794_vm5, %v3860_v21, %v1793_v29  ;;  %1873 = vst [vmem:[#allocation7 + $0x18] sm:$0xff] %v1857_v27  ;;  %vm1593_vm10 = vcmp.eq.s32.totalorder %v2231_v41, %v1525_v13  ;;  %v4291_v57 = vld [vmem:[#allocation70_spill] sm:$0xff] }
 0x82f   :  { %vm1584_vm13 = vcmp.eq.s32.totalorder %v2231_v41, %v1399_v54  ;;  %v1810_v12 = vmax.f32 %v1728_v26, 1e-12  ;;  %1878 = vst [vmem:[#allocation7 + $0x40] sm:$0xff] %v1862_v34  ;;  %v1609_v0 = vsel %vm1593_vm10, -inf, %v4291_v57  ;;  %2091 = vrcp.f32 %v1811_v20  ;;  %v4293_v20 = vld [vmem:[#allocation16_spill] sm:$0xff]  ;;  %v4299_v54 = vld [vmem:[#allocation18_spill] sm:$0xff] }
 0x830   :  { %v1600_v60 = vsel %vm1584_vm13, -inf, %v4292_v8  ;;  %v1813_v51 = vmax.f32 %v3989_v45, 1e-12  ;;  %vm1796_vm14 = vcmp.eq.f32.partialorder %v3860_v21, 0.0  ;;  %vm1657_vm15 = vcmp.eq.f32.partialorder %v1609_v0, -inf  ;;  %v1549_v2 = vpop.xlane.xlu1 %1548  ;;  %v4298_v45 = vld [vmem:[#allocation19_spill] sm:$0xff] }
 0x831   :  { %vm1648_vm1 = vcmp.eq.f32.partialorder %v1600_v60, -inf  ;;  %2093 = vrcp.f32 %v1816_v30  ;;  %v1784_v25 = vsel %vm1782_vm3, %v1783_v62, %v3910_v47  ;;  %v1440_v3 = vshll.u32 %v1439_v17, 16  ;;  %vm1673_vm5 = vmand %vm1657_vm15, %vm219_vm0  ;;  %v1423_v16 = vpop.xlane.xlu0 %1422  ;;  %v4301_v21 = vld [vmem:[#allocation75_spill] sm:$0xff] }
 0x832   :  { %v1510_v36 = vshll.u32 %v1509_v10, 16  ;;  %v1438_v4 = vcvt.f32.s32 %v1437_v49  ;;  %v1508_v1 = vcvt.f32.s32 %v1507_v52  ;;  %v2088_v24 = vpop.eup %2087  ;;  %v1551_v46 = vcvt.f32.s32 %v3711_v7  ;;  %vm1664_vm4 = vmand %vm1648_vm1, %vm219_vm0  ;;  %v4302_v49 = vld [vmem:[#allocation20_spill] sm:$0xff] }
 0x833   :  { %v1425_v14 = vcvt.f32.s32 %v3715_v55  ;;  %v1689_v29 = vsel %vm1673_vm5, %v4293_v20, 0.0  ;;  %v1805_v5 = vsel %vm1803_vm7, %v1804_v19, %v3938_v6  ;;  %v2090_v62 = vpop.eup %2089  ;;  %v1680_v61 = vsel %vm1664_vm4, %v4294_v44, 0.0 }
 0x834   :  { %v1865_v47 = vmul.f32 %v2088_v24, %v1689_v29  ;;  %v1441_v50 = vadd.s32 %v1440_v3, %v1438_v4  ;;  %v1511_v31 = vadd.s32 %v1510_v36, %v1508_v1  ;;  %v1856_v7 = vmul.f32 %v2090_v62, %v1680_v61  ;;  %v1465_v57 = vpop.xlane.xlu1 %1464  ;;  %v4303_v1 = vld [vmem:[#allocation21_spill] sm:$0xff] }
 0x835   :  { %2095 = vrcp.f32 %v1819_v28  ;;  %v1818_v55 = vmax.f32 %v1784_v25, 1e-12  ;;  %v4295_v48 = vand.u32 2147483648, %v3643_v59  ;;  %v1821_v19 = vmax.f32 %v1805_v5, 1e-12  ;;  %v4300_v28 = vld [vmem:[#allocation74_spill] sm:$0xff] }
 0x836   :  { %1881 = vst [vmem:[#allocation7 + $0x58] sm:$0xff] %v1865_v47  ;;  %vm1587_vm3 = vcmp.eq.s32.totalorder %v2231_v41, %v1441_v50  ;;  %vm1592_vm6 = vcmp.eq.s32.totalorder %v2231_v41, %v1511_v31  ;;  %2097 = vrcp.f32 %v1810_v12  ;;  %v1552_v6 = vshll.u32 %v1551_v46, 16  ;;  %1872 = vst [vmem:[#allocation7 + $0x10] sm:$0xff] %v1856_v7  ;;  %v4304_v47 = vld [vmem:[#allocation76_spill] sm:$0xff] }
 0x837   :  { %v1742_v53 = vsel %vm1740_vm12, %v4295_v48, %v3960_v9  ;;  %v1603_v23 = vsel %vm1587_vm3, -inf, %v4296_v15  ;;  %v1608_v33 = vsel %vm1592_vm6, -inf, %v4297_v58  ;;  %v1550_v42 = vcvt.f32.s32 %v1549_v2  ;;  %v4305_v48 = vld [vmem:[#allocation77_spill] sm:$0xff]  ;;  %v4306_v2 = vld [vmem:[#allocation23_spill] sm:$0xff] }
 0x838   :  { %v1426_v30 = vshll.u32 %v1425_v14, 16  ;;  %vm1651_vm7 = vcmp.eq.f32.partialorder %v1603_v23, -inf  ;;  %vm1656_vm9 = vcmp.eq.f32.partialorder %v1608_v33, -inf  ;;  %v1424_v59 = vcvt.f32.s32 %v1423_v16  ;;  %v1577_v46 = vpop.xlane.xlu1 %1576  ;;  %v4307_v23 = vld [vmem:[#allocation78_spill] sm:$0xff] }
 0x839   :  { %v1467_v9 = vcvt.f32.s32 %v3722_v40  ;;  %vm1667_vm11 = vmand %vm1651_vm7, %vm219_vm0  ;;  %v1553_v38 = vadd.s32 %v1552_v6, %v1550_v42  ;;  %2099 = vrcp.f32 %v1813_v51  ;;  %v1812_v26 = vmax.f32 %v1742_v53, 1e-12  ;;  %v2092_v63 = vpop.eup %2091  ;;  %v4308_v42 = vld [vmem:[#allocation22_spill] sm:$0xff] }
 0x83a   :  { %v1683_v35 = vsel %vm1667_vm11, %v4298_v45, 0.0  ;;  %vm1672_vm8 = vmand %vm1656_vm9, %vm219_vm0  ;;  %v1427_v27 = vadd.s32 %v1426_v30, %v1424_v59  ;;  %2101 = vrcp.f32 %v1818_v55  ;;  %v1798_v40 = vsel %vm1796_vm14, %v1797_v32, %v3997_v22 }
 0x83b   :  { %v2094_v11 = vpop.eup %2093  ;;  %v1537_v39 = vcvt.f32.s32 %v3727_v37  ;;  %v1859_v13 = vmul.f32 %v2092_v63, %v1683_v35  ;;  %v1688_v17 = vsel %vm1672_vm8, %v4299_v54, 0.0  ;;  %vm1595_vm12 = vcmp.eq.s32.totalorder %v2231_v41, %v1553_v38  ;;  %v4309_v38 = vld [vmem:[#allocation79_spill] sm:$0xff]  ;;  %v4310_v63 = vld [vmem:[#allocation24_spill] sm:$0xff] }
 0x83c   :  { %v1579_v10 = vcvt.f32.s32 %v3731_v43  ;;  %v1864_v34 = vmul.f32 %v2094_v11, %v1688_v17  ;;  %v1611_v12 = vsel %vm1595_vm12, -inf, %v4300_v28  ;;  %vm1586_vm2 = vcmp.eq.s32.totalorder %v2231_v41, %v1427_v27  ;;  %v1535_v43 = vpop.xlane.xlu0 %1534  ;;  %v4311_v11 = vld [vmem:[#allocation25_spill] sm:$0xff]  ;;  %v4312_v54 = vld [vmem:[#allocation80_spill] sm:$0xff] }
 0x83d   :  { %v1468_v0 = vshll.u32 %v1467_v9, 16  ;;  %1875 = vst [vmem:[#allocation7 + $0x28] sm:$0xff] %v1859_v13  ;;  %vm1659_vm10 = vcmp.eq.f32.partialorder %v1611_v12, -inf  ;;  %v1602_v32 = vsel %vm1586_vm2, -inf, %v4301_v21  ;;  %v1466_v22 = vcvt.f32.s32 %v1465_v57 }
 0x83e   :  { %v1453_v37 = vcvt.f32.s32 %v3736_v18  ;;  %1880 = vst [vmem:[#allocation7 + $0x50] sm:$0xff] %v1864_v34  ;;  %vm1675_vm13 = vmand %vm1659_vm10, %vm219_vm0  ;;  %vm1650_vm14 = vcmp.eq.f32.partialorder %v1602_v32, -inf  ;;  %2103 = vrcp.f32 %v1821_v19  ;;  %v1820_v8 = vmax.f32 %v1798_v40, 1e-12  ;;  %v4313_v34 = vld [vmem:[#allocation26_spill] sm:$0xff] }
 0x83f   :  { %v2096_v60 = vpop.eup %2095  ;;  %v1538_v51 = vshll.u32 %v1537_v39, 16  ;;  %v1691_v52 = vsel %vm1675_vm13, %v4302_v49, 0.0  ;;  %vm1666_vm15 = vmand %vm1650_vm14, %vm219_vm0  ;;  %v1469_v25 = vadd.s32 %v1468_v0, %v1466_v22  ;;  %v1536_v3 = vcvt.f32.s32 %v1535_v43 }
 0x840   :  { %v2098_v36 = vpop.eup %2097  ;;  %v1580_v4 = vshll.u32 %v1579_v10, 16  ;;  %v1867_v18 = vmul.f32 %v2096_v60, %v1691_v52  ;;  %v1682_v24 = vsel %vm1666_vm15, %v4303_v1, 0.0  ;;  %2105 = vrcp.f32 %v1812_v26  ;;  %v1451_v61 = vpop.xlane.xlu0 %1450 }
 0x841   :  { %v1858_v14 = vmul.f32 %v2098_v36, %v1682_v24  ;;  %vm1589_vm1 = vcmp.eq.s32.totalorder %v2231_v41, %v1469_v25  ;;  %v1539_v20 = vadd.s32 %v1538_v51, %v1536_v3  ;;  %v1578_v29 = vcvt.f32.s32 %v1577_v46 }
 0x842   :  { %v1454_v5 = vshll.u32 %v1453_v37, 16  ;;  %v1565_v62 = vcvt.f32.s32 %v3740_v56  ;;  %1883 = vst [vmem:[#allocation7 + $0x68] sm:$0xff] %v1867_v18  ;;  %v1605_v44 = vsel %vm1589_vm1, -inf, %v4304_v47  ;;  %v1452_v7 = vcvt.f32.s32 %v1451_v61 }
 0x843   :  { %v2100_v50 = vpop.eup %2099  ;;  %1874 = vst [vmem:[#allocation7 + $0x20] sm:$0xff] %v1858_v14  ;;  %vm1653_vm5 = vcmp.eq.f32.partialorder %v1605_v44, -inf  ;;  %vm1594_vm4 = vcmp.eq.s32.totalorder %v2231_v41, %v1539_v20  ;;  %v1581_v31 = vadd.s32 %v1580_v4, %v1578_v29  ;;  %2107 = vrcp.f32 %v1820_v8 }
 0x844   :  { %v2102_v55 = vpop.eup %2101  ;;  %vm1669_vm3 = vmand %vm1653_vm5, %vm219_vm0  ;;  %v1610_v53 = vsel %vm1594_vm4, -inf, %v4305_v48  ;;  %v1455_v19 = vadd.s32 %v1454_v5, %v1452_v7  ;;  %v1566_v6 = vshll.u32 %v1565_v62, 16  ;;  %v1563_v33 = vpop.xlane.xlu0 %1562 }
 0x845   :  { %v1685_v56 = vsel %vm1669_vm3, %v4306_v2, 0.0  ;;  %vm1658_vm6 = vcmp.eq.f32.partialorder %v1610_v53, -inf  ;;  %vm1597_vm7 = vcmp.eq.s32.totalorder %v2231_v41, %v1581_v31  ;;  %v1564_v30 = vcvt.f32.s32 %v1563_v33 }
 0x846   :  { %v1861_v15 = vmul.f32 %v2100_v50, %v1685_v56  ;;  %vm1674_vm9 = vmand %vm1658_vm6, %vm219_vm0  ;;  %v1613_v58 = vsel %vm1597_vm7, -inf, %v4307_v23  ;;  %vm1588_vm8 = vcmp.eq.s32.totalorder %v2231_v41, %v1455_v19 }
 0x847   :  { %v1690_v16 = vsel %vm1674_vm9, %v4308_v42, 0.0  ;;  %vm1661_vm11 = vcmp.eq.f32.partialorder %v1613_v58, -inf  ;;  %v1604_v26 = vsel %vm1588_vm8, -inf, %v4309_v38  ;;  %v1567_v35 = vadd.s32 %v1566_v6, %v1564_v30 }
 0x848   :  { %v2104_v59 = vpop.eup %2103  ;;  %1877 = vst [vmem:[#allocation7 + $0x38] sm:$0xff] %v1861_v15  ;;  %v1866_v9 = vmul.f32 %v2102_v55, %v1690_v16  ;;  %vm1677_vm12 = vmand %vm1661_vm11, %vm219_vm0  ;;  %vm1652_vm2 = vcmp.eq.f32.partialorder %v1604_v26, -inf }
 0x849   :  { %v1693_v45 = vsel %vm1677_vm12, %v4310_v63, 0.0  ;;  %vm1668_vm10 = vmand %vm1652_vm2, %vm219_vm0  ;;  %vm1596_vm13 = vcmp.eq.s32.totalorder %v2231_v41, %v1567_v35 }
 0x84a   :  { %v2106_v27 = vpop.eup %2105  ;;  %1882 = vst [vmem:[#allocation7 + $0x60] sm:$0xff] %v1866_v9  ;;  %v1869_v40 = vmul.f32 %v2104_v59, %v1693_v45  ;;  %v1684_v39 = vsel %vm1668_vm10, %v4311_v11, 0.0  ;;  %v1612_v17 = vsel %vm1596_vm13, -inf, %v4312_v54 }
 0x84b   :  { %v1860_v13 = vmul.f32 %v2106_v27, %v1684_v39  ;;  %vm1660_vm14 = vcmp.eq.f32.partialorder %v1612_v17, -inf }
 0x84c   :  { %1885 = vst [vmem:[#allocation7 + $0x78] sm:$0xff] %v1869_v40  ;;  %vm1676_vm15 = vmand %vm1660_vm14, %vm219_vm0 }
 0x84d   :  { %v2108_v10 = vpop.eup %2107  ;;  %1876 = vst [vmem:[#allocation7 + $0x30] sm:$0xff] %v1860_v13  ;;  %v1692_v28 = vsel %vm1676_vm15, %v4313_v34, 0.0 }
 0x84e   :  { %v1868_v12 = vmul.f32 %v2108_v10, %v1692_v28 }
 0x850   :  { %1884 = vst [vmem:[#allocation7 + $0x70] sm:$0xff] %v1868_v12 }
 0x851   :  { %2164 = shalt.err (!%p2161_p6)
}
 0x852   :  { %s2165_s10 = scalar_lea.hbm %s4100_s2, 2048 }
 0x853   :  { %p2166_p7 = scmp.ne.s32.totalorder %s4100_s2, %s2165_s10  ;;  %p2169_p8 = scmp.lt.u32.totalorder %s2165_s10, %s4100_s2 }
 0x855   :  { %p2171_p9 = pnand %p2169_p8, %p2166_p7 }
 0x857   :  { %2174 = shalt.err (!%p2171_p9)
}
 0x858   :  { %1897 = dma.vmem_to_hbm [thread:$0]  %s1892_s6, 2048, %s4100_s2, [#allocation4], %s2182_s19, %s2182_s19, %s2183_s20  }
 0x859   :  { %2179 = dma.done.wait [#allocation4], 2048  }
 0x85a   :  { %2180 = vsyncadd [#allocation4], 4294965248 }
 0x85b   :  { %1901 = vsyncpa [#allocation3], 1 }
 0x85c   :  { %1902 = vsyncpa [#allocation6], 1 }
 0x85d   :  { %1903 = vsyncpa [#allocation4], 1 }

// kernel: tpu_custom_call.1
= control target key start
LH: loop header
LB: loop body
LE: loop exit
PB: predicated region body
PF: predicated region fallthrough
CT: control target
= control target key end

     0   :  { %7 = vsyncpa [#allocation3], 0  ;;  %s4098_s0 = inlined_call_operand.hbm [shape: f32[128,128], index: 0, kind: input, shape index: {}]   ;;  %s4099_s1 = inlined_call_operand.hbm [shape: f32[128,128], index: 1, kind: input, shape index: {}]   ;;  %s4100_s2 = inlined_call_operand.hbm [shape: f32[128,128], index: 2, kind: output, shape index: {}]  }
   0x1   :  { %8 = vsyncpa [#allocation6], 0 }
   0x2   :  { %9 = vsyncpa [#allocation4], 0  ;;  %s2181_s9 = smov [#allocation2]   ;;  %s2109_s13 = scalar_lea.hbm %s4098_s0, 2048 }
   0x3   :  { %s15_s10 = sshll.u32 %s2181_s9, 4  ;;  %p2110_p0 = scmp.ne.s32.totalorder %s4098_s0, %s2109_s13  ;;  %s16_s10 = int_to_ptr.vmem [resolvable:$true] %s15_s10 }
   0x4   :  { %p2113_p1 = scmp.lt.u32.totalorder %s2109_s13, %s4098_s0 }
   0x6   :  { %p2115_p2 = pnand %p2113_p1, %p2110_p0 }
   0x8   :  { %2118 = shalt.err (!%p2115_p2)
}
   0x9   :  { %s2119_s18 = scalar_lea.vmem %s16_s10, 2048  ;;  %p2124_p4 = scmp.lt.s32.totalorder %s16_s10, %s16_s10 }
   0xa   :  { %p2120_p3 = scmp.ne.s32.totalorder %s16_s10, %s2119_s18  ;;  %p2125_p5 = scmp.lt.s32.totalorder %s2119_s18, %s2119_s18 }
   0xc   :  { %p2126_p6 = por %p2125_p5, %p2124_p4 }
   0xe   :  { %p2127_p7 = pnand %p2126_p6, %p2120_p3 }
  0x10   :  { %2130 = shalt.err (!%p2127_p7)
}
  0x11   :  { %s2182_s19 = smov 128   ;;  %s2183_s20 = smov 8  }
  0x12   :  { %21 = dma.hbm_to_vmem [thread:$0]  %s4098_s0, 2048, %s16_s10, [#allocation3], %s2182_s19, %s2182_s19, %s2183_s20  }
  0x13   :  { %s2184_s23 = smov [#allocation5]   ;;  %s2131_s27 = scalar_lea.hbm %s4099_s1, 2048 }
  0x14   :  { %s27_s24 = sshll.u32 %s2184_s23, 4  ;;  %p2132_p8 = scmp.ne.s32.totalorder %s4099_s1, %s2131_s27  ;;  %s28_s24 = int_to_ptr.vmem [resolvable:$true] %s27_s24 }
  0x15   :  { %p2135_p9 = scmp.lt.u32.totalorder %s2131_s27, %s4099_s1 }
  0x17   :  { %p2137_p10 = pnand %p2135_p9, %p2132_p8 }
  0x19   :  { %2140 = shalt.err (!%p2137_p10)
}
  0x1a   :  { %s2141_s4 = scalar_lea.vmem %s28_s24, 2048  ;;  %p2146_p12 = scmp.lt.s32.totalorder %s28_s24, %s28_s24 }
  0x1b   :  { %p2142_p11 = scmp.ne.s32.totalorder %s28_s24, %s2141_s4  ;;  %p2147_p13 = scmp.lt.s32.totalorder %s2141_s4, %s2141_s4 }
  0x1d   :  { %p2148_p0 = por %p2147_p13, %p2146_p12 }
  0x1f   :  { %p2149_p1 = pnand %p2148_p0, %p2142_p11 }
  0x21   :  { %2152 = shalt.err (!%p2149_p1)
}
  0x22   :  { %33 = dma.hbm_to_vmem [thread:$0]  %s4099_s1, 2048, %s28_s24, [#allocation6], %s2182_s19, %s2182_s19, %s2183_s20  }
  0x23   :  { %2175 = dma.done.wait [#allocation3], 2048  }
  0x24   :  { %2176 = vsyncadd [#allocation3], 4294965248 }
  0x25   :  { %2177 = dma.done.wait [#allocation6], 2048  }
  0x26   :  { %2178 = vsyncadd [#allocation6], 4294965248  ;;  %v56_v0 = vld [vmem:[#allocation5] sm:$0xff]  ;;  %v57_v1 = vld [vmem:[#allocation5 + $0x8] sm:$0xff]  ;;  %v217_v40 = vlaneseq  ;;  %s2185_s1 = smov [#allocation7]  }
  0x27   :  { %v58_v2 = vld [vmem:[#allocation5 + $0x10] sm:$0xff]  ;;  %v1992_v3 = vpack.c.bf16 %v57_v1, %v56_v0  ;;  %v59_v4 = vld [vmem:[#allocation5 + $0x18] sm:$0xff]  ;;  %v40_v6 = vld [vmem:[#allocation2] sm:$0xff]  ;;  %s1891_s6 = sshll.u32 %s2185_s1, 4  ;;  %s1892_s6 = int_to_ptr.vmem [resolvable:$true] %s1891_s6 }
  0x28   :  { %v1996_v5 = vpack.c.bf16 %v59_v4, %v58_v2  ;;  %v48_v7 = vld [vmem:[#allocation2 + $0x40] sm:$0xff]  ;;  %v61_v9 = vld [vmem:[#allocation5 + $0x28] sm:$0xff]  ;;  %1968 = vmatprep.mubr.f32.mxu0 %v40_v6  ;;  %v62_v11 = vld [vmem:[#allocation5 + $0x30] sm:$0xff]  ;;  %v2231_v41 = vand.u32 127, %v217_v40  ;;  %s2153_s7 = scalar_lea.vmem %s1892_s6, 2048  ;;  %p2158_p3 = scmp.lt.s32.totalorder %s1892_s6, %s1892_s6 }
  0x29   :  { %1993 = vmatprep.subr.bf16.mxu0 %v1992_v3  ;;  %2024 = vmatprep.subr.bf16.mxu1 %v1992_v3  ;;  %v60_v8 = vld [vmem:[#allocation5 + $0x20] sm:$0xff]  ;;  %v63_v12 = vld [vmem:[#allocation5 + $0x38] sm:$0xff]  ;;  %v65_v15 = vld [vmem:[#allocation5 + $0x48] sm:$0xff]  ;;  %p2154_p2 = scmp.ne.s32.totalorder %s1892_s6, %s2153_s7  ;;  %p2159_p4 = scmp.lt.s32.totalorder %s2153_s7, %s2153_s7 }
  0x2a   :  { %1995 = vmatpush3.bf16.xpose.msra.mxu0 %v1992_v3  ;;  %2032 = vmatpush3.bf16.xpose.msra.mxu1 %v1992_v3  ;;  %v2000_v10 = vpack.c.bf16 %v61_v9, %v60_v8  ;;  %v2004_v13 = vpack.c.bf16 %v63_v12, %v62_v11  ;;  %v64_v14 = vld [vmem:[#allocation5 + $0x40] sm:$0xff]  ;;  %v66_v17 = vld [vmem:[#allocation5 + $0x50] sm:$0xff]  ;;  %v67_v18 = vld [vmem:[#allocation5 + $0x58] sm:$0xff]  ;;  %vm219_vm0 = vcmp.lt.s32.totalorder %v2231_v41, 16 }
  0x2b   :  { %1997 = vmatprep.subr.bf16.mxu0 %v1996_v5  ;;  %2025 = vmatprep.subr.bf16.mxu1 %v1996_v5  ;;  %v2008_v16 = vpack.c.bf16 %v65_v15, %v64_v14  ;;  %v2012_v19 = vpack.c.bf16 %v67_v18, %v66_v17  ;;  %v68_v20 = vld [vmem:[#allocation5 + $0x60] sm:$0xff]  ;;  %v69_v21 = vld [vmem:[#allocation5 + $0x68] sm:$0xff]  ;;  %v70_v23 = vld [vmem:[#allocation5 + $0x70] sm:$0xff]  ;;  %p2160_p5 = por %p2159_p4, %p2158_p3 }
  0x2c   :  { %1980 = vmatprep.mubr.f32.mxu1 %v48_v7  ;;  %v2016_v22 = vpack.c.bf16 %v69_v21, %v68_v20  ;;  %v71_v24 = vld [vmem:[#allocation5 + $0x78] sm:$0xff]  ;;  %v41_v26 = vld [vmem:[#allocation2 + $0x8] sm:$0xff]  ;;  %v42_v28 = vld [vmem:[#allocation2 + $0x10] sm:$0xff] }
  0x2d   :  { %v2020_v25 = vpack.c.bf16 %v71_v24, %v70_v23  ;;  %v49_v27 = vld [vmem:[#allocation2 + $0x48] sm:$0xff]  ;;  %v50_v29 = vld [vmem:[#allocation2 + $0x50] sm:$0xff]  ;;  %v43_v30 = vld [vmem:[#allocation2 + $0x18] sm:$0xff]  ;;  %p2161_p6 = pnand %p2160_p5, %p2154_p2 }
  0x2e   :  { %v51_v31 = vld [vmem:[#allocation2 + $0x58] sm:$0xff]  ;;  %v44_v32 = vld [vmem:[#allocation2 + $0x20] sm:$0xff]  ;;  %v45_v34 = vld [vmem:[#allocation2 + $0x28] sm:$0xff] }
  0x2f   :  { %v52_v33 = vld [vmem:[#allocation2 + $0x60] sm:$0xff]  ;;  %v53_v35 = vld [vmem:[#allocation2 + $0x68] sm:$0xff]  ;;  %v46_v36 = vld [vmem:[#allocation2 + $0x30] sm:$0xff] }
  0x30   :  { %v54_v37 = vld [vmem:[#allocation2 + $0x70] sm:$0xff]  ;;  %v47_v38 = vld [vmem:[#allocation2 + $0x38] sm:$0xff] }
  0x31   :  { %v55_v39 = vld [vmem:[#allocation2 + $0x78] sm:$0xff] }
  0x32   :  { %1999 = vmatpush3.bf16.xpose.msra.mxu0 %v1996_v5  ;;  %2033 = vmatpush3.bf16.xpose.msra.mxu1 %v1996_v5 }
  0x33   :  { %2001 = vmatprep.subr.bf16.mxu0 %v2000_v10  ;;  %2026 = vmatprep.subr.bf16.mxu1 %v2000_v10 }
  0x3a   :  { %2003 = vmatpush3.bf16.xpose.msra.mxu0 %v2000_v10  ;;  %2034 = vmatpush3.bf16.xpose.msra.mxu1 %v2000_v10 }
  0x3b   :  { %2005 = vmatprep.subr.bf16.mxu0 %v2004_v13  ;;  %2027 = vmatprep.subr.bf16.mxu1 %v2004_v13 }
  0x42   :  { %2007 = vmatpush3.bf16.xpose.msra.mxu0 %v2004_v13  ;;  %2035 = vmatpush3.bf16.xpose.msra.mxu1 %v2004_v13 }
  0x43   :  { %2009 = vmatprep.subr.bf16.mxu0 %v2008_v16  ;;  %2028 = vmatprep.subr.bf16.mxu1 %v2008_v16 }
  0x4a   :  { %2011 = vmatpush3.bf16.xpose.msra.mxu0 %v2008_v16  ;;  %2036 = vmatpush3.bf16.xpose.msra.mxu1 %v2008_v16 }
  0x4b   :  { %2013 = vmatprep.subr.bf16.mxu0 %v2012_v19  ;;  %2029 = vmatprep.subr.bf16.mxu1 %v2012_v19 }
  0x52   :  { %2015 = vmatpush3.bf16.xpose.msra.mxu0 %v2012_v19  ;;  %2037 = vmatpush3.bf16.xpose.msra.mxu1 %v2012_v19 }
  0x53   :  { %2017 = vmatprep.subr.bf16.mxu0 %v2016_v22  ;;  %2030 = vmatprep.subr.bf16.mxu1 %v2016_v22 }
  0x5a   :  { %2019 = vmatpush3.bf16.xpose.msra.mxu0 %v2016_v22  ;;  %2038 = vmatpush3.bf16.xpose.msra.mxu1 %v2016_v22 }
  0x5b   :  { %2021 = vmatprep.subr.bf16.mxu0 %v2020_v25  ;;  %2031 = vmatprep.subr.bf16.mxu1 %v2020_v25 }
  0x62   :  { %2023 = vmatpush3.bf16.xpose.msra.mxu0 %v2020_v25  ;;  %2039 = vmatpush3.bf16.xpose.msra.mxu1 %v2020_v25 }
  0x69   :  { %1969 = vmatmul.mubr.f32.vlgmr.msra.gmra.mrb[0].mxu0 %v41_v26  ;;  %1981 = vmatmul.mubr.f32.vlgmr.msra.gmra.mrb[0].mxu1 %v49_v27 }
  0x6a   :  { %1971 = vmatprep.mubr.f32.mxu0 %v42_v28  ;;  %1983 = vmatprep.mubr.f32.mxu1 %v50_v29 }
  0x6d   :  { %1972 = vmatmul.mubr.f32.gmra.mrb[2].mxu0 %v43_v30  ;;  %1984 = vmatmul.mubr.f32.gmra.mrb[2].mxu1 %v51_v31 }
  0x6e   :  { %1974 = vmatprep.mubr.f32.mxu0 %v44_v32  ;;  %1986 = vmatprep.mubr.f32.mxu1 %v52_v33 }
  0x71   :  { %1975 = vmatmul.mubr.f32.gmra.mrb[4].mxu0 %v45_v34  ;;  %1987 = vmatmul.mubr.f32.gmra.mrb[4].mxu1 %v53_v35 }
  0x72   :  { %1977 = vmatprep.mubr.f32.mxu0 %v46_v36  ;;  %1989 = vmatprep.mubr.f32.mxu1 %v54_v37 }
  0x75   :  { %1978 = vmatmul.mubr.f32.gmra.mrb[6].mxu0 %v47_v38  ;;  %1990 = vmatmul.mubr.f32.gmra.mrb[6].mxu1 %v55_v39 }
 0x13c   :  { %v2234_v42 = vpop.f32.mrb[0].mxu0  ;;  %v2236_v43 = vpop.f32.mrb[0].mxu1 }
 0x13d   :  { %4171 = vst [vmem:[#allocation11_spill] sm:$0xff] %v2234_v42  ;;  %4172 = vst [vmem:[#allocation12_spill] sm:$0xff] %v2236_v43  ;;  %v2238_v44 = vpop.f32.mrb[1].mxu0  ;;  %v2240_v45 = vpop.f32.mrb[1].mxu1  ;;  %v2245_v46 = vsel %vm219_vm0, %v2236_v43, -inf  ;;  %v2250_v47 = vsel %vm219_vm0, %v2234_v42, -inf }
 0x13e   :  { %4173 = vst [vmem:[#allocation13_spill] sm:$0xff] %v2238_v44  ;;  %4174 = vst [vmem:[#allocation14_spill] sm:$0xff] %v2240_v45  ;;  %256 = vmax.xlane.f32.xlu1 %v2245_v46  ;;  %240 = vmax.xlane.f32.xlu0 %v2250_v47  ;;  %v2263_v51 = vsel %vm219_vm0, %v2238_v44, -inf  ;;  %v2286_v57 = vsel %vm219_vm0, %v2240_v45, -inf }
 0x140   :  { %v2254_v48 = vpop.f32.mrb[2].mxu0  ;;  %v2256_v49 = vpop.f32.mrb[2].mxu1 }
 0x141   :  { %4175 = vst [vmem:[#allocation15_spill] sm:$0xff] %v2254_v48  ;;  %4176 = vst [vmem:[#allocation16_spill] sm:$0xff] %v2256_v49  ;;  %v2258_v50 = vpop.f32.mrb[3].mxu0  ;;  %v2268_v52 = vsel %vm219_vm0, %v2254_v48, -inf  ;;  %v2270_v53 = vpop.f32.mrb[3].mxu1  ;;  %v2277_v54 = vsel %vm219_vm0, %v2256_v49, -inf }
 0x142   :  { %4177 = vst [vmem:[#allocation17_spill] sm:$0xff] %v2258_v50  ;;  %4178 = vst [vmem:[#allocation18_spill] sm:$0xff] %v2270_v53  ;;  %238 = vmax.xlane.f32.xlu0 %v2263_v51  ;;  %244 = vmax.xlane.f32.xlu1 %v2268_v52  ;;  %v2301_v62 = vsel %vm219_vm0, %v2270_v53, -inf  ;;  %v2306_v63 = vsel %vm219_vm0, %v2258_v50, -inf }
 0x144   :  { %v2279_v55 = vpop.f32.mrb[4].mxu0  ;;  %v2281_v56 = vpop.f32.mrb[4].mxu1 }
 0x145   :  { %4179 = vst [vmem:[#allocation19_spill] sm:$0xff] %v2279_v55  ;;  %4180 = vst [vmem:[#allocation20_spill] sm:$0xff] %v2281_v56  ;;  %v2288_v58 = vpop.f32.mrb[5].mxu0  ;;  %v2290_v59 = vpop.f32.mrb[5].mxu1  ;;  %v2317_v2 = vsel %vm219_vm0, %v2279_v55, -inf  ;;  %v2329_v4 = vsel %vm219_vm0, %v2281_v56, -inf }
 0x146   :  { %4181 = vst [vmem:[#allocation21_spill] sm:$0xff] %v2288_v58  ;;  %4182 = vst [vmem:[#allocation22_spill] sm:$0xff] %v2290_v59  ;;  %254 = vmax.xlane.f32.xlu0 %v2286_v57  ;;  %260 = vmax.xlane.f32.xlu1 %v2277_v54  ;;  %v2322_v3 = vsel %vm219_vm0, %v2288_v58, -inf  ;;  %v2334_v5 = vsel %vm219_vm0, %v2290_v59, -inf }
 0x148   :  { %v2294_v60 = vpop.f32.mrb[6].mxu0  ;;  %v2296_v61 = vpop.f32.mrb[6].mxu1 }
 0x149   :  { %4183 = vst [vmem:[#allocation23_spill] sm:$0xff] %v2294_v60  ;;  %4184 = vst [vmem:[#allocation24_spill] sm:$0xff] %v2296_v61  ;;  %v2308_v0 = vpop.f32.mrb[7].mxu0  ;;  %v2310_v1 = vpop.f32.mrb[7].mxu1  ;;  %v2346_v7 = vsel %vm219_vm0, %v2294_v60, -inf  ;;  %v2358_v9 = vsel %vm219_vm0, %v2296_v61, -inf }
 0x14a   :  { %4185 = vst [vmem:[#allocation25_spill] sm:$0xff] %v2308_v0  ;;  %4186 = vst [vmem:[#allocation26_spill] sm:$0xff] %v2310_v1  ;;  %258 = vmax.xlane.f32.xlu0 %v2301_v62  ;;  %242 = vmax.xlane.f32.xlu1 %v2306_v63  ;;  %v2341_v6 = vsel %vm219_vm0, %v2308_v0, -inf  ;;  %v2353_v8 = vsel %vm219_vm0, %v2310_v1, -inf }
 0x14e   :  { %248 = vmax.xlane.f32.xlu1 %v2317_v2  ;;  %246 = vmax.xlane.f32.xlu0 %v2322_v3 }
 0x152   :  { %264 = vmax.xlane.f32.xlu1 %v2329_v4  ;;  %262 = vmax.xlane.f32.xlu0 %v2334_v5 }
 0x156   :  { %252 = vmax.xlane.f32.xlu1 %v2346_v7  ;;  %250 = vmax.xlane.f32.xlu0 %v2341_v6 }
 0x15a   :  { %268 = vmax.xlane.f32.xlu1 %v2358_v9  ;;  %266 = vmax.xlane.f32.xlu0 %v2353_v8 }
 0x1cb   :  { %v2362_v10 = vpop.xlane.xlu1 %256  ;;  %v2364_v11 = vpop.xlane.xlu0 %240 }
 0x1cc   :  { %vm279_vm1 = vcmp.eq.f32.partialorder %v2245_v46, %v2362_v10  ;;  %vm271_vm2 = vcmp.eq.f32.partialorder %v2250_v47, %v2364_v11 }
 0x1cd   :  { %v2371_v12 = vsel %vm271_vm2, %v2231_v41, 128  ;;  %v2375_v14 = vsel %vm279_vm1, %v2231_v41, 128 }
 0x1ce   :  { %v317_v13 = vshra.s32 %v2371_v12, 16  ;;  %v429_v18 = vshra.s32 %v2375_v14, 16 }
 0x1cf   :  { %v2377_v15 = vpop.xlane.xlu0 %238  ;;  %v2379_v16 = vpop.xlane.xlu1 %244 }
 0x1d0   :  { %4187 = vst [vmem:[#allocation27_spill] sm:$0xff] %v2377_v15  ;;  %4188 = vst [vmem:[#allocation28_spill] sm:$0xff] %v2379_v16  ;;  %vm270_vm3 = vcmp.eq.f32.partialorder %v2263_v51, %v2377_v15  ;;  %vm273_vm4 = vcmp.eq.f32.partialorder %v2268_v52, %v2379_v16  ;;  %v2385_v17 = vcvt.s32.f32 %v317_v13  ;;  %v2404_v24 = vcvt.s32.f32 %v429_v18 }
 0x1d1   :  { %v2389_v19 = vsel %vm270_vm3, %v2231_v41, 128  ;;  %v2393_v21 = vsel %vm273_vm4, %v2231_v41, 128 }
 0x1d2   :  { %v303_v20 = vshra.s32 %v2389_v19, 16  ;;  %320 = vmin.xlane.f32.xlu1 %v2385_v17  ;;  %v345_v26 = vshra.s32 %v2393_v21, 16 }
 0x1d3   :  { %v2396_v22 = vpop.xlane.xlu0 %254  ;;  %v2398_v23 = vpop.xlane.xlu1 %260 }
 0x1d4   :  { %4189 = vst [vmem:[#allocation29_spill] sm:$0xff] %v2396_v22  ;;  %4190 = vst [vmem:[#allocation30_spill] sm:$0xff] %v2398_v23  ;;  %vm278_vm5 = vcmp.eq.f32.partialorder %v2286_v57, %v2396_v22  ;;  %vm281_vm6 = vcmp.eq.f32.partialorder %v2277_v54, %v2398_v23  ;;  %v2406_v25 = vcvt.s32.f32 %v303_v20  ;;  %v2426_v32 = vcvt.s32.f32 %v345_v26 }
 0x1d5   :  { %v2410_v27 = vsel %vm278_vm5, %v2231_v41, 128  ;;  %v2414_v29 = vsel %vm281_vm6, %v2231_v41, 128 }
 0x1d6   :  { %v415_v28 = vshra.s32 %v2410_v27, 16  ;;  %432 = vmin.xlane.f32.xlu1 %v2404_v24  ;;  %306 = vmin.xlane.f32.xlu0 %v2406_v25  ;;  %v457_v34 = vshra.s32 %v2414_v29, 16  ;;  %v414_v22 = vand.u32 65535, %v2410_v27 }
 0x1d7   :  { %v2418_v30 = vpop.xlane.xlu0 %258  ;;  %v2420_v31 = vpop.xlane.xlu1 %242 }
 0x1d8   :  { %4191 = vst [vmem:[#allocation31_spill] sm:$0xff] %v2418_v30  ;;  %4192 = vst [vmem:[#allocation32_spill] sm:$0xff] %v2420_v31  ;;  %vm280_vm7 = vcmp.eq.f32.partialorder %v2301_v62, %v2418_v30  ;;  %vm272_vm8 = vcmp.eq.f32.partialorder %v2306_v63, %v2420_v31  ;;  %v2428_v33 = vcvt.s32.f32 %v415_v28  ;;  %v2448_v40 = vcvt.s32.f32 %v457_v34 }
 0x1d9   :  { %v2432_v35 = vsel %vm272_vm8, %v2231_v41, 128  ;;  %v2436_v37 = vsel %vm280_vm7, %v2231_v41, 128 }
 0x1da   :  { %v331_v36 = vshra.s32 %v2432_v35, 16  ;;  %348 = vmin.xlane.f32.xlu1 %v2426_v32  ;;  %418 = vmin.xlane.f32.xlu0 %v2428_v33  ;;  %v443_v20 = vshra.s32 %v2436_v37, 16  ;;  %v330_v27 = vand.u32 65535, %v2432_v35  ;;  %v442_v35 = vand.u32 65535, %v2436_v37 }
 0x1db   :  { %v2440_v38 = vpop.xlane.xlu1 %248  ;;  %v2442_v39 = vpop.xlane.xlu0 %246 }
 0x1dc   :  { %4193 = vst [vmem:[#allocation33_spill] sm:$0xff] %v2440_v38  ;;  %4194 = vst [vmem:[#allocation34_spill] sm:$0xff] %v2442_v39  ;;  %vm275_vm9 = vcmp.eq.f32.partialorder %v2317_v2, %v2440_v38  ;;  %vm274_vm10 = vcmp.eq.f32.partialorder %v2322_v3, %v2442_v39  ;;  %v2450_v13 = vcvt.s32.f32 %v331_v36  ;;  %v2472_v0 = vcvt.s32.f32 %v443_v20 }
 0x1dd   :  { %v2453_v18 = vsel %vm275_vm9, %v2231_v41, 128  ;;  %v2458_v28 = vsel %vm274_vm10, %v2231_v41, 128 }
 0x1de   :  { %v373_v26 = vshra.s32 %v2453_v18, 16  ;;  %460 = vmin.xlane.f32.xlu1 %v2448_v40  ;;  %334 = vmin.xlane.f32.xlu0 %v2450_v13  ;;  %v359_v59 = vshra.s32 %v2458_v28, 16  ;;  %v358_v37 = vand.u32 65535, %v2458_v28 }
 0x1df   :  { %v2462_v1 = vpop.xlane.xlu1 %264  ;;  %v2464_v34 = vpop.xlane.xlu0 %262 }
 0x1e0   :  { %4195 = vst [vmem:[#allocation35_spill] sm:$0xff] %v2462_v1  ;;  %4196 = vst [vmem:[#allocation36_spill] sm:$0xff] %v2464_v34  ;;  %vm283_vm11 = vcmp.eq.f32.partialorder %v2329_v4, %v2462_v1  ;;  %vm282_vm12 = vcmp.eq.f32.partialorder %v2334_v5, %v2464_v34  ;;  %v2470_v36 = vcvt.s32.f32 %v373_v26  ;;  %v2494_v53 = vcvt.s32.f32 %v359_v59 }
 0x1e1   :  { %v2475_v61 = vsel %vm283_vm11, %v2231_v41, 128  ;;  %v2480_v58 = vsel %vm282_vm12, %v2231_v41, 128 }
 0x1e2   :  { %v485_v60 = vshra.s32 %v2475_v61, 16  ;;  %376 = vmin.xlane.f32.xlu1 %v2470_v36  ;;  %446 = vmin.xlane.f32.xlu0 %v2472_v0  ;;  %v471_v50 = vshra.s32 %v2480_v58, 16  ;;  %v470_v28 = vand.u32 65535, %v2480_v58 }
 0x1e3   :  { %v2484_v56 = vpop.xlane.xlu1 %252  ;;  %v2486_v26 = vpop.xlane.xlu0 %250 }
 0x1e4   :  { %4197 = vst [vmem:[#allocation37_spill] sm:$0xff] %v2484_v56  ;;  %4198 = vst [vmem:[#allocation38_spill] sm:$0xff] %v2486_v26  ;;  %vm277_vm13 = vcmp.eq.f32.partialorder %v2346_v7, %v2484_v56  ;;  %vm276_vm14 = vcmp.eq.f32.partialorder %v2341_v6, %v2486_v26  ;;  %v2492_v20 = vcvt.s32.f32 %v485_v60  ;;  %v2516_v44 = vcvt.s32.f32 %v471_v50 }
 0x1e5   :  { %v2497_v55 = vsel %vm277_vm13, %v2231_v41, 128  ;;  %v2502_v45 = vsel %vm276_vm14, %v2231_v41, 128  ;;  %v316_v56 = vand.u32 65535, %v2371_v12  ;;  %v344_v12 = vand.u32 65535, %v2393_v21 }
 0x1e6   :  { %v401_v49 = vshra.s32 %v2497_v55, 16  ;;  %488 = vmin.xlane.f32.xlu1 %v2492_v20  ;;  %362 = vmin.xlane.f32.xlu0 %v2494_v53  ;;  %v387_v42 = vshra.s32 %v2502_v45, 16  ;;  %v456_v21 = vand.u32 65535, %v2414_v29  ;;  %v372_v29 = vand.u32 65535, %v2453_v18 }
 0x1e7   :  { %v2506_v48 = vpop.xlane.xlu1 %268  ;;  %v2508_v60 = vpop.xlane.xlu0 %266  ;;  %v318_v1 = vcvt.s32.f32 %v316_v56  ;;  %v484_v18 = vand.u32 65535, %v2475_v61  ;;  %v400_v61 = vand.u32 65535, %v2497_v55  ;;  %v386_v58 = vand.u32 65535, %v2502_v45 }
 0x1e8   :  { %4199 = vst [vmem:[#allocation39_spill] sm:$0xff] %v2506_v48  ;;  %4200 = vst [vmem:[#allocation40_spill] sm:$0xff] %v2508_v60  ;;  %vm285_vm15 = vcmp.eq.f32.partialorder %v2358_v9, %v2506_v48  ;;  %vm284_vm1 = vcmp.eq.f32.partialorder %v2353_v8, %v2508_v60  ;;  %v2514_v59 = vcvt.s32.f32 %v401_v49  ;;  %v2530_v49 = vcvt.s32.f32 %v387_v42 }
 0x1e9   :  { %v2519_v43 = vsel %vm285_vm15, %v2231_v41, 128  ;;  %v2524_v34 = vsel %vm284_vm1, %v2231_v41, 128  ;;  %v302_v42 = vand.u32 65535, %v2389_v19  ;;  %v346_v19 = vcvt.s32.f32 %v344_v12 }
 0x1ea   :  { %v513_v26 = vshra.s32 %v2519_v43, 16  ;;  %404 = vmin.xlane.f32.xlu1 %v2514_v59  ;;  %474 = vmin.xlane.f32.xlu0 %v2516_v44  ;;  %v499_v50 = vshra.s32 %v2524_v34, 16  ;;  %v512_v55 = vand.u32 65535, %v2519_v43  ;;  %v498_v43 = vand.u32 65535, %v2524_v34 }
 0x1eb   :  { %v304_v23 = vcvt.s32.f32 %v302_v42 }
 0x1ec   :  { %v2528_v48 = vcvt.s32.f32 %v513_v26  ;;  %v2535_v60 = vcvt.s32.f32 %v499_v50  ;;  %v428_v26 = vand.u32 65535, %v2375_v14 }
 0x1ee   :  { %516 = vmin.xlane.f32.xlu1 %v2528_v48  ;;  %390 = vmin.xlane.f32.xlu0 %v2530_v49  ;;  %v430_v31 = vcvt.s32.f32 %v428_v26  ;;  %v458_v26 = vcvt.s32.f32 %v456_v21  ;;  %v486_v21 = vcvt.s32.f32 %v484_v18 }
 0x1f2   :  { %502 = vmin.xlane.f32.xlu0 %v2535_v60 }
 0x25f   :  { %v2539_v39 = vpop.xlane.xlu1 %320 }
 0x260   :  { %vm322_vm2 = vcmp.eq.f32.partialorder %v2385_v17, %v2539_v39  ;;  %v327_v34 = vcvt.f32.s32 %v2539_v39 }
 0x261   :  { %v323_v30 = vsel %vm322_vm2, %v318_v1, inf }
 0x262   :  { %324 = vmin.xlane.f32.xlu1 %v323_v30  ;;  %v416_v30 = vcvt.s32.f32 %v414_v22  ;;  %v332_v22 = vcvt.s32.f32 %v330_v27  ;;  %v360_v27 = vcvt.s32.f32 %v358_v37  ;;  %v328_v37 = vshll.u32 %v327_v34, 16 }
 0x263   :  { %v2545_v38 = vpop.xlane.xlu1 %432  ;;  %v2547_v50 = vpop.xlane.xlu0 %306 }
 0x264   :  { %vm434_vm3 = vcmp.eq.f32.partialorder %v2404_v24, %v2545_v38  ;;  %vm308_vm4 = vcmp.eq.f32.partialorder %v2406_v25, %v2547_v50  ;;  %v439_v18 = vcvt.f32.s32 %v2545_v38 }
 0x265   :  { %v435_v56 = vsel %vm434_vm3, %v430_v31, inf  ;;  %v309_v14 = vsel %vm308_vm4, %v304_v23, inf }
 0x266   :  { %436 = vmin.xlane.f32.xlu1 %v435_v56  ;;  %310 = vmin.xlane.f32.xlu0 %v309_v14  ;;  %v374_v56 = vcvt.s32.f32 %v372_v29  ;;  %v444_v14 = vcvt.s32.f32 %v442_v35 }
 0x267   :  { %v2555_v1 = vpop.xlane.xlu1 %348  ;;  %v2557_v17 = vpop.xlane.xlu0 %418 }
 0x268   :  { %vm350_vm5 = vcmp.eq.f32.partialorder %v2426_v32, %v2555_v1  ;;  %vm420_vm6 = vcmp.eq.f32.partialorder %v2428_v33, %v2557_v17 }
 0x269   :  { %v351_v24 = vsel %vm350_vm5, %v346_v19, inf  ;;  %v421_v23 = vsel %vm420_vm6, %v416_v30, inf }
 0x26a   :  { %352 = vmin.xlane.f32.xlu1 %v351_v24  ;;  %422 = vmin.xlane.f32.xlu0 %v421_v23 }
 0x26b   :  { %v2565_v25 = vpop.xlane.xlu1 %460  ;;  %v2567_v31 = vpop.xlane.xlu0 %334 }
 0x26c   :  { %vm462_vm7 = vcmp.eq.f32.partialorder %v2448_v40, %v2565_v25  ;;  %vm336_vm8 = vcmp.eq.f32.partialorder %v2450_v13, %v2567_v31 }
 0x26d   :  { %v463_v32 = vsel %vm462_vm7, %v458_v26, inf  ;;  %v337_v33 = vsel %vm336_vm8, %v332_v22, inf  ;;  %v402_v26 = vcvt.s32.f32 %v400_v61  ;;  %v472_v22 = vcvt.s32.f32 %v470_v28 }
 0x26e   :  { %464 = vmin.xlane.f32.xlu1 %v463_v32  ;;  %338 = vmin.xlane.f32.xlu0 %v337_v33  ;;  %v514_v32 = vcvt.s32.f32 %v512_v55  ;;  %v388_v33 = vcvt.s32.f32 %v386_v58  ;;  %v425_v61 = vcvt.f32.s32 %v2557_v17  ;;  %v341_v17 = vcvt.f32.s32 %v2567_v31 }
 0x26f   :  { %v2575_v42 = vpop.xlane.xlu1 %376  ;;  %v2577_v12 = vpop.xlane.xlu0 %446 }
 0x270   :  { %vm378_vm9 = vcmp.eq.f32.partialorder %v2470_v36, %v2575_v42  ;;  %vm448_vm10 = vcmp.eq.f32.partialorder %v2472_v0, %v2577_v12  ;;  %v426_v55 = vshll.u32 %v425_v61, 16  ;;  %v342_v31 = vshll.u32 %v341_v17, 16 }
 0x271   :  { %v379_v40 = vsel %vm378_vm9, %v374_v56, inf  ;;  %v449_v13 = vsel %vm448_vm10, %v444_v14, inf  ;;  %v500_v56 = vcvt.s32.f32 %v498_v43 }
 0x272   :  { %380 = vmin.xlane.f32.xlu1 %v379_v40  ;;  %450 = vmin.xlane.f32.xlu0 %v449_v13 }
 0x273   :  { %v2585_v19 = vpop.xlane.xlu1 %488  ;;  %v2587_v30 = vpop.xlane.xlu0 %362 }
 0x274   :  { %vm490_vm11 = vcmp.eq.f32.partialorder %v2492_v20, %v2585_v19  ;;  %vm364_vm12 = vcmp.eq.f32.partialorder %v2494_v53, %v2587_v30 }
 0x275   :  { %v491_v0 = vsel %vm490_vm11, %v486_v21, inf  ;;  %v365_v36 = vsel %vm364_vm12, %v360_v27, inf  ;;  %v440_v21 = vshll.u32 %v439_v18, 16  ;;  %v355_v27 = vcvt.f32.s32 %v2555_v1 }
 0x276   :  { %492 = vmin.xlane.f32.xlu1 %v491_v0  ;;  %366 = vmin.xlane.f32.xlu0 %v365_v36  ;;  %v467_v1 = vcvt.f32.s32 %v2565_v25 }
 0x277   :  { %v2595_v24 = vpop.xlane.xlu1 %404  ;;  %v2597_v23 = vpop.xlane.xlu0 %474 }
 0x278   :  { %vm406_vm13 = vcmp.eq.f32.partialorder %v2514_v59, %v2595_v24  ;;  %vm476_vm14 = vcmp.eq.f32.partialorder %v2516_v44, %v2597_v23  ;;  %v468_v25 = vshll.u32 %v467_v1, 16 }
 0x279   :  { %v407_v53 = vsel %vm406_vm13, %v402_v26, inf  ;;  %v477_v20 = vsel %vm476_vm14, %v472_v22, inf }
 0x27a   :  { %408 = vmin.xlane.f32.xlu1 %v407_v53  ;;  %478 = vmin.xlane.f32.xlu0 %v477_v20 }
 0x27b   :  { %v2605_v29 = vpop.xlane.xlu1 %516  ;;  %v2607_v35 = vpop.xlane.xlu0 %390 }
 0x27c   :  { %vm518_vm15 = vcmp.eq.f32.partialorder %v2528_v48, %v2605_v29  ;;  %vm392_vm1 = vcmp.eq.f32.partialorder %v2530_v49, %v2607_v35  ;;  %v313_v49 = vcvt.f32.s32 %v2547_v50  ;;  %v356_v50 = vshll.u32 %v355_v27, 16 }
 0x27d   :  { %v519_v45 = vsel %vm518_vm15, %v514_v32, inf  ;;  %v393_v44 = vsel %vm392_vm1, %v388_v33, inf }
 0x27e   :  { %520 = vmin.xlane.f32.xlu1 %v519_v45  ;;  %394 = vmin.xlane.f32.xlu0 %v393_v44  ;;  %v383_v44 = vcvt.f32.s32 %v2575_v42 }
 0x27f   :  { %v2614_v59 = vpop.xlane.xlu0 %502 }
 0x280   :  { %vm504_vm2 = vcmp.eq.f32.partialorder %v2535_v60, %v2614_v59  ;;  %v314_v60 = vshll.u32 %v313_v49, 16  ;;  %v384_v42 = vshll.u32 %v383_v44, 16  ;;  %v509_v44 = vcvt.f32.s32 %v2614_v59 }
 0x281   :  { %v505_v14 = vsel %vm504_vm2, %v500_v56, inf  ;;  %v453_v56 = vcvt.f32.s32 %v2577_v12 }
 0x282   :  { %506 = vmin.xlane.f32.xlu0 %v505_v14 }
 0x283   :  { %v454_v12 = vshll.u32 %v453_v56, 16 }
 0x2ef   :  { %v325_v48 = vpop.xlane.xlu1 %324 }
 0x2f0   :  { %v326_v40 = vcvt.f32.s32 %v325_v48 }
 0x2f2   :  { %v329_v13 = vadd.s32 %v328_v37, %v326_v40  ;;  %v495_v40 = vcvt.f32.s32 %v2585_v19 }
 0x2f3   :  { %v437_v28 = vpop.xlane.xlu1 %436  ;;  %v311_v0 = vpop.xlane.xlu0 %310 }
 0x2f4   :  { %v438_v36 = vcvt.f32.s32 %v437_v28  ;;  %v312_v26 = vcvt.f32.s32 %v311_v0  ;;  %vm527_vm3 = vcmp.eq.s32.totalorder %v2231_v41, %v329_v13  ;;  %v369_v13 = vcvt.f32.s32 %v2587_v30 }
 0x2f5   :  { %v2625_v38 = vsel %vm527_vm3, -inf, %v2250_v47  ;;  %v496_v19 = vshll.u32 %v495_v40, 16 }
 0x2f6   :  { %v441_v39 = vadd.s32 %v440_v21, %v438_v36  ;;  %v315_v22 = vadd.s32 %v314_v60, %v312_v26  ;;  %592 = vmax.xlane.f32.xlu1 %v2625_v38  ;;  %v370_v30 = vshll.u32 %v369_v13, 16  ;;  %v411_v36 = vcvt.f32.s32 %v2595_v24 }
 0x2f7   :  { %v353_v58 = vpop.xlane.xlu1 %352  ;;  %v423_v53 = vpop.xlane.xlu0 %422  ;;  %v481_v26 = vcvt.f32.s32 %v2597_v23 }
 0x2f8   :  { %v354_v20 = vcvt.f32.s32 %v353_v58  ;;  %v424_v32 = vcvt.f32.s32 %v423_v53  ;;  %vm535_vm4 = vcmp.eq.s32.totalorder %v2231_v41, %v441_v39  ;;  %vm526_vm5 = vcmp.eq.s32.totalorder %v2231_v41, %v315_v22 }
 0x2f9   :  { %v2633_v47 = vsel %vm535_vm4, -inf, %v2245_v46  ;;  %v2636_v33 = vsel %vm526_vm5, -inf, %v2263_v51  ;;  %v412_v24 = vshll.u32 %v411_v36, 16  ;;  %v482_v23 = vshll.u32 %v481_v26, 16 }
 0x2fa   :  { %v357_v43 = vadd.s32 %v356_v50, %v354_v20  ;;  %v427_v45 = vadd.s32 %v426_v55, %v424_v32  ;;  %608 = vmax.xlane.f32.xlu1 %v2633_v47  ;;  %590 = vmax.xlane.f32.xlu0 %v2636_v33  ;;  %v523_v58 = vcvt.f32.s32 %v2605_v29  ;;  %v397_v53 = vcvt.f32.s32 %v2607_v35 }
 0x2fb   :  { %v465_v14 = vpop.xlane.xlu1 %464  ;;  %v339_v34 = vpop.xlane.xlu0 %338 }
 0x2fc   :  { %v466_v18 = vcvt.f32.s32 %v465_v14  ;;  %v340_v46 = vcvt.f32.s32 %v339_v34  ;;  %vm529_vm6 = vcmp.eq.s32.totalorder %v2231_v41, %v357_v43  ;;  %vm534_vm7 = vcmp.eq.s32.totalorder %v2231_v41, %v427_v45 }
 0x2fd   :  { %v2645_v51 = vsel %vm529_vm6, -inf, %v2268_v52  ;;  %v2648_v48 = vsel %vm534_vm7, -inf, %v2286_v57  ;;  %v524_v29 = vshll.u32 %v523_v58, 16  ;;  %v398_v35 = vshll.u32 %v397_v53, 16 }
 0x2fe   :  { %v469_v37 = vadd.s32 %v468_v25, %v466_v18  ;;  %v343_v49 = vadd.s32 %v342_v31, %v340_v46  ;;  %596 = vmax.xlane.f32.xlu1 %v2645_v51  ;;  %606 = vmax.xlane.f32.xlu0 %v2648_v48 }
 0x2ff   :  { %v381_v21 = vpop.xlane.xlu1 %380  ;;  %v451_v27 = vpop.xlane.xlu0 %450 }
 0x300   :  { %v382_v61 = vcvt.f32.s32 %v381_v21  ;;  %v452_v52 = vcvt.f32.s32 %v451_v27  ;;  %vm537_vm8 = vcmp.eq.s32.totalorder %v2231_v41, %v469_v37  ;;  %vm528_vm9 = vcmp.eq.s32.totalorder %v2231_v41, %v343_v49 }
 0x301   :  { %v2657_v57 = vsel %vm537_vm8, -inf, %v2277_v54  ;;  %v2660_v28 = vsel %vm528_vm9, -inf, %v2306_v63  ;;  %v510_v49 = vshll.u32 %v509_v44, 16 }
 0x302   :  { %v385_v0 = vadd.s32 %v384_v42, %v382_v61  ;;  %v455_v60 = vadd.s32 %v454_v12, %v452_v52  ;;  %612 = vmax.xlane.f32.xlu1 %v2657_v57  ;;  %594 = vmax.xlane.f32.xlu0 %v2660_v28 }
 0x303   :  { %v493_v39 = vpop.xlane.xlu1 %492  ;;  %v367_v22 = vpop.xlane.xlu0 %366 }
 0x304   :  { %v494_v50 = vcvt.f32.s32 %v493_v39  ;;  %v368_v54 = vcvt.f32.s32 %v367_v22  ;;  %vm531_vm10 = vcmp.eq.s32.totalorder %v2231_v41, %v385_v0  ;;  %vm536_vm11 = vcmp.eq.s32.totalorder %v2231_v41, %v455_v60 }
 0x305   :  { %v2669_v63 = vsel %vm531_vm10, -inf, %v2317_v2  ;;  %v2672_v55 = vsel %vm536_vm11, -inf, %v2301_v62 }
 0x306   :  { %v497_v1 = vadd.s32 %v496_v19, %v494_v50  ;;  %v371_v17 = vadd.s32 %v370_v30, %v368_v54  ;;  %600 = vmax.xlane.f32.xlu1 %v2669_v63  ;;  %610 = vmax.xlane.f32.xlu0 %v2672_v55 }
 0x307   :  { %v409_v20 = vpop.xlane.xlu1 %408  ;;  %v479_v32 = vpop.xlane.xlu0 %478 }
 0x308   :  { %v410_v43 = vcvt.f32.s32 %v409_v20  ;;  %v480_v2 = vcvt.f32.s32 %v479_v32  ;;  %vm539_vm12 = vcmp.eq.s32.totalorder %v2231_v41, %v497_v1  ;;  %vm530_vm13 = vcmp.eq.s32.totalorder %v2231_v41, %v371_v17 }
 0x309   :  { %v2681_v62 = vsel %vm539_vm12, -inf, %v2329_v4  ;;  %v2684_v45 = vsel %vm530_vm13, -inf, %v2322_v3 }
 0x30a   :  { %v413_v25 = vadd.s32 %v412_v24, %v410_v43  ;;  %v483_v31 = vadd.s32 %v482_v23, %v480_v2  ;;  %616 = vmax.xlane.f32.xlu1 %v2681_v62  ;;  %598 = vmax.xlane.f32.xlu0 %v2684_v45 }
 0x30b   :  { %v521_v56 = vpop.xlane.xlu1 %520  ;;  %v395_v14 = vpop.xlane.xlu0 %394 }
 0x30c   :  { %v522_v34 = vcvt.f32.s32 %v521_v56  ;;  %v396_v18 = vcvt.f32.s32 %v395_v14  ;;  %vm533_vm14 = vcmp.eq.s32.totalorder %v2231_v41, %v413_v25  ;;  %vm538_vm15 = vcmp.eq.s32.totalorder %v2231_v41, %v483_v31 }
 0x30d   :  { %v2692_v3 = vsel %vm533_vm14, -inf, %v2346_v7  ;;  %v2695_v4 = vsel %vm538_vm15, -inf, %v2334_v5 }
 0x30e   :  { %v525_v46 = vadd.s32 %v524_v29, %v522_v34  ;;  %v399_v37 = vadd.s32 %v398_v35, %v396_v18  ;;  %604 = vmax.xlane.f32.xlu1 %v2692_v3  ;;  %614 = vmax.xlane.f32.xlu0 %v2695_v4 }
 0x30f   :  { %v507_v59 = vpop.xlane.xlu0 %506 }
 0x310   :  { %v508_v42 = vcvt.f32.s32 %v507_v59  ;;  %vm541_vm1 = vcmp.eq.s32.totalorder %v2231_v41, %v525_v46  ;;  %vm532_vm2 = vcmp.eq.s32.totalorder %v2231_v41, %v399_v37 }
 0x311   :  { %v2702_v12 = vsel %vm541_vm1, -inf, %v2358_v9  ;;  %v2705_v7 = vsel %vm532_vm2, -inf, %v2341_v6 }
 0x312   :  { %v511_v5 = vadd.s32 %v510_v49, %v508_v42  ;;  %620 = vmax.xlane.f32.xlu1 %v2702_v12  ;;  %602 = vmax.xlane.f32.xlu0 %v2705_v7 }
 0x314   :  { %vm540_vm3 = vcmp.eq.s32.totalorder %v2231_v41, %v511_v5 }
 0x315   :  { %v2711_v40 = vsel %vm540_vm3, -inf, %v2353_v8 }
 0x316   :  { %618 = vmax.xlane.f32.xlu0 %v2711_v40 }
 0x383   :  { %v2714_v13 = vpop.xlane.xlu1 %592 }
 0x384   :  { %vm623_vm4 = vcmp.eq.f32.partialorder %v2625_v38, %v2714_v13 }
 0x385   :  { %v2719_v6 = vsel %vm623_vm4, %v2231_v41, 128 }
 0x386   :  { %v669_v9 = vshra.s32 %v2719_v6, 16 }
 0x387   :  { %v2722_v21 = vpop.xlane.xlu1 %608  ;;  %v2724_v27 = vpop.xlane.xlu0 %590 }
 0x388   :  { %4201 = vst [vmem:[#allocation41_spill] sm:$0xff] %v2724_v27  ;;  %vm631_vm5 = vcmp.eq.f32.partialorder %v2633_v47, %v2722_v21  ;;  %vm622_vm6 = vcmp.eq.f32.partialorder %v2636_v33, %v2724_v27  ;;  %v2730_v8 = vcvt.s32.f32 %v669_v9 }
 0x389   :  { %v2733_v61 = vsel %vm631_vm5, %v2231_v41, 128  ;;  %v2736_v52 = vsel %vm622_vm6, %v2231_v41, 128 }
 0x38a   :  { %v781_v0 = vshra.s32 %v2733_v61, 16  ;;  %v655_v60 = vshra.s32 %v2736_v52, 16  ;;  %672 = vmin.xlane.f32.xlu1 %v2730_v8 }
 0x38b   :  { %v2741_v19 = vpop.xlane.xlu1 %596  ;;  %v2743_v30 = vpop.xlane.xlu0 %606 }
 0x38c   :  { %4202 = vst [vmem:[#allocation42_spill] sm:$0xff] %v2741_v19  ;;  %4203 = vst [vmem:[#allocation43_spill] sm:$0xff] %v2743_v30  ;;  %vm625_vm7 = vcmp.eq.f32.partialorder %v2645_v51, %v2741_v19  ;;  %vm630_vm8 = vcmp.eq.f32.partialorder %v2648_v48, %v2743_v30  ;;  %v2749_v36 = vcvt.s32.f32 %v781_v0  ;;  %v2751_v26 = vcvt.s32.f32 %v655_v60 }
 0x38d   :  { %v2754_v39 = vsel %vm625_vm7, %v2231_v41, 128  ;;  %v2757_v22 = vsel %vm630_vm8, %v2231_v41, 128 }
 0x38e   :  { %v697_v50 = vshra.s32 %v2754_v39, 16  ;;  %v767_v54 = vshra.s32 %v2757_v22, 16  ;;  %784 = vmin.xlane.f32.xlu1 %v2749_v36  ;;  %658 = vmin.xlane.f32.xlu0 %v2751_v26  ;;  %v766_v27 = vand.u32 65535, %v2757_v22 }
 0x38f   :  { %v2763_v1 = vpop.xlane.xlu1 %612  ;;  %v2765_v17 = vpop.xlane.xlu0 %594 }
 0x390   :  { %4204 = vst [vmem:[#allocation44_spill] sm:$0xff] %v2763_v1  ;;  %4205 = vst [vmem:[#allocation45_spill] sm:$0xff] %v2765_v17  ;;  %vm633_vm9 = vcmp.eq.f32.partialorder %v2657_v57, %v2763_v1  ;;  %vm624_vm10 = vcmp.eq.f32.partialorder %v2660_v28, %v2765_v17  ;;  %v2771_v24 = vcvt.s32.f32 %v697_v50  ;;  %v2773_v23 = vcvt.s32.f32 %v767_v54 }
 0x391   :  { %v2776_v58 = vsel %vm633_vm9, %v2231_v41, 128  ;;  %v2779_v53 = vsel %vm624_vm10, %v2231_v41, 128  ;;  %v668_v17 = vand.u32 65535, %v2719_v6  ;;  %v654_v1 = vand.u32 65535, %v2736_v52 }
 0x392   :  { %v809_v20 = vshra.s32 %v2776_v58, 16  ;;  %v683_v32 = vshra.s32 %v2779_v53, 16  ;;  %700 = vmin.xlane.f32.xlu1 %v2771_v24  ;;  %770 = vmin.xlane.f32.xlu0 %v2773_v23  ;;  %v696_v6 = vand.u32 65535, %v2754_v39  ;;  %v808_v39 = vand.u32 65535, %v2776_v58 }
 0x393   :  { %v2785_v43 = vpop.xlane.xlu1 %600  ;;  %v2787_v2 = vpop.xlane.xlu0 %610  ;;  %v656_v15 = vcvt.s32.f32 %v654_v1  ;;  %v768_v1 = vcvt.s32.f32 %v766_v27  ;;  %v682_v22 = vand.u32 65535, %v2779_v53 }
 0x394   :  { %4206 = vst [vmem:[#allocation46_spill] sm:$0xff] %v2785_v43  ;;  %4207 = vst [vmem:[#allocation47_spill] sm:$0xff] %v2787_v2  ;;  %vm627_vm11 = vcmp.eq.f32.partialorder %v2669_v63, %v2785_v43  ;;  %vm632_vm12 = vcmp.eq.f32.partialorder %v2672_v55, %v2787_v2  ;;  %v2793_v25 = vcvt.s32.f32 %v809_v20  ;;  %v2795_v31 = vcvt.s32.f32 %v683_v32 }
 0x395   :  { %v2798_v29 = vsel %vm627_vm11, %v2231_v41, 128  ;;  %v2801_v35 = vsel %vm632_vm12, %v2231_v41, 128  ;;  %v684_v27 = vcvt.s32.f32 %v682_v22 }
 0x396   :  { %v725_v44 = vshra.s32 %v2798_v29, 16  ;;  %v795_v56 = vshra.s32 %v2801_v35, 16  ;;  %812 = vmin.xlane.f32.xlu1 %v2793_v25  ;;  %686 = vmin.xlane.f32.xlu0 %v2795_v31  ;;  %v724_v58 = vand.u32 65535, %v2798_v29  ;;  %v794_v53 = vand.u32 65535, %v2801_v35 }
 0x397   :  { %v2807_v14 = vpop.xlane.xlu1 %616  ;;  %v2809_v34 = vpop.xlane.xlu0 %598 }
 0x398   :  { %4208 = vst [vmem:[#allocation48_spill] sm:$0xff] %v2807_v14  ;;  %4209 = vst [vmem:[#allocation49_spill] sm:$0xff] %v2809_v34  ;;  %vm635_vm13 = vcmp.eq.f32.partialorder %v2681_v62, %v2807_v14  ;;  %vm626_vm14 = vcmp.eq.f32.partialorder %v2684_v45, %v2809_v34  ;;  %v2815_v18 = vcvt.s32.f32 %v725_v44  ;;  %v2817_v46 = vcvt.s32.f32 %v795_v56 }
 0x399   :  { %v2820_v37 = vsel %vm635_vm13, %v2231_v41, 128  ;;  %v2823_v59 = vsel %vm626_vm14, %v2231_v41, 128 }
 0x39a   :  { %v837_v49 = vshra.s32 %v2820_v37, 16  ;;  %v711_v42 = vshra.s32 %v2823_v59, 16  ;;  %728 = vmin.xlane.f32.xlu1 %v2815_v18  ;;  %798 = vmin.xlane.f32.xlu0 %v2817_v46  ;;  %v836_v29 = vand.u32 65535, %v2820_v37  ;;  %v710_v35 = vand.u32 65535, %v2823_v59 }
 0x39b   :  { %v2829_v5 = vpop.xlane.xlu1 %604  ;;  %v2831_v9 = vpop.xlane.xlu0 %614 }
 0x39c   :  { %4210 = vst [vmem:[#allocation50_spill] sm:$0xff] %v2829_v5  ;;  %4211 = vst [vmem:[#allocation51_spill] sm:$0xff] %v2831_v9  ;;  %vm629_vm15 = vcmp.eq.f32.partialorder %v2692_v3, %v2829_v5  ;;  %vm634_vm1 = vcmp.eq.f32.partialorder %v2695_v4, %v2831_v9  ;;  %v2837_v0 = vcvt.s32.f32 %v837_v49  ;;  %v2839_v60 = vcvt.s32.f32 %v711_v42 }
 0x39d   :  { %v2842_v50 = vsel %vm629_vm15, %v2231_v41, 128  ;;  %v2845_v54 = vsel %vm634_vm1, %v2231_v41, 128  ;;  %v712_v22 = vcvt.s32.f32 %v710_v35 }
 0x39e   :  { %v753_v20 = vshra.s32 %v2842_v50, 16  ;;  %v823_v32 = vshra.s32 %v2845_v54, 16  ;;  %840 = vmin.xlane.f32.xlu1 %v2837_v0  ;;  %714 = vmin.xlane.f32.xlu0 %v2839_v60  ;;  %v752_v37 = vand.u32 65535, %v2842_v50  ;;  %v822_v59 = vand.u32 65535, %v2845_v54 }
 0x39f   :  { %v2851_v44 = vpop.xlane.xlu1 %620  ;;  %v2853_v56 = vpop.xlane.xlu0 %602 }
 0x3a0   :  { %4212 = vst [vmem:[#allocation52_spill] sm:$0xff] %v2851_v44  ;;  %4213 = vst [vmem:[#allocation53_spill] sm:$0xff] %v2853_v56  ;;  %vm637_vm2 = vcmp.eq.f32.partialorder %v2702_v12, %v2851_v44  ;;  %vm628_vm3 = vcmp.eq.f32.partialorder %v2705_v7, %v2853_v56  ;;  %v2859_v49 = vcvt.s32.f32 %v753_v20  ;;  %v2861_v42 = vcvt.s32.f32 %v823_v32 }
 0x3a1   :  { %v2864_v9 = vsel %vm637_vm2, %v2231_v41, 128  ;;  %v2867_v5 = vsel %vm628_vm3, %v2231_v41, 128 }
 0x3a2   :  { %v865_v34 = vshra.s32 %v2864_v9, 16  ;;  %v739_v14 = vshra.s32 %v2867_v5, 16  ;;  %756 = vmin.xlane.f32.xlu1 %v2859_v49  ;;  %826 = vmin.xlane.f32.xlu0 %v2861_v42  ;;  %v864_v50 = vand.u32 65535, %v2864_v9  ;;  %v738_v54 = vand.u32 65535, %v2867_v5 }
 0x3a3   :  { %v2873_v44 = vpop.xlane.xlu0 %618 }
 0x3a4   :  { %4214 = vst [vmem:[#allocation54_spill] sm:$0xff] %v2873_v44  ;;  %vm636_vm4 = vcmp.eq.f32.partialorder %v2711_v40, %v2873_v44  ;;  %v2877_v20 = vcvt.s32.f32 %v865_v34  ;;  %v2879_v32 = vcvt.s32.f32 %v739_v14  ;;  %v670_v34 = vcvt.s32.f32 %v668_v17 }
 0x3a5   :  { %v2882_v56 = vsel %vm636_vm4, %v2231_v41, 128  ;;  %v780_v14 = vand.u32 65535, %v2733_v61  ;;  %v698_v17 = vcvt.s32.f32 %v696_v6 }
 0x3a6   :  { %v851_v2 = vshra.s32 %v2882_v56, 16  ;;  %868 = vmin.xlane.f32.xlu1 %v2877_v20  ;;  %742 = vmin.xlane.f32.xlu0 %v2879_v32  ;;  %v850_v9 = vand.u32 65535, %v2882_v56 }
 0x3a7   :  { %v782_v19 = vcvt.s32.f32 %v780_v14 }
 0x3a8   :  { %v2887_v43 = vcvt.s32.f32 %v851_v2 }
 0x3aa   :  { %854 = vmin.xlane.f32.xlu0 %v2887_v43 }
 0x417   :  { %v2891_v44 = vpop.xlane.xlu1 %672 }
 0x418   :  { %vm674_vm5 = vcmp.eq.f32.partialorder %v2730_v8, %v2891_v44  ;;  %v679_v56 = vcvt.f32.s32 %v2891_v44 }
 0x419   :  { %v675_v30 = vsel %vm674_vm5, %v670_v34, inf  ;;  %v810_v34 = vcvt.s32.f32 %v808_v39  ;;  %v838_v39 = vcvt.s32.f32 %v836_v29 }
 0x41a   :  { %676 = vmin.xlane.f32.xlu1 %v675_v30  ;;  %v680_v35 = vshll.u32 %v679_v56, 16 }
 0x41b   :  { %v2897_v16 = vpop.xlane.xlu1 %784  ;;  %v2899_v2 = vpop.xlane.xlu0 %658 }
 0x41c   :  { %vm786_vm6 = vcmp.eq.f32.partialorder %v2749_v36, %v2897_v16  ;;  %vm660_vm7 = vcmp.eq.f32.partialorder %v2751_v26, %v2899_v2  ;;  %v791_v29 = vcvt.f32.s32 %v2897_v16 }
 0x41d   :  { %v787_v61 = vsel %vm786_vm6, %v782_v19, inf  ;;  %v661_v8 = vsel %vm660_vm7, %v656_v15, inf }
 0x41e   :  { %788 = vmin.xlane.f32.xlu1 %v787_v61  ;;  %662 = vmin.xlane.f32.xlu0 %v661_v8  ;;  %v726_v61 = vcvt.s32.f32 %v724_v58  ;;  %v796_v8 = vcvt.s32.f32 %v794_v53 }
 0x41f   :  { %v2907_v52 = vpop.xlane.xlu1 %700  ;;  %v2909_v30 = vpop.xlane.xlu0 %770 }
 0x420   :  { %vm702_vm8 = vcmp.eq.f32.partialorder %v2771_v24, %v2907_v52  ;;  %vm772_vm9 = vcmp.eq.f32.partialorder %v2773_v23, %v2909_v30 }
 0x421   :  { %v703_v19 = vsel %vm702_vm8, %v698_v17, inf  ;;  %v773_v15 = vsel %vm772_vm9, %v768_v1, inf }
 0x422   :  { %704 = vmin.xlane.f32.xlu1 %v703_v19  ;;  %774 = vmin.xlane.f32.xlu0 %v773_v15 }
 0x423   :  { %v2917_v36 = vpop.xlane.xlu1 %812  ;;  %v2919_v26 = vpop.xlane.xlu0 %686 }
 0x424   :  { %vm814_vm10 = vcmp.eq.f32.partialorder %v2793_v25, %v2917_v36  ;;  %vm688_vm11 = vcmp.eq.f32.partialorder %v2795_v31, %v2919_v26 }
 0x425   :  { %v815_v24 = vsel %vm814_vm10, %v810_v34, inf  ;;  %v689_v23 = vsel %vm688_vm11, %v684_v27, inf  ;;  %v754_v34 = vcvt.s32.f32 %v752_v37  ;;  %v824_v27 = vcvt.s32.f32 %v822_v59 }
 0x426   :  { %816 = vmin.xlane.f32.xlu1 %v815_v24  ;;  %690 = vmin.xlane.f32.xlu0 %v689_v23  ;;  %v866_v24 = vcvt.s32.f32 %v864_v50  ;;  %v740_v23 = vcvt.s32.f32 %v738_v54  ;;  %v777_v37 = vcvt.f32.s32 %v2909_v30  ;;  %v693_v30 = vcvt.f32.s32 %v2919_v26 }
 0x427   :  { %v2927_v14 = vpop.xlane.xlu1 %728  ;;  %v2929_v6 = vpop.xlane.xlu0 %798 }
 0x428   :  { %vm730_vm12 = vcmp.eq.f32.partialorder %v2815_v18, %v2927_v14  ;;  %vm800_vm13 = vcmp.eq.f32.partialorder %v2817_v46, %v2929_v6  ;;  %v778_v50 = vshll.u32 %v777_v37, 16  ;;  %v694_v26 = vshll.u32 %v693_v30, 16 }
 0x429   :  { %v731_v25 = vsel %vm730_vm12, %v726_v61, inf  ;;  %v801_v31 = vsel %vm800_vm13, %v796_v8, inf  ;;  %v852_v61 = vcvt.s32.f32 %v850_v9 }
 0x42a   :  { %732 = vmin.xlane.f32.xlu1 %v731_v25  ;;  %802 = vmin.xlane.f32.xlu0 %v801_v31 }
 0x42b   :  { %v2937_v17 = vpop.xlane.xlu1 %840  ;;  %v2939_v1 = vpop.xlane.xlu0 %714 }
 0x42c   :  { %vm842_vm14 = vcmp.eq.f32.partialorder %v2837_v0, %v2937_v17  ;;  %vm716_vm15 = vcmp.eq.f32.partialorder %v2839_v60, %v2939_v1 }
 0x42d   :  { %v843_v18 = vsel %vm842_vm14, %v838_v39, inf  ;;  %v717_v46 = vsel %vm716_vm15, %v712_v22, inf  ;;  %v792_v39 = vshll.u32 %v791_v29, 16  ;;  %v707_v22 = vcvt.f32.s32 %v2907_v52 }
 0x42e   :  { %844 = vmin.xlane.f32.xlu1 %v843_v18  ;;  %718 = vmin.xlane.f32.xlu0 %v717_v46  ;;  %v819_v52 = vcvt.f32.s32 %v2917_v36 }
 0x42f   :  { %v2947_v19 = vpop.xlane.xlu1 %756  ;;  %v2949_v15 = vpop.xlane.xlu0 %826 }
 0x430   :  { %vm758_vm1 = vcmp.eq.f32.partialorder %v2859_v49, %v2947_v19  ;;  %vm828_vm2 = vcmp.eq.f32.partialorder %v2861_v42, %v2949_v15  ;;  %v820_v36 = vshll.u32 %v819_v52, 16 }
 0x431   :  { %v759_v0 = vsel %vm758_vm1, %v754_v34, inf  ;;  %v829_v60 = vsel %vm828_vm2, %v824_v27, inf }
 0x432   :  { %760 = vmin.xlane.f32.xlu1 %v759_v0  ;;  %830 = vmin.xlane.f32.xlu0 %v829_v60 }
 0x433   :  { %v2957_v58 = vpop.xlane.xlu1 %868  ;;  %v2959_v53 = vpop.xlane.xlu0 %742 }
 0x434   :  { %vm870_vm3 = vcmp.eq.f32.partialorder %v2877_v20, %v2957_v58  ;;  %vm744_vm4 = vcmp.eq.f32.partialorder %v2879_v32, %v2959_v53  ;;  %v665_v32 = vcvt.f32.s32 %v2899_v2  ;;  %v708_v2 = vshll.u32 %v707_v22, 16 }
 0x435   :  { %v871_v5 = vsel %vm870_vm3, %v866_v24, inf  ;;  %v745_v49 = vsel %vm744_vm4, %v740_v23, inf }
 0x436   :  { %872 = vmin.xlane.f32.xlu1 %v871_v5  ;;  %746 = vmin.xlane.f32.xlu0 %v745_v49  ;;  %v735_v49 = vcvt.f32.s32 %v2927_v14 }
 0x437   :  { %v2966_v42 = vpop.xlane.xlu0 %854 }
 0x438   :  { %vm856_vm5 = vcmp.eq.f32.partialorder %v2887_v43, %v2966_v42  ;;  %v666_v43 = vshll.u32 %v665_v32, 16  ;;  %v736_v14 = vshll.u32 %v735_v49, 16  ;;  %v861_v49 = vcvt.f32.s32 %v2966_v42 }
 0x439   :  { %v857_v8 = vsel %vm856_vm5, %v852_v61, inf  ;;  %v805_v61 = vcvt.f32.s32 %v2929_v6 }
 0x43a   :  { %858 = vmin.xlane.f32.xlu0 %v857_v8 }
 0x43b   :  { %v806_v6 = vshll.u32 %v805_v61, 16 }
 0x4a7   :  { %v677_v20 = vpop.xlane.xlu1 %676 }
 0x4a8   :  { %v678_v25 = vcvt.f32.s32 %v677_v20 }
 0x4aa   :  { %v681_v31 = vadd.s32 %v680_v35, %v678_v25  ;;  %v847_v25 = vcvt.f32.s32 %v2937_v17 }
 0x4ab   :  { %v789_v59 = vpop.xlane.xlu1 %788  ;;  %v663_v18 = vpop.xlane.xlu0 %662 }
 0x4ac   :  { %v790_v46 = vcvt.f32.s32 %v789_v59  ;;  %v664_v34 = vcvt.f32.s32 %v663_v18  ;;  %vm879_vm6 = vcmp.eq.s32.totalorder %v2231_v41, %v681_v31  ;;  %v721_v31 = vcvt.f32.s32 %v2939_v1 }
 0x4ad   :  { %v2977_v16 = vsel %vm879_vm6, -inf, %v2625_v38  ;;  %v848_v17 = vshll.u32 %v847_v25, 16 }
 0x4ae   :  { %v793_v44 = vadd.s32 %v792_v39, %v790_v46  ;;  %v667_v27 = vadd.s32 %v666_v43, %v664_v34  ;;  %944 = vmax.xlane.f32.xlu1 %v2977_v16  ;;  %v722_v1 = vshll.u32 %v721_v31, 16  ;;  %v763_v46 = vcvt.f32.s32 %v2947_v19 }
 0x4af   :  { %v705_v54 = vpop.xlane.xlu1 %704  ;;  %v775_v0 = vpop.xlane.xlu0 %774  ;;  %v833_v34 = vcvt.f32.s32 %v2949_v15 }
 0x4b0   :  { %v706_v60 = vcvt.f32.s32 %v705_v54  ;;  %v776_v24 = vcvt.f32.s32 %v775_v0  ;;  %vm887_vm7 = vcmp.eq.s32.totalorder %v2231_v41, %v793_v44  ;;  %vm878_vm8 = vcmp.eq.s32.totalorder %v2231_v41, %v667_v27 }
 0x4b1   :  { %v2985_v38 = vsel %vm887_vm7, -inf, %v2633_v47  ;;  %v2988_v23 = vsel %vm878_vm8, -inf, %v2636_v33  ;;  %v764_v19 = vshll.u32 %v763_v46, 16  ;;  %v834_v15 = vshll.u32 %v833_v34, 16 }
 0x4b2   :  { %v709_v9 = vadd.s32 %v708_v2, %v706_v60  ;;  %v779_v5 = vadd.s32 %v778_v50, %v776_v24  ;;  %960 = vmax.xlane.f32.xlu1 %v2985_v38  ;;  %942 = vmax.xlane.f32.xlu0 %v2988_v23  ;;  %v875_v54 = vcvt.f32.s32 %v2957_v58  ;;  %v749_v0 = vcvt.f32.s32 %v2959_v53 }
 0x4b3   :  { %v817_v8 = vpop.xlane.xlu1 %816  ;;  %v691_v56 = vpop.xlane.xlu0 %690 }
 0x4b4   :  { %v818_v29 = vcvt.f32.s32 %v817_v8  ;;  %v692_v47 = vcvt.f32.s32 %v691_v56  ;;  %vm881_vm9 = vcmp.eq.s32.totalorder %v2231_v41, %v709_v9  ;;  %vm886_vm10 = vcmp.eq.s32.totalorder %v2231_v41, %v779_v5 }
 0x4b5   :  { %v2997_v33 = vsel %vm881_vm9, -inf, %v2645_v51  ;;  %v3000_v20 = vsel %vm886_vm10, -inf, %v2648_v48  ;;  %v876_v58 = vshll.u32 %v875_v54, 16  ;;  %v750_v53 = vshll.u32 %v749_v0, 16 }
 0x4b6   :  { %v821_v35 = vadd.s32 %v820_v36, %v818_v29  ;;  %v695_v32 = vadd.s32 %v694_v26, %v692_v47  ;;  %948 = vmax.xlane.f32.xlu1 %v2997_v33  ;;  %958 = vmax.xlane.f32.xlu0 %v3000_v20 }
 0x4b7   :  { %v733_v39 = vpop.xlane.xlu1 %732  ;;  %v803_v22 = vpop.xlane.xlu0 %802 }
 0x4b8   :  { %v734_v37 = vcvt.f32.s32 %v733_v39  ;;  %v804_v51 = vcvt.f32.s32 %v803_v22  ;;  %vm889_vm11 = vcmp.eq.s32.totalorder %v2231_v41, %v821_v35  ;;  %vm880_vm12 = vcmp.eq.s32.totalorder %v2231_v41, %v695_v32 }
 0x4b9   :  { %v3009_v48 = vsel %vm889_vm11, -inf, %v2657_v57  ;;  %v3012_v59 = vsel %vm880_vm12, -inf, %v2660_v28  ;;  %v862_v32 = vshll.u32 %v861_v49, 16 }
 0x4ba   :  { %v737_v18 = vadd.s32 %v736_v14, %v734_v37  ;;  %v807_v43 = vadd.s32 %v806_v6, %v804_v51  ;;  %964 = vmax.xlane.f32.xlu1 %v3009_v48  ;;  %946 = vmax.xlane.f32.xlu0 %v3012_v59 }
 0x4bb   :  { %v845_v44 = vpop.xlane.xlu1 %844  ;;  %v719_v27 = vpop.xlane.xlu0 %718 }
 0x4bc   :  { %v846_v2 = vcvt.f32.s32 %v845_v44  ;;  %v720_v57 = vcvt.f32.s32 %v719_v27  ;;  %vm883_vm13 = vcmp.eq.s32.totalorder %v2231_v41, %v737_v18  ;;  %vm888_vm14 = vcmp.eq.s32.totalorder %v2231_v41, %v807_v43 }
 0x4bd   :  { %v3021_v28 = vsel %vm883_vm13, -inf, %v2669_v63  ;;  %v3024_v50 = vsel %vm888_vm14, -inf, %v2672_v55 }
 0x4be   :  { %v849_v52 = vadd.s32 %v848_v17, %v846_v2  ;;  %v723_v30 = vadd.s32 %v722_v1, %v720_v57  ;;  %952 = vmax.xlane.f32.xlu1 %v3021_v28  ;;  %962 = vmax.xlane.f32.xlu0 %v3024_v50 }
 0x4bf   :  { %v761_v60 = vpop.xlane.xlu1 %760  ;;  %v831_v24 = vpop.xlane.xlu0 %830 }
 0x4c0   :  { %v762_v9 = vcvt.f32.s32 %v761_v60  ;;  %v832_v63 = vcvt.f32.s32 %v831_v24  ;;  %vm891_vm15 = vcmp.eq.s32.totalorder %v2231_v41, %v849_v52  ;;  %vm882_vm1 = vcmp.eq.s32.totalorder %v2231_v41, %v723_v30 }
 0x4c1   :  { %v3033_v55 = vsel %vm891_vm15, -inf, %v2681_v62  ;;  %v3036_v5 = vsel %vm882_vm1, -inf, %v2684_v45 }
 0x4c2   :  { %v765_v36 = vadd.s32 %v764_v19, %v762_v9  ;;  %v835_v26 = vadd.s32 %v834_v15, %v832_v63  ;;  %968 = vmax.xlane.f32.xlu1 %v3033_v55  ;;  %950 = vmax.xlane.f32.xlu0 %v3036_v5 }
 0x4c3   :  { %v873_v61 = vpop.xlane.xlu1 %872  ;;  %v747_v8 = vpop.xlane.xlu0 %746 }
 0x4c4   :  { %v874_v56 = vcvt.f32.s32 %v873_v61  ;;  %v748_v29 = vcvt.f32.s32 %v747_v8  ;;  %vm885_vm2 = vcmp.eq.s32.totalorder %v2231_v41, %v765_v36  ;;  %vm890_vm3 = vcmp.eq.s32.totalorder %v2231_v41, %v835_v26 }
 0x4c5   :  { %v3044_v62 = vsel %vm885_vm2, -inf, %v2692_v3  ;;  %v3047_v45 = vsel %vm890_vm3, -inf, %v2695_v4 }
 0x4c6   :  { %v877_v47 = vadd.s32 %v876_v58, %v874_v56  ;;  %v751_v35 = vadd.s32 %v750_v53, %v748_v29  ;;  %956 = vmax.xlane.f32.xlu1 %v3044_v62  ;;  %966 = vmax.xlane.f32.xlu0 %v3047_v45 }
 0x4c7   :  { %v859_v42 = vpop.xlane.xlu0 %858 }
 0x4c8   :  { %v860_v14 = vcvt.f32.s32 %v859_v42  ;;  %vm893_vm4 = vcmp.eq.s32.totalorder %v2231_v41, %v877_v47  ;;  %vm884_vm5 = vcmp.eq.s32.totalorder %v2231_v41, %v751_v35 }
 0x4c9   :  { %v3054_v6 = vsel %vm893_vm4, -inf, %v2702_v12  ;;  %v3057_v3 = vsel %vm884_vm5, -inf, %v2705_v7 }
 0x4ca   :  { %v863_v4 = vadd.s32 %v862_v32, %v860_v14  ;;  %972 = vmax.xlane.f32.xlu1 %v3054_v6  ;;  %954 = vmax.xlane.f32.xlu0 %v3057_v3 }
 0x4cc   :  { %vm892_vm6 = vcmp.eq.s32.totalorder %v2231_v41, %v863_v4 }
 0x4cd   :  { %v3063_v25 = vsel %vm892_vm6, -inf, %v2711_v40 }
 0x4ce   :  { %970 = vmax.xlane.f32.xlu0 %v3063_v25 }
 0x53b   :  { %v3066_v31 = vpop.xlane.xlu1 %944 }
 0x53c   :  { %vm975_vm7 = vcmp.eq.f32.partialorder %v2977_v16, %v3066_v31 }
 0x53d   :  { %v3071_v12 = vsel %vm975_vm7, %v2231_v41, 128 }
 0x53e   :  { %v1021_v7 = vshra.s32 %v3071_v12, 16 }
 0x53f   :  { %v3074_v39 = vpop.xlane.xlu1 %960  ;;  %v3076_v22 = vpop.xlane.xlu0 %942 }
 0x540   :  { %4215 = vst [vmem:[#allocation55_spill] sm:$0xff] %v3074_v39  ;;  %4216 = vst [vmem:[#allocation56_spill] sm:$0xff] %v3076_v22  ;;  %vm983_vm8 = vcmp.eq.f32.partialorder %v2985_v38, %v3074_v39  ;;  %vm974_vm9 = vcmp.eq.f32.partialorder %v2988_v23, %v3076_v22  ;;  %v3088_v51 = vcvt.s32.f32 %v1021_v7 }
 0x541   :  { %v3083_v40 = vsel %vm983_vm8, %v2231_v41, 128  ;;  %v3086_v37 = vsel %vm974_vm9, %v2231_v41, 128 }
 0x542   :  { %v1133_v18 = vshra.s32 %v3083_v40, 16  ;;  %v1007_v43 = vshra.s32 %v3086_v37, 16  ;;  %1024 = vmin.xlane.f32.xlu1 %v3088_v51 }
 0x543   :  { %v3093_v17 = vpop.xlane.xlu1 %948  ;;  %v3095_v1 = vpop.xlane.xlu0 %958 }
 0x544   :  { %4217 = vst [vmem:[#allocation57_spill] sm:$0xff] %v3093_v17  ;;  %4218 = vst [vmem:[#allocation58_spill] sm:$0xff] %v3095_v1  ;;  %vm977_vm10 = vcmp.eq.f32.partialorder %v2997_v33, %v3093_v17  ;;  %vm982_vm11 = vcmp.eq.f32.partialorder %v3000_v20, %v3095_v1  ;;  %v3107_v44 = vcvt.s32.f32 %v1133_v18  ;;  %v3109_v27 = vcvt.s32.f32 %v1007_v43 }
 0x545   :  { %v3102_v46 = vsel %vm977_vm10, %v2231_v41, 128  ;;  %v3105_v34 = vsel %vm982_vm11, %v2231_v41, 128 }
 0x546   :  { %v1049_v2 = vshra.s32 %v3102_v46, 16  ;;  %v1119_v57 = vshra.s32 %v3105_v34, 16  ;;  %1136 = vmin.xlane.f32.xlu1 %v3107_v44  ;;  %1010 = vmin.xlane.f32.xlu0 %v3109_v27  ;;  %v1048_v17 = vand.u32 65535, %v3102_v46 }
 0x547   :  { %v3115_v52 = vpop.xlane.xlu1 %964  ;;  %v3117_v30 = vpop.xlane.xlu0 %946 }
 0x548   :  { %4219 = vst [vmem:[#allocation59_spill] sm:$0xff] %v3115_v52  ;;  %4220 = vst [vmem:[#allocation60_spill] sm:$0xff] %v3117_v30  ;;  %vm985_vm12 = vcmp.eq.f32.partialorder %v3009_v48, %v3115_v52  ;;  %vm976_vm13 = vcmp.eq.f32.partialorder %v3012_v59, %v3117_v30  ;;  %v3129_v54 = vcvt.s32.f32 %v1049_v2  ;;  %v3131_v0 = vcvt.s32.f32 %v1119_v57 }
 0x549   :  { %v3124_v19 = vsel %vm985_vm12, %v2231_v41, 128  ;;  %v3127_v15 = vsel %vm976_vm13, %v2231_v41, 128  ;;  %v1020_v30 = vand.u32 65535, %v3071_v12 }
 0x54a   :  { %v1161_v60 = vshra.s32 %v3124_v19, 16  ;;  %v1035_v24 = vshra.s32 %v3127_v15, 16  ;;  %1052 = vmin.xlane.f32.xlu1 %v3129_v54  ;;  %1122 = vmin.xlane.f32.xlu0 %v3131_v0  ;;  %v1034_v46 = vand.u32 65535, %v3127_v15 }
 0x54b   :  { %v3137_v9 = vpop.xlane.xlu1 %952  ;;  %v3139_v63 = vpop.xlane.xlu0 %962 }
 0x54c   :  { %4221 = vst [vmem:[#allocation61_spill] sm:$0xff] %v3137_v9  ;;  %4222 = vst [vmem:[#allocation62_spill] sm:$0xff] %v3139_v63  ;;  %vm979_vm14 = vcmp.eq.f32.partialorder %v3021_v28, %v3137_v9  ;;  %vm984_vm15 = vcmp.eq.f32.partialorder %v3024_v50, %v3139_v63  ;;  %v3151_v58 = vcvt.s32.f32 %v1161_v60  ;;  %v3153_v53 = vcvt.s32.f32 %v1035_v24 }
 0x54d   :  { %v3146_v36 = vsel %vm979_vm14, %v2231_v41, 128  ;;  %v3149_v26 = vsel %vm984_vm15, %v2231_v41, 128 }
 0x54e   :  { %v1077_v49 = vshra.s32 %v3146_v36, 16  ;;  %v1147_v61 = vshra.s32 %v3149_v26, 16  ;;  %1164 = vmin.xlane.f32.xlu1 %v3151_v58  ;;  %1038 = vmin.xlane.f32.xlu0 %v3153_v53  ;;  %v1146_v15 = vand.u32 65535, %v3149_v26 }
 0x54f   :  { %v3159_v8 = vpop.xlane.xlu1 %968  ;;  %v3161_v56 = vpop.xlane.xlu0 %950 }
 0x550   :  { %4223 = vst [vmem:[#allocation63_spill] sm:$0xff] %v3159_v8  ;;  %4224 = vst [vmem:[#allocation64_spill] sm:$0xff] %v3161_v56  ;;  %vm987_vm1 = vcmp.eq.f32.partialorder %v3033_v55, %v3159_v8  ;;  %vm978_vm2 = vcmp.eq.f32.partialorder %v3036_v5, %v3161_v56  ;;  %v3173_v35 = vcvt.s32.f32 %v1077_v49  ;;  %v3175_v42 = vcvt.s32.f32 %v1147_v61 }
 0x551   :  { %v3168_v29 = vsel %vm987_vm1, %v2231_v41, 128  ;;  %v3171_v47 = vsel %vm978_vm2, %v2231_v41, 128 }
 0x552   :  { %v1189_v32 = vshra.s32 %v3168_v29, 16  ;;  %v1063_v14 = vshra.s32 %v3171_v47, 16  ;;  %1080 = vmin.xlane.f32.xlu1 %v3173_v35  ;;  %1150 = vmin.xlane.f32.xlu0 %v3175_v42  ;;  %v1062_v26 = vand.u32 65535, %v3171_v47 }
 0x553   :  { %v3181_v4 = vpop.xlane.xlu1 %956  ;;  %v3183_v7 = vpop.xlane.xlu0 %966 }
 0x554   :  { %4225 = vst [vmem:[#allocation65_spill] sm:$0xff] %v3181_v4  ;;  %4226 = vst [vmem:[#allocation66_spill] sm:$0xff] %v3183_v7  ;;  %vm981_vm3 = vcmp.eq.f32.partialorder %v3044_v62, %v3181_v4  ;;  %vm986_vm4 = vcmp.eq.f32.partialorder %v3047_v45, %v3183_v7  ;;  %v3195_v2 = vcvt.s32.f32 %v1189_v32  ;;  %v3197_v57 = vcvt.s32.f32 %v1063_v14 }
 0x555   :  { %v3190_v18 = vsel %vm981_vm3, %v2231_v41, 128  ;;  %v3193_v43 = vsel %vm986_vm4, %v2231_v41, 128 }
 0x556   :  { %v1105_v60 = vshra.s32 %v3190_v18, 16  ;;  %v1175_v24 = vshra.s32 %v3193_v43, 16  ;;  %1192 = vmin.xlane.f32.xlu1 %v3195_v2  ;;  %1066 = vmin.xlane.f32.xlu0 %v3197_v57  ;;  %v1174_v47 = vand.u32 65535, %v3193_v43 }
 0x557   :  { %v3203_v49 = vpop.xlane.xlu1 %972  ;;  %v3205_v61 = vpop.xlane.xlu0 %954 }
 0x558   :  { %4227 = vst [vmem:[#allocation67_spill] sm:$0xff] %v3203_v49  ;;  %4228 = vst [vmem:[#allocation68_spill] sm:$0xff] %v3205_v61  ;;  %vm989_vm5 = vcmp.eq.f32.partialorder %v3054_v6, %v3203_v49  ;;  %vm980_vm6 = vcmp.eq.f32.partialorder %v3057_v3, %v3205_v61  ;;  %v3217_v7 = vcvt.s32.f32 %v1105_v60  ;;  %v3219_v4 = vcvt.s32.f32 %v1175_v24 }
 0x559   :  { %v3212_v32 = vsel %vm989_vm5, %v2231_v41, 128  ;;  %v3215_v14 = vsel %vm980_vm6, %v2231_v41, 128 }
 0x55a   :  { %v1217_v56 = vshra.s32 %v3212_v32, 16  ;;  %v1091_v8 = vshra.s32 %v3215_v14, 16  ;;  %1108 = vmin.xlane.f32.xlu1 %v3217_v7  ;;  %1178 = vmin.xlane.f32.xlu0 %v3219_v4  ;;  %v1090_v43 = vand.u32 65535, %v3215_v14 }
 0x55b   :  { %v3225_v49 = vpop.xlane.xlu0 %970 }
 0x55c   :  { %4229 = vst [vmem:[#allocation69_spill] sm:$0xff] %v3225_v49  ;;  %vm988_vm7 = vcmp.eq.f32.partialorder %v3063_v25, %v3225_v49  ;;  %v3229_v61 = vcvt.s32.f32 %v1217_v56  ;;  %v3234_v24 = vcvt.s32.f32 %v1091_v8  ;;  %v1132_v56 = vand.u32 65535, %v3083_v40 }
 0x55d   :  { %v3232_v60 = vsel %vm988_vm7, %v2231_v41, 128  ;;  %v1006_v49 = vand.u32 65535, %v3086_v37  ;;  %v1022_v8 = vcvt.s32.f32 %v1020_v30 }
 0x55e   :  { %v1203_v63 = vshra.s32 %v3232_v60, 16  ;;  %1220 = vmin.xlane.f32.xlu1 %v3229_v61  ;;  %1094 = vmin.xlane.f32.xlu0 %v3234_v24  ;;  %v1134_v12 = vcvt.s32.f32 %v1132_v56  ;;  %v1050_v56 = vcvt.s32.f32 %v1048_v17 }
 0x55f   :  { %v1008_v40 = vcvt.s32.f32 %v1006_v49 }
 0x560   :  { %v3239_v9 = vcvt.s32.f32 %v1203_v63  ;;  %v1118_v63 = vand.u32 65535, %v3105_v34 }
 0x562   :  { %1206 = vmin.xlane.f32.xlu0 %v3239_v9  ;;  %v1120_v49 = vcvt.s32.f32 %v1118_v63  ;;  %v1036_v63 = vcvt.s32.f32 %v1034_v46 }
 0x5cf   :  { %v3245_v52 = vpop.xlane.xlu1 %1024 }
 0x5d0   :  { %vm1026_vm8 = vcmp.eq.f32.partialorder %v3088_v51, %v3245_v52 }
 0x5d1   :  { %v1027_v1 = vsel %vm1026_vm8, %v1022_v8, inf }
 0x5d2   :  { %1028 = vmin.xlane.f32.xlu1 %v1027_v1  ;;  %v1160_v1 = vand.u32 65535, %v3124_v19  ;;  %v1076_v19 = vand.u32 65535, %v3146_v36  ;;  %v1188_v36 = vand.u32 65535, %v3168_v29  ;;  %v1104_v29 = vand.u32 65535, %v3190_v18 }
 0x5d3   :  { %v3251_v22 = vpop.xlane.xlu1 %1136  ;;  %v3253_v39 = vpop.xlane.xlu0 %1010  ;;  %v1216_v18 = vand.u32 65535, %v3212_v32  ;;  %v1202_v32 = vand.u32 65535, %v3232_v60 }
 0x5d4   :  { %vm1138_vm9 = vcmp.eq.f32.partialorder %v3107_v44, %v3251_v22  ;;  %vm1012_vm10 = vcmp.eq.f32.partialorder %v3109_v27, %v3253_v39  ;;  %v1162_v17 = vcvt.s32.f32 %v1160_v1  ;;  %v1148_v1 = vcvt.s32.f32 %v1146_v15 }
 0x5d5   :  { %v1139_v37 = vsel %vm1138_vm9, %v1134_v12, inf  ;;  %v1013_v51 = vsel %vm1012_vm10, %v1008_v40, inf  ;;  %v1106_v15 = vcvt.s32.f32 %v1104_v29 }
 0x5d6   :  { %1140 = vmin.xlane.f32.xlu1 %v1139_v37  ;;  %1014 = vmin.xlane.f32.xlu0 %v1013_v51  ;;  %v1078_v51 = vcvt.s32.f32 %v1076_v19 }
 0x5d7   :  { %v3261_v34 = vpop.xlane.xlu1 %1052  ;;  %v3263_v30 = vpop.xlane.xlu0 %1122 }
 0x5d8   :  { %vm1054_vm11 = vcmp.eq.f32.partialorder %v3129_v54, %v3261_v34  ;;  %vm1124_vm12 = vcmp.eq.f32.partialorder %v3131_v0, %v3263_v30 }
 0x5d9   :  { %v1055_v44 = vsel %vm1054_vm11, %v1050_v56, inf  ;;  %v1125_v27 = vsel %vm1124_vm12, %v1120_v49, inf  ;;  %v1190_v49 = vcvt.s32.f32 %v1188_v36 }
 0x5da   :  { %1056 = vmin.xlane.f32.xlu1 %v1055_v44  ;;  %1126 = vmin.xlane.f32.xlu0 %v1125_v27  ;;  %v1064_v44 = vcvt.s32.f32 %v1062_v26  ;;  %v1204_v26 = vcvt.s32.f32 %v1202_v32 }
 0x5db   :  { %v3271_v8 = vpop.xlane.xlu1 %1164  ;;  %v3273_v12 = vpop.xlane.xlu0 %1038 }
 0x5dc   :  { %vm1166_vm13 = vcmp.eq.f32.partialorder %v3151_v58, %v3271_v8  ;;  %vm1040_vm14 = vcmp.eq.f32.partialorder %v3153_v53, %v3273_v12 }
 0x5dd   :  { %v1167_v54 = vsel %vm1166_vm13, %v1162_v17, inf  ;;  %v1041_v0 = vsel %vm1040_vm14, %v1036_v63, inf  ;;  %v1176_v17 = vcvt.s32.f32 %v1174_v47 }
 0x5de   :  { %1168 = vmin.xlane.f32.xlu1 %v1167_v54  ;;  %1042 = vmin.xlane.f32.xlu0 %v1041_v0  ;;  %v1218_v54 = vcvt.s32.f32 %v1216_v18  ;;  %v1092_v0 = vcvt.s32.f32 %v1090_v43 }
 0x5df   :  { %v3281_v40 = vpop.xlane.xlu1 %1080  ;;  %v3283_v37 = vpop.xlane.xlu0 %1150 }
 0x5e0   :  { %vm1082_vm15 = vcmp.eq.f32.partialorder %v3173_v35, %v3281_v40  ;;  %vm1152_vm1 = vcmp.eq.f32.partialorder %v3175_v42, %v3283_v37 }
 0x5e1   :  { %v1083_v58 = vsel %vm1082_vm15, %v1078_v51, inf  ;;  %v1153_v53 = vsel %vm1152_vm1, %v1148_v1, inf  ;;  %v1031_v51 = vcvt.f32.s32 %v3245_v52  ;;  %v1143_v1 = vcvt.f32.s32 %v3251_v22 }
 0x5e2   :  { %1084 = vmin.xlane.f32.xlu1 %v1083_v58  ;;  %1154 = vmin.xlane.f32.xlu0 %v1153_v53 }
 0x5e3   :  { %v3291_v46 = vpop.xlane.xlu1 %1192  ;;  %v3293_v56 = vpop.xlane.xlu0 %1066  ;;  %v1032_v58 = vshll.u32 %v1031_v51, 16  ;;  %v1144_v47 = vshll.u32 %v1143_v1, 16 }
 0x5e4   :  { %vm1194_vm2 = vcmp.eq.f32.partialorder %v3195_v2, %v3291_v46  ;;  %vm1068_vm3 = vcmp.eq.f32.partialorder %v3197_v57, %v3293_v56 }
 0x5e5   :  { %v1195_v35 = vsel %vm1194_vm2, %v1190_v49, inf  ;;  %v1069_v42 = vsel %vm1068_vm3, %v1064_v44, inf  ;;  %v1059_v49 = vcvt.f32.s32 %v3261_v34  ;;  %v1129_v44 = vcvt.f32.s32 %v3263_v30 }
 0x5e6   :  { %1196 = vmin.xlane.f32.xlu1 %v1195_v35  ;;  %1070 = vmin.xlane.f32.xlu0 %v1069_v42  ;;  %v1171_v34 = vcvt.f32.s32 %v3271_v8  ;;  %v1045_v30 = vcvt.f32.s32 %v3273_v12 }
 0x5e7   :  { %v3301_v27 = vpop.xlane.xlu1 %1108  ;;  %v3303_v19 = vpop.xlane.xlu0 %1178 }
 0x5e8   :  { %vm1110_vm4 = vcmp.eq.f32.partialorder %v3217_v7, %v3301_v27  ;;  %vm1180_vm5 = vcmp.eq.f32.partialorder %v3219_v4, %v3303_v19  ;;  %v1172_v8 = vshll.u32 %v1171_v34, 16  ;;  %v1046_v12 = vshll.u32 %v1045_v30, 16 }
 0x5e9   :  { %v1111_v2 = vsel %vm1110_vm4, %v1106_v15, inf  ;;  %v1181_v57 = vsel %vm1180_vm5, %v1176_v17, inf  ;;  %v1130_v17 = vshll.u32 %v1129_v44, 16 }
 0x5ea   :  { %1112 = vmin.xlane.f32.xlu1 %v1111_v2  ;;  %1182 = vmin.xlane.f32.xlu0 %v1181_v57 }
 0x5eb   :  { %v3310_v63 = vpop.xlane.xlu1 %1220  ;;  %v3312_v14 = vpop.xlane.xlu0 %1094 }
 0x5ec   :  { %vm1222_vm6 = vcmp.eq.f32.partialorder %v3229_v61, %v3310_v63  ;;  %vm1096_vm7 = vcmp.eq.f32.partialorder %v3234_v24, %v3312_v14  ;;  %v1017_v24 = vcvt.f32.s32 %v3253_v39  ;;  %v1060_v39 = vshll.u32 %v1059_v49, 16 }
 0x5ed   :  { %v1223_v7 = vsel %vm1222_vm6, %v1218_v54, inf  ;;  %v1097_v4 = vsel %vm1096_vm7, %v1092_v0, inf }
 0x5ee   :  { %1224 = vmin.xlane.f32.xlu1 %v1223_v7  ;;  %1098 = vmin.xlane.f32.xlu0 %v1097_v4 }
 0x5ef   :  { %v3318_v36 = vpop.xlane.xlu0 %1206 }
 0x5f0   :  { %vm1208_vm8 = vcmp.eq.f32.partialorder %v3239_v9, %v3318_v36  ;;  %v1018_v9 = vshll.u32 %v1017_v24, 16 }
 0x5f1   :  { %v1209_v60 = vsel %vm1208_vm8, %v1204_v26, inf  ;;  %v1087_v26 = vcvt.f32.s32 %v3281_v40 }
 0x5f2   :  { %1210 = vmin.xlane.f32.xlu0 %v1209_v60  ;;  %v1157_v60 = vcvt.f32.s32 %v3283_v37 }
 0x5f3   :  { %v1088_v40 = vshll.u32 %v1087_v26, 16 }
 0x5f4   :  { %v1158_v37 = vshll.u32 %v1157_v60, 16  ;;  %v1213_v60 = vcvt.f32.s32 %v3318_v36 }
 0x65f   :  { %v1029_v61 = vpop.xlane.xlu1 %1028 }
 0x660   :  { %v1030_v53 = vcvt.f32.s32 %v1029_v61 }
 0x662   :  { %v1033_v29 = vadd.s32 %v1032_v58, %v1030_v53 }
 0x663   :  { %v1141_v35 = vpop.xlane.xlu1 %1140  ;;  %v1015_v42 = vpop.xlane.xlu0 %1014 }
 0x664   :  { %v1142_v18 = vcvt.f32.s32 %v1141_v35  ;;  %v1016_v43 = vcvt.f32.s32 %v1015_v42  ;;  %vm1231_vm9 = vcmp.eq.s32.totalorder %v2231_v41, %v1033_v29  ;;  %v1199_v29 = vcvt.f32.s32 %v3291_v46 }
 0x665   :  { %v3329_v22 = vsel %vm1231_vm9, -inf, %v2977_v16 }
 0x666   :  { %v1145_v52 = vadd.s32 %v1144_v47, %v1142_v18  ;;  %v1019_v15 = vadd.s32 %v1018_v9, %v1016_v43  ;;  %1296 = vmax.xlane.f32.xlu1 %v3329_v22  ;;  %v1073_v47 = vcvt.f32.s32 %v3293_v56  ;;  %v1200_v46 = vshll.u32 %v1199_v29, 16 }
 0x667   :  { %v1057_v2 = vpop.xlane.xlu1 %1056  ;;  %v1127_v57 = vpop.xlane.xlu0 %1126  ;;  %v1115_v43 = vcvt.f32.s32 %v3301_v27 }
 0x668   :  { %v1058_v32 = vcvt.f32.s32 %v1057_v2  ;;  %v1128_v54 = vcvt.f32.s32 %v1127_v57  ;;  %vm1239_vm10 = vcmp.eq.s32.totalorder %v2231_v41, %v1145_v52  ;;  %vm1230_vm11 = vcmp.eq.s32.totalorder %v2231_v41, %v1019_v15 }
 0x669   :  { %v3337_v16 = vsel %vm1239_vm10, -inf, %v2985_v38  ;;  %v3340_v0 = vsel %vm1230_vm11, -inf, %v2988_v23  ;;  %v1074_v56 = vshll.u32 %v1073_v47, 16  ;;  %v1185_v52 = vcvt.f32.s32 %v3303_v19 }
 0x66a   :  { %v1061_v7 = vadd.s32 %v1060_v39, %v1058_v32  ;;  %v1131_v4 = vadd.s32 %v1130_v17, %v1128_v54  ;;  %1312 = vmax.xlane.f32.xlu1 %v3337_v16  ;;  %1294 = vmax.xlane.f32.xlu0 %v3340_v0  ;;  %v1116_v27 = vshll.u32 %v1115_v43, 16  ;;  %v1227_v57 = vcvt.f32.s32 %v3310_v63  ;;  %v4243_v43 = vld [vmem:[#allocation27_spill] sm:$0xff] }
 0x66b   :  { %v1169_v51 = vpop.xlane.xlu1 %1168  ;;  %v1043_v1 = vpop.xlane.xlu0 %1042  ;;  %v1186_v19 = vshll.u32 %v1185_v52, 16  ;;  %v1101_v32 = vcvt.f32.s32 %v3312_v14 }
 0x66c   :  { %v1170_v61 = vcvt.f32.s32 %v1169_v51  ;;  %v1044_v38 = vcvt.f32.s32 %v1043_v1  ;;  %vm1233_vm12 = vcmp.eq.s32.totalorder %v2231_v41, %v1061_v7  ;;  %vm1238_vm13 = vcmp.eq.s32.totalorder %v2231_v41, %v1131_v4 }
 0x66d   :  { %v3349_v23 = vsel %vm1233_vm12, -inf, %v2997_v33  ;;  %v3352_v58 = vsel %vm1238_vm13, -inf, %v3000_v20  ;;  %v1228_v63 = vshll.u32 %v1227_v57, 16  ;;  %v1102_v14 = vshll.u32 %v1101_v32, 16 }
 0x66e   :  { %v1173_v24 = vadd.s32 %v1172_v8, %v1170_v61  ;;  %v1047_v53 = vadd.s32 %v1046_v12, %v1044_v38  ;;  %1300 = vmax.xlane.f32.xlu1 %v3349_v23  ;;  %1310 = vmax.xlane.f32.xlu0 %v3352_v58 }
 0x66f   :  { %v1085_v49 = vpop.xlane.xlu1 %1084  ;;  %v1155_v44 = vpop.xlane.xlu0 %1154 }
 0x670   :  { %v1086_v35 = vcvt.f32.s32 %v1085_v49  ;;  %v1156_v33 = vcvt.f32.s32 %v1155_v44  ;;  %vm1241_vm14 = vcmp.eq.s32.totalorder %v2231_v41, %v1173_v24  ;;  %vm1232_vm15 = vcmp.eq.s32.totalorder %v2231_v41, %v1047_v53 }
 0x671   :  { %v3361_v20 = vsel %vm1241_vm14, -inf, %v3009_v48  ;;  %v3364_v42 = vsel %vm1232_vm15, -inf, %v3012_v59  ;;  %v911_v49 = vmul.f32 %v2714_v13, %v2714_v13 }
 0x672   :  { %4230 = vst [vmem:[#allocation70_spill] sm:$0xff] %v3361_v20  ;;  %4231 = vst [vmem:[#allocation71_spill] sm:$0xff] %v3364_v42  ;;  %v1089_v9 = vadd.s32 %v1088_v40, %v1086_v35  ;;  %v1159_v18 = vadd.s32 %v1158_v37, %v1156_v33  ;;  %1316 = vmax.xlane.f32.xlu1 %v3361_v20  ;;  %1298 = vmax.xlane.f32.xlu0 %v3364_v42  ;;  %v1214_v40 = vshll.u32 %v1213_v60, 16 }
 0x673   :  { %v1197_v15 = vpop.xlane.xlu1 %1196  ;;  %v1071_v39 = vpop.xlane.xlu0 %1070  ;;  %v919_v35 = vmul.f32 %v2722_v21, %v2722_v21  ;;  %v567_v33 = vmul.f32 %v2362_v10, %v2362_v10 }
 0x674   :  { %v1198_v17 = vcvt.f32.s32 %v1197_v15  ;;  %v1072_v48 = vcvt.f32.s32 %v1071_v39  ;;  %vm1235_vm1 = vcmp.eq.s32.totalorder %v2231_v41, %v1089_v9  ;;  %vm1240_vm2 = vcmp.eq.s32.totalorder %v2231_v41, %v1159_v18  ;;  %v4244_v15 = vld [vmem:[#allocation56_spill] sm:$0xff] }
 0x675   :  { %v3373_v59 = vsel %vm1235_vm1, -inf, %v3021_v28  ;;  %v3376_v34 = vsel %vm1240_vm2, -inf, %v3024_v50  ;;  %v935_v21 = vadd.f32 %v919_v35, %v567_v33  ;;  %v1262_v10 = vmul.f32 %v4244_v15, %v4244_v15 }
 0x676   :  { %4232 = vst [vmem:[#allocation72_spill] sm:$0xff] %v3373_v59  ;;  %4233 = vst [vmem:[#allocation73_spill] sm:$0xff] %v3376_v34  ;;  %v1201_v30 = vadd.s32 %v1200_v46, %v1198_v17  ;;  %v1075_v2 = vadd.s32 %v1074_v56, %v1072_v48  ;;  %1304 = vmax.xlane.f32.xlu1 %v3373_v59  ;;  %1314 = vmax.xlane.f32.xlu0 %v3376_v34  ;;  %v4242_v56 = vld [vmem:[#allocation55_spill] sm:$0xff]  ;;  %v4245_v48 = vld [vmem:[#allocation42_spill] sm:$0xff] }
 0x677   :  { %v1113_v54 = vpop.xlane.xlu1 %1112  ;;  %v1183_v7 = vpop.xlane.xlu0 %1182  ;;  %v1271_v13 = vmul.f32 %v4242_v56, %v4242_v56  ;;  %v4253_v56 = vld [vmem:[#allocation59_spill] sm:$0xff] }
 0x678   :  { %v1114_v4 = vcvt.f32.s32 %v1113_v54  ;;  %v1184_v28 = vcvt.f32.s32 %v1183_v7  ;;  %vm1243_vm3 = vcmp.eq.s32.totalorder %v2231_v41, %v1201_v30  ;;  %vm1234_vm4 = vcmp.eq.s32.totalorder %v2231_v41, %v1075_v2  ;;  %v4247_v7 = vld [vmem:[#allocation57_spill] sm:$0xff] }
 0x679   :  { %v3385_v50 = vsel %vm1243_vm3, -inf, %v3033_v55  ;;  %v3388_v8 = vsel %vm1234_vm4, -inf, %v3036_v5  ;;  %v913_v30 = vmul.f32 %v4245_v48, %v4245_v48  ;;  %v1287_v54 = vadd.f32 %v1271_v13, %v935_v21 }
 0x67a   :  { %4234 = vst [vmem:[#allocation74_spill] sm:$0xff] %v3385_v50  ;;  %4235 = vst [vmem:[#allocation75_spill] sm:$0xff] %v3388_v8  ;;  %v1117_v12 = vadd.s32 %v1116_v27, %v1114_v4  ;;  %v1187_v26 = vadd.s32 %v1186_v19, %v1184_v28  ;;  %1320 = vmax.xlane.f32.xlu1 %v3385_v50  ;;  %1302 = vmax.xlane.f32.xlu0 %v3388_v8  ;;  %v4246_v19 = vld [vmem:[#allocation28_spill] sm:$0xff] }
 0x67b   :  { %v1225_v51 = vpop.xlane.xlu1 %1224  ;;  %v1099_v1 = vpop.xlane.xlu0 %1098  ;;  %v561_v57 = vmul.f32 %v4246_v19, %v4246_v19  ;;  %v1265_v4 = vmul.f32 %v4247_v7, %v4247_v7  ;;  %v1273_v13 = vmul.f32 %v4253_v56, %v4253_v56  ;;  %v4256_v7 = vld [vmem:[#allocation46_spill] sm:$0xff] }
 0x67c   :  { %v1226_v61 = vcvt.f32.s32 %v1225_v51  ;;  %v1100_v38 = vcvt.f32.s32 %v1099_v1  ;;  %vm1237_vm5 = vcmp.eq.s32.totalorder %v2231_v41, %v1117_v12  ;;  %vm1242_vm6 = vcmp.eq.s32.totalorder %v2231_v41, %v1187_v26  ;;  %v4248_v26 = vld [vmem:[#allocation43_spill] sm:$0xff]  ;;  %v4249_v1 = vld [vmem:[#allocation29_spill] sm:$0xff] }
 0x67d   :  { %v3396_v55 = vsel %vm1237_vm5, -inf, %v3044_v62  ;;  %v3399_v5 = vsel %vm1242_vm6, -inf, %v3047_v45 }
 0x67e   :  { %4236 = vst [vmem:[#allocation76_spill] sm:$0xff] %v3396_v55  ;;  %4237 = vst [vmem:[#allocation77_spill] sm:$0xff] %v3399_v5  ;;  %v1229_v24 = vadd.s32 %v1228_v63, %v1226_v61  ;;  %v1103_v53 = vadd.s32 %v1102_v14, %v1100_v38  ;;  %1308 = vmax.xlane.f32.xlu1 %v3396_v55  ;;  %1318 = vmax.xlane.f32.xlu0 %v3399_v5 }
 0x67f   :  { %v1211_v36 = vpop.xlane.xlu0 %1210  ;;  %v918_v63 = vmul.f32 %v4248_v26, %v4248_v26  ;;  %v566_v61 = vmul.f32 %v4249_v1, %v4249_v1  ;;  %v929_v38 = vadd.f32 %v913_v30, %v561_v57 }
 0x680   :  { %v1212_v37 = vcvt.f32.s32 %v1211_v36  ;;  %vm1245_vm7 = vcmp.eq.s32.totalorder %v2231_v41, %v1229_v24  ;;  %vm1236_vm8 = vcmp.eq.s32.totalorder %v2231_v41, %v1103_v53 }
 0x681   :  { %v3406_v29 = vsel %vm1245_vm7, -inf, %v3054_v6  ;;  %v3409_v62 = vsel %vm1236_vm8, -inf, %v3057_v3  ;;  %v559_v6 = vmul.f32 %v2364_v11, %v2364_v11  ;;  %v1263_v3 = vmul.f32 %v3066_v31, %v3066_v31 }
 0x682   :  { %4238 = vst [vmem:[#allocation78_spill] sm:$0xff] %v3406_v29  ;;  %4239 = vst [vmem:[#allocation79_spill] sm:$0xff] %v3409_v62  ;;  %v1215_v45 = vadd.s32 %v1214_v40, %v1212_v37  ;;  %1324 = vmax.xlane.f32.xlu1 %v3406_v29  ;;  %1306 = vmax.xlane.f32.xlu0 %v3409_v62  ;;  %v558_v31 = vmul.f32 %v4243_v43, %v4243_v43  ;;  %v4250_v40 = vld [vmem:[#allocation58_spill] sm:$0xff] }
 0x683   :  { %v927_v44 = vadd.f32 %v911_v49, %v559_v6  ;;  %v1270_v37 = vmul.f32 %v4250_v40, %v4250_v40  ;;  %v1281_v33 = vadd.f32 %v1265_v4, %v929_v38  ;;  %v915_v4 = vmul.f32 %v4256_v7, %v4256_v7  ;;  %v4259_v40 = vld [vmem:[#allocation61_spill] sm:$0xff] }
 0x684   :  { %vm1244_vm9 = vcmp.eq.s32.totalorder %v2231_v41, %v1215_v45  ;;  %v4264_v7 = vld [vmem:[#allocation49_spill] sm:$0xff] }
 0x685   :  { %v3415_v47 = vsel %vm1244_vm9, -inf, %v3063_v25  ;;  %v4241_v25 = vld [vmem:[#allocation41_spill] sm:$0xff]  ;;  %v1279_v46 = vadd.f32 %v1263_v3, %v927_v44  ;;  %v4251_v44 = vld [vmem:[#allocation44_spill] sm:$0xff] }
 0x686   :  { %4240 = vst [vmem:[#allocation80_spill] sm:$0xff] %v3415_v47  ;;  %1322 = vmax.xlane.f32.xlu0 %v3415_v47  ;;  %v910_v9 = vmul.f32 %v4241_v25, %v4241_v25  ;;  %v921_v35 = vmul.f32 %v4251_v44, %v4251_v44  ;;  %v4252_v25 = vld [vmem:[#allocation30_spill] sm:$0xff] }
 0x688   :  { %v926_v32 = vadd.f32 %v910_v9, %v558_v31  ;;  %v569_v9 = vmul.f32 %v4252_v25, %v4252_v25 }
 0x68a   :  { %v1278_v14 = vadd.f32 %v1262_v10, %v926_v32  ;;  %v937_v10 = vadd.f32 %v921_v35, %v569_v9 }
 0x6f3   :  { %v1297_v18 = vpop.xlane.xlu1 %1296 }
 0x6f4   :  { %vm1327_vm10 = vcmp.eq.f32.partialorder %v3329_v22, %v1297_v18  ;;  %v1615_v11 = vmul.f32 %v1297_v18, %v1297_v18  ;;  %v934_v18 = vadd.f32 %v918_v63, %v566_v61 }
 0x6f5   :  { %v3436_v52 = vsel %vm1327_vm10, %v2231_v41, 128 }
 0x6f6   :  { %v1373_v39 = vshra.s32 %v3436_v52, 16  ;;  %v3441_v17 = vadd.f32 %v1615_v11, %v1279_v46  ;;  %v1286_v31 = vadd.f32 %v1270_v37, %v934_v18  ;;  %v1267_v37 = vmul.f32 %v4259_v40, %v4259_v40 }
 0x6f7   :  { %v1313_v2 = vpop.xlane.xlu1 %1312  ;;  %v1295_v27 = vpop.xlane.xlu0 %1294 }
 0x6f8   :  { %vm1335_vm11 = vcmp.eq.f32.partialorder %v3337_v16, %v1313_v2  ;;  %v1623_v28 = vmul.f32 %v1313_v2, %v1313_v2  ;;  %vm1326_vm12 = vcmp.eq.f32.partialorder %v3340_v0, %v1295_v27  ;;  %v1614_v12 = vmul.f32 %v1295_v27, %v1295_v27  ;;  %v4255_v27 = vld [vmem:[#allocation32_spill] sm:$0xff] }
 0x6f9   :  { %v3454_v60 = vsel %vm1335_vm11, %v2231_v41, 128  ;;  %v3456_v51 = vcvt.s32.f32 %v1373_v39  ;;  %v3463_v53 = vsel %vm1326_vm12, %v2231_v41, 128  ;;  %v4254_v39 = vld [vmem:[#allocation45_spill] sm:$0xff]  ;;  %v560_v19 = vmul.f32 %v4255_v27, %v4255_v27 }
 0x6fa   :  { %v3460_v24 = vadd.f32 %v1623_v28, %v1287_v54  ;;  %v1485_v45 = vshra.s32 %v3454_v60, 16  ;;  %v3468_v49 = vadd.f32 %v1614_v12, %v1278_v14  ;;  %v1359_v46 = vshra.s32 %v3463_v53, 16  ;;  %v4257_v12 = vld [vmem:[#allocation60_spill] sm:$0xff]  ;;  %v4258_v14 = vld [vmem:[#allocation33_spill] sm:$0xff] }
 0x6fb   :  { %v1301_v36 = vpop.xlane.xlu1 %1300  ;;  %1376 = vmin.xlane.f32.xlu1 %v3456_v51  ;;  %v1311_v3 = vpop.xlane.xlu0 %1310  ;;  %v912_v48 = vmul.f32 %v4254_v39, %v4254_v39  ;;  %v1289_v28 = vadd.f32 %v1273_v13, %v937_v10  ;;  %v1264_v26 = vmul.f32 %v4257_v12, %v4257_v12  ;;  %v563_v1 = vmul.f32 %v4258_v14, %v4258_v14  ;;  %v4263_v39 = vld [vmem:[#allocation48_spill] sm:$0xff] }
 0x6fc   :  { %v1617_v6 = vmul.f32 %v1301_v36, %v1301_v36  ;;  %vm1329_vm13 = vcmp.eq.f32.partialorder %v3349_v23, %v1301_v36  ;;  %vm1334_vm14 = vcmp.eq.f32.partialorder %v3352_v58, %v1311_v3  ;;  %v1622_v43 = vmul.f32 %v1311_v3, %v1311_v3 }
 0x6fd   :  { %v3482_v21 = vcvt.s32.f32 %v1485_v45  ;;  %v3487_v30 = vsel %vm1329_vm13, %v2231_v41, 128  ;;  %v3490_v2 = vsel %vm1334_vm14, %v2231_v41, 128  ;;  %v3497_v32 = vcvt.s32.f32 %v1359_v46 }
 0x6fe   :  { %v3479_v11 = vadd.f32 %v1617_v6, %v1281_v33  ;;  %v3494_v57 = vadd.f32 %v1622_v43, %v1286_v31  ;;  %v1401_v61 = vshra.s32 %v3487_v30, 16  ;;  %v1471_v38 = vshra.s32 %v3490_v2, 16  ;;  %v4260_v6 = vld [vmem:[#allocation31_spill] sm:$0xff] }
 0x6ff   :  { %v1317_v15 = vpop.xlane.xlu1 %1316  ;;  %1488 = vmin.xlane.f32.xlu1 %v3482_v21  ;;  %v1299_v54 = vpop.xlane.xlu0 %1298  ;;  %1362 = vmin.xlane.f32.xlu0 %v3497_v32  ;;  %v928_v36 = vadd.f32 %v912_v48, %v560_v19  ;;  %v568_v3 = vmul.f32 %v4260_v6, %v4260_v6  ;;  %v931_v35 = vadd.f32 %v915_v4, %v563_v1  ;;  %v4261_v33 = vld [vmem:[#allocation47_spill] sm:$0xff]  ;;  %v4266_v1 = vld [vmem:[#allocation34_spill] sm:$0xff]  ;;  %2045 = vrsqrt.f32 %v3441_v17 }
 0x700   :  { %v1625_v63 = vmul.f32 %v1317_v15, %v1317_v15  ;;  %vm1337_vm15 = vcmp.eq.f32.partialorder %v3361_v20, %v1317_v15  ;;  %vm1328_vm1 = vcmp.eq.f32.partialorder %v3364_v42, %v1299_v54  ;;  %v920_v25 = vmul.f32 %v4261_v33, %v4261_v33  ;;  %v4262_v15 = vld [vmem:[#allocation35_spill] sm:$0xff] }
 0x701   :  { %v1280_v9 = vadd.f32 %v1264_v26, %v928_v36  ;;  %v3519_v18 = vsel %vm1337_vm15, %v2231_v41, 128  ;;  %v3522_v46 = vsel %vm1328_vm1, %v2231_v41, 128  ;;  %v1616_v56 = vmul.f32 %v1299_v54, %v1299_v54  ;;  %v4267_v36 = vld [vmem:[#allocation63_spill] sm:$0xff] }
 0x702   :  { %v3511_v45 = vadd.f32 %v1625_v63, %v1289_v28  ;;  %v3524_v13 = vcvt.s32.f32 %v1401_v61  ;;  %v3526_v43 = vcvt.s32.f32 %v1471_v38  ;;  %v571_v10 = vmul.f32 %v4262_v15, %v4262_v15  ;;  %v4265_v28 = vld [vmem:[#allocation62_spill] sm:$0xff]  ;;  %v4269_v15 = vld [vmem:[#allocation64_spill] sm:$0xff] }
 0x703   :  { %v1305_v44 = vpop.xlane.xlu1 %1304  ;;  %v1315_v31 = vpop.xlane.xlu0 %1314  ;;  %v923_v48 = vmul.f32 %v4263_v39, %v4263_v39  ;;  %v1283_v27 = vadd.f32 %v1267_v37, %v931_v35  ;;  %v914_v4 = vmul.f32 %v4264_v7, %v4264_v7  ;;  %v1272_v12 = vmul.f32 %v4265_v28, %v4265_v28  ;;  %v4268_v37 = vld [vmem:[#allocation37_spill] sm:$0xff]  ;;  %v4270_v28 = vld [vmem:[#allocation50_spill] sm:$0xff] }
 0x704   :  { %v1619_v19 = vmul.f32 %v1305_v44, %v1305_v44  ;;  %v3536_v54 = vadd.f32 %v1616_v56, %v1280_v9  ;;  %1404 = vmin.xlane.f32.xlu1 %v3524_v13  ;;  %1474 = vmin.xlane.f32.xlu0 %v3526_v43  ;;  %v1513_v26 = vshra.s32 %v3519_v18, 16  ;;  %v1387_v63 = vshra.s32 %v3522_v46, 16 }
 0x705   :  { %vm1331_vm2 = vcmp.eq.f32.partialorder %v3373_v59, %v1305_v44  ;;  %v562_v61 = vmul.f32 %v4266_v1, %v4266_v1  ;;  %v936_v38 = vadd.f32 %v920_v25, %v568_v3  ;;  %v1275_v40 = vmul.f32 %v4267_v36, %v4267_v36 }
 0x706   :  { %v3543_v14 = vadd.f32 %v1619_v19, %v1283_v27  ;;  %vm1336_vm3 = vcmp.eq.f32.partialorder %v3376_v34, %v1315_v31  ;;  %v565_v6 = vmul.f32 %v4268_v37, %v4268_v37  ;;  %v939_v35 = vadd.f32 %v923_v48, %v571_v10 }
 0x707   :  { %v1321_v33 = vpop.xlane.xlu1 %1320  ;;  %v930_v9 = vadd.f32 %v914_v4, %v562_v61  ;;  %v1288_v56 = vadd.f32 %v1272_v12, %v936_v38  ;;  %v1266_v44 = vmul.f32 %v4269_v15, %v4269_v15  ;;  %v3555_v39 = vsel %vm1331_vm2, %v2231_v41, 128  ;;  %v1303_v27 = vpop.xlane.xlu0 %1302  ;;  %v4271_v4 = vld [vmem:[#allocation65_spill] sm:$0xff]  ;;  %v4272_v15 = vld [vmem:[#allocation51_spill] sm:$0xff] }
 0x708   :  { %v3558_v3 = vsel %vm1336_vm3, %v2231_v41, 128  ;;  %v1624_v25 = vmul.f32 %v1315_v31, %v1315_v31  ;;  %v3560_v19 = vcvt.s32.f32 %v1513_v26  ;;  %v3562_v7 = vcvt.s32.f32 %v1387_v63 }
 0x709   :  { %v917_v10 = vmul.f32 %v4270_v28, %v4270_v28  ;;  %v1291_v48 = vadd.f32 %v1275_v40, %v939_v35  ;;  %v1269_v12 = vmul.f32 %v4271_v4, %v4271_v4  ;;  %v1627_v1 = vmul.f32 %v1321_v33, %v1321_v33 }
 0x70a   :  { %v3568_v61 = vadd.f32 %v1624_v25, %v1288_v56  ;;  %1516 = vmin.xlane.f32.xlu1 %v3560_v19  ;;  %1390 = vmin.xlane.f32.xlu0 %v3562_v7  ;;  %vm1339_vm4 = vcmp.eq.f32.partialorder %v3385_v50, %v1321_v33  ;;  %v1618_v31 = vmul.f32 %v1303_v27, %v1303_v27  ;;  %v1429_v26 = vshra.s32 %v3555_v39, 16 }
 0x70b   :  { %v1499_v63 = vshra.s32 %v3558_v3, 16  ;;  %v3575_v38 = vadd.f32 %v1627_v1, %v1291_v48  ;;  %vm1330_vm5 = vcmp.eq.f32.partialorder %v3388_v8, %v1303_v27  ;;  %v1282_v36 = vadd.f32 %v1266_v44, %v930_v9  ;;  %v1309_v40 = vpop.xlane.xlu1 %1308  ;;  %v1319_v56 = vpop.xlane.xlu0 %1318  ;;  %v4273_v44 = vld [vmem:[#allocation36_spill] sm:$0xff]  ;;  %v4274_v27 = vld [vmem:[#allocation66_spill] sm:$0xff] }
 0x70c   :  { %v933_v37 = vadd.f32 %v917_v10, %v565_v6  ;;  %v3579_v35 = vsel %vm1339_vm4, %v2231_v41, 128  ;;  %v922_v25 = vmul.f32 %v4272_v15, %v4272_v15  ;;  %v3584_v33 = vsel %vm1330_vm5, %v2231_v41, 128 }
 0x70d   :  { %v3586_v28 = vadd.f32 %v1618_v31, %v1282_v36  ;;  %v3588_v48 = vcvt.s32.f32 %v1429_v26  ;;  %v3590_v1 = vcvt.s32.f32 %v1499_v63  ;;  %v1621_v9 = vmul.f32 %v1309_v40, %v1309_v40  ;;  %v4275_v63 = vld [vmem:[#allocation38_spill] sm:$0xff] }
 0x70e   :  { %v1285_v4 = vadd.f32 %v1269_v12, %v933_v37  ;;  %v570_v6 = vmul.f32 %v4273_v44, %v4273_v44  ;;  %v1274_v10 = vmul.f32 %v4274_v27, %v4274_v27  ;;  %v1541_v8 = vshra.s32 %v3579_v35, 16  ;;  %v4276_v44 = vld [vmem:[#allocation53_spill] sm:$0xff] }
 0x70f   :  { %vm1333_vm6 = vcmp.eq.f32.partialorder %v3396_v55, %v1309_v40  ;;  %v1415_v15 = vshra.s32 %v3584_v33, 16  ;;  %1432 = vmin.xlane.f32.xlu1 %v3588_v48  ;;  %1502 = vmin.xlane.f32.xlu0 %v3590_v1  ;;  %vm1338_vm7 = vcmp.eq.f32.partialorder %v3399_v5, %v1319_v56  ;;  %v3604_v26 = vpop.xlane.xlu1 %1324  ;;  %v564_v36 = vmul.f32 %v4275_v63, %v4275_v63  ;;  %v1307_v40 = vpop.xlane.xlu0 %1306 }
 0x710   :  { %v3601_v12 = vadd.f32 %v1621_v9, %v1285_v4  ;;  %v938_v31 = vadd.f32 %v922_v25, %v570_v6  ;;  %v3609_v37 = vsel %vm1333_vm6, %v2231_v41, 128  ;;  %v916_v27 = vmul.f32 %v4276_v44, %v4276_v44  ;;  %v4277_v4 = vld [vmem:[#allocation68_spill] sm:$0xff] }
 0x711   :  { %v1626_v50 = vmul.f32 %v1319_v56, %v1319_v56  ;;  %v3613_v34 = vcvt.s32.f32 %v1541_v8  ;;  %v1268_v25 = vmul.f32 %v4277_v4, %v4277_v4  ;;  %v3618_v9 = vsel %vm1338_vm7, %v2231_v41, 128 }
 0x712   :  { %v1290_v55 = vadd.f32 %v1274_v10, %v938_v31  ;;  %v3620_v6 = vcvt.s32.f32 %v1415_v15  ;;  %vm1341_vm8 = vcmp.eq.f32.partialorder %v3406_v29, %v3604_v26  ;;  %v1457_v63 = vshra.s32 %v3609_v37, 16 }
 0x713   :  { %1544 = vmin.xlane.f32.xlu1 %v3613_v34  ;;  %v3629_v8 = vsel %vm1341_vm8, %v2231_v41, 128  ;;  %vm1332_vm9 = vcmp.eq.f32.partialorder %v3409_v62, %v1307_v40  ;;  %v932_v56 = vadd.f32 %v916_v27, %v564_v36  ;;  %v1527_v10 = vshra.s32 %v3618_v9, 16  ;;  %v3638_v44 = vpop.xlane.xlu0 %1322 }
 0x714   :  { %v3625_v5 = vadd.f32 %v1626_v50, %v1290_v55  ;;  %1418 = vmin.xlane.f32.xlu0 %v3620_v6  ;;  %v1569_v15 = vshra.s32 %v3629_v8, 16  ;;  %v3636_v31 = vsel %vm1332_vm9, %v2231_v41, 128  ;;  %v1620_v55 = vmul.f32 %v1307_v40, %v1307_v40 }
 0x715   :  { %v1284_v50 = vadd.f32 %v1268_v25, %v932_v56  ;;  %v3640_v4 = vcvt.s32.f32 %v1457_v63  ;;  %v1443_v29 = vshra.s32 %v3636_v31, 16  ;;  %v3646_v36 = vcvt.s32.f32 %v1527_v10 }
 0x716   :  { %vm1340_vm10 = vcmp.eq.f32.partialorder %v3415_v47, %v3638_v44  ;;  %v3653_v62 = vcvt.s32.f32 %v1569_v15  ;;  %v1372_v56 = vand.u32 65535, %v3436_v52  ;;  %2047 = vrsqrt.f32 %v3460_v24 }
 0x717   :  { %v3643_v59 = vadd.f32 %v1620_v55, %v1284_v50  ;;  %1460 = vmin.xlane.f32.xlu1 %v3640_v4  ;;  %v3651_v27 = vsel %vm1340_vm10, %v2231_v41, 128  ;;  %v3658_v25 = vcvt.s32.f32 %v1443_v29  ;;  %v1484_v50 = vand.u32 65535, %v3454_v60 }
 0x718   :  { %1530 = vmin.xlane.f32.xlu0 %v3646_v36  ;;  %v1555_v40 = vshra.s32 %v3651_v27, 16  ;;  %v1374_v15 = vcvt.s32.f32 %v1372_v56  ;;  %v1358_v29 = vand.u32 65535, %v3463_v53  ;;  %v1400_v60 = vand.u32 65535, %v3487_v30 }
 0x719   :  { %v1512_v30 = vand.u32 65535, %v3519_v18  ;;  %v1428_v18 = vand.u32 65535, %v3555_v39  ;;  %v1414_v39 = vand.u32 65535, %v3584_v33  ;;  %2049 = vrsqrt.f32 %v3468_v49 }
 0x71a   :  { %v3661_v63 = vcvt.s32.f32 %v1555_v40  ;;  %v1486_v40 = vcvt.s32.f32 %v1484_v50  ;;  %v1360_v20 = vcvt.s32.f32 %v1358_v29  ;;  %v1402_v50 = vcvt.s32.f32 %v1400_v60 }
 0x71b   :  { %1572 = vmin.xlane.f32.xlu1 %v3653_v62  ;;  %2051 = vrsqrt.f32 %v3479_v11 }
 0x71c   :  { %1446 = vmin.xlane.f32.xlu0 %v3658_v25  ;;  %2053 = vrsqrt.f32 %v3494_v57 }
 0x71d   :  { %2055 = vrsqrt.f32 %v3511_v45 }
 0x71e   :  { %2057 = vrsqrt.f32 %v3536_v54 }
 0x71f   :  { %2059 = vrsqrt.f32 %v3543_v14 }
 0x720   :  { %1558 = vmin.xlane.f32.xlu0 %v3661_v63  ;;  %2061 = vrsqrt.f32 %v3568_v61 }
 0x721   :  { %2063 = vrsqrt.f32 %v3575_v38 }
 0x722   :  { %2065 = vrsqrt.f32 %v3586_v28 }
 0x723   :  { %2067 = vrsqrt.f32 %v3601_v12 }
 0x724   :  { %2069 = vrsqrt.f32 %v3625_v5 }
 0x788   :  { %v3665_v10 = vpop.xlane.xlu1 %1376 }
 0x789   :  { %vm1378_vm11 = vcmp.eq.f32.partialorder %v3456_v51, %v3665_v10  ;;  %v1470_v51 = vand.u32 65535, %v3490_v2  ;;  %v1386_v2 = vand.u32 65535, %v3522_v46  ;;  %v1498_v46 = vand.u32 65535, %v3558_v3 }
 0x78a   :  { %v1379_v55 = vsel %vm1378_vm11, %v1374_v15, inf }
 0x78b   :  { %1380 = vmin.xlane.f32.xlu1 %v1379_v55 }
 0x78c   :  { %v3671_v47 = vpop.xlane.xlu1 %1488  ;;  %v3675_v42 = vpop.xlane.xlu0 %1362 }
 0x78d   :  { %vm1490_vm12 = vcmp.eq.f32.partialorder %v3482_v21, %v3671_v47  ;;  %vm1364_vm13 = vcmp.eq.f32.partialorder %v3497_v32, %v3675_v42  ;;  %v1472_v21 = vcvt.s32.f32 %v1470_v51 }
 0x78e   :  { %v1491_v52 = vsel %vm1490_vm12, %v1486_v40, inf  ;;  %v1365_v56 = vsel %vm1364_vm13, %v1360_v20, inf  ;;  %v1514_v40 = vcvt.s32.f32 %v1512_v30  ;;  %v1526_v30 = vand.u32 65535, %v3618_v9 }
 0x78f   :  { %1492 = vmin.xlane.f32.xlu1 %v1491_v52  ;;  %1366 = vmin.xlane.f32.xlu0 %v1365_v56  ;;  %v1388_v52 = vcvt.s32.f32 %v1386_v2  ;;  %v1430_v56 = vcvt.s32.f32 %v1428_v18  ;;  %v1568_v2 = vand.u32 65535, %v3629_v8  ;;  %vm1703_vm12 = vcmp.eq.f32.partialorder %v3441_v17, inf }
 0x790   :  { %vm1705_vm13 = vcmp.eq.f32.partialorder %v3441_v17, 0.0 }
 0x791   :  { %v3681_v53 = vpop.xlane.xlu1 %1404  ;;  %v3683_v15 = vpop.xlane.xlu0 %1474  ;;  %v1570_v8 = vcvt.s32.f32 %v1568_v2 }
 0x792   :  { %vm1406_vm14 = vcmp.eq.f32.partialorder %v3524_v13, %v3681_v53  ;;  %vm1476_vm15 = vcmp.eq.f32.partialorder %v3526_v43, %v3683_v15 }
 0x793   :  { %v1407_v32 = vsel %vm1406_vm14, %v1402_v50, inf  ;;  %v1477_v55 = vsel %vm1476_vm15, %v1472_v21, inf  ;;  %v1500_v50 = vcvt.s32.f32 %v1498_v46  ;;  %v1540_v21 = vand.u32 65535, %v3579_v35 }
 0x794   :  { %1408 = vmin.xlane.f32.xlu1 %v1407_v32  ;;  %1478 = vmin.xlane.f32.xlu0 %v1477_v55  ;;  %v1416_v35 = vcvt.s32.f32 %v1414_v39  ;;  %v2046_v39 = vpop.eup %2045  ;;  %vm1759_vm14 = vcmp.eq.f32.partialorder %v3460_v24, inf  ;;  %vm1696_vm15 = vcmp.eq.f32.partialorder %v3468_v49, inf }
 0x795   :  { %v1542_v32 = vcvt.s32.f32 %v1540_v21 }
 0x797   :  { %v3691_v20 = vpop.xlane.xlu1 %1516  ;;  %v3693_v29 = vpop.xlane.xlu0 %1390 }
 0x798   :  { %vm1518_vm1 = vcmp.eq.f32.partialorder %v3560_v19, %v3691_v20  ;;  %vm1392_vm2 = vcmp.eq.f32.partialorder %v3562_v7, %v3693_v29 }
 0x799   :  { %v1519_v13 = vsel %vm1518_vm1, %v1514_v40, inf  ;;  %v1393_v43 = vsel %vm1392_vm2, %v1388_v52, inf  ;;  %vm1761_vm1 = vcmp.eq.f32.partialorder %v3460_v24, 0.0  ;;  %vm1717_vm2 = vcmp.eq.f32.partialorder %v3479_v11, inf }
 0x79a   :  { %1520 = vmin.xlane.f32.xlu1 %v1519_v13  ;;  %1394 = vmin.xlane.f32.xlu0 %v1393_v43 }
 0x79c   :  { %v3701_v60 = vpop.xlane.xlu1 %1432  ;;  %v3703_v51 = vpop.xlane.xlu0 %1502 }
 0x79d   :  { %vm1434_vm3 = vcmp.eq.f32.partialorder %v3588_v48, %v3701_v60  ;;  %vm1504_vm4 = vcmp.eq.f32.partialorder %v3590_v1, %v3703_v51  ;;  %v1456_v48 = vand.u32 65535, %v3609_v37 }
 0x79e   :  { %v1435_v19 = vsel %vm1434_vm3, %v1430_v56, inf  ;;  %v1505_v3 = vsel %vm1504_vm4, %v1500_v50, inf  ;;  %vm1698_vm3 = vcmp.eq.f32.partialorder %v3468_v49, 0.0  ;;  %vm1752_vm4 = vcmp.eq.f32.partialorder %v3494_v57, inf }
 0x79f   :  { %1436 = vmin.xlane.f32.xlu1 %v1435_v19  ;;  %1506 = vmin.xlane.f32.xlu0 %v1505_v3  ;;  %v1458_v52 = vcvt.s32.f32 %v1456_v48  ;;  %v4280_v19 = vld [vmem:[#allocation39_spill] sm:$0xff]  ;;  %v4282_v48 = vld [vmem:[#allocation40_spill] sm:$0xff] }
 0x7a0   :  { %v3711_v7 = vpop.xlane.xlu1 %1544  ;;  %v573_v3 = vmul.f32 %v4280_v19, %v4280_v19 }
 0x7a1   :  { %vm1546_vm5 = vcmp.eq.f32.partialorder %v3613_v34, %v3711_v7  ;;  %v3715_v55 = vpop.xlane.xlu0 %1418  ;;  %v1442_v34 = vand.u32 65535, %v3636_v31 }
 0x7a2   :  { %vm1420_vm6 = vcmp.eq.f32.partialorder %v3620_v6, %v3715_v55  ;;  %v1547_v1 = vsel %vm1546_vm5, %v1542_v32, inf  ;;  %v1528_v6 = vcvt.s32.f32 %v1526_v30  ;;  %v4281_v32 = vld [vmem:[#allocation67_spill] sm:$0xff]  ;;  %vm1773_vm5 = vcmp.eq.f32.partialorder %v3511_v45, inf }
 0x7a3   :  { %1548 = vmin.xlane.f32.xlu1 %v1547_v1  ;;  %v1421_v33 = vsel %vm1420_vm6, %v1416_v35, inf  ;;  %v1444_v46 = vcvt.s32.f32 %v1442_v34  ;;  %v1277_v35 = vmul.f32 %v4281_v32, %v4281_v32  ;;  %v572_v1 = vmul.f32 %v4282_v48, %v4282_v48 }
 0x7a4   :  { %1422 = vmin.xlane.f32.xlu0 %v1421_v33  ;;  %v3722_v40 = vpop.xlane.xlu1 %1460  ;;  %v4283_v33 = vld [vmem:[#allocation69_spill] sm:$0xff]  ;;  %v1755_v32 = vand.u32 2147483648, %v3494_v57  ;;  %vm1710_vm6 = vcmp.eq.f32.partialorder %v3536_v54, inf }
 0x7a5   :  { %vm1462_vm7 = vcmp.eq.f32.partialorder %v3640_v4, %v3722_v40  ;;  %v3727_v37 = vpop.xlane.xlu0 %1530  ;;  %v1554_v4 = vand.u32 65535, %v3651_v27  ;;  %v1276_v30 = vmul.f32 %v4283_v33, %v4283_v33 }
 0x7a6   :  { %v1463_v13 = vsel %vm1462_vm7, %v1458_v52, inf  ;;  %vm1532_vm8 = vcmp.eq.f32.partialorder %v3646_v36, %v3727_v37  ;;  %v2048_v52 = vpop.eup %2047  ;;  %vm1731_vm7 = vcmp.eq.f32.partialorder %v3543_v14, inf }
 0x7a7   :  { %1464 = vmin.xlane.f32.xlu1 %v1463_v13  ;;  %v1533_v9 = vsel %vm1532_vm8, %v1528_v6, inf  ;;  %v1556_v50 = vcvt.s32.f32 %v1554_v4  ;;  %v1702_v13 = vmul.f32 %v2046_v39, %v3441_v17  ;;  %v2050_v6 = vpop.eup %2049  ;;  %v1720_v39 = vand.u32 2147483648, %v3479_v11 }
 0x7a8   :  { %v3731_v43 = vpop.xlane.xlu1 %1572  ;;  %1534 = vmin.xlane.f32.xlu0 %v1533_v9  ;;  %vm1719_vm8 = vcmp.eq.f32.partialorder %v3479_v11, 0.0 }
 0x7a9   :  { %vm1574_vm9 = vcmp.eq.f32.partialorder %v3653_v62, %v3731_v43  ;;  %v3736_v18 = vpop.xlane.xlu0 %1446  ;;  %v4278_v62 = vld [vmem:[#allocation52_spill] sm:$0xff] }
 0x7aa   :  { %v1575_v31 = vsel %vm1574_vm9, %v1570_v8, inf  ;;  %vm1448_vm10 = vcmp.eq.f32.partialorder %v3658_v25, %v3736_v18  ;;  %v925_v27 = vmul.f32 %v4278_v62, %v4278_v62  ;;  %v4279_v25 = vld [vmem:[#allocation54_spill] sm:$0xff]  ;;  %v2052_v8 = vpop.eup %2051  ;;  %v1699_v62 = vand.u32 2147483648, %v3468_v49 }
 0x7ab   :  { %1576 = vmin.xlane.f32.xlu1 %v1575_v31  ;;  %v1449_v36 = vsel %vm1448_vm10, %v1444_v46, inf  ;;  %v2054_v31 = vpop.eup %2053  ;;  %v1706_v46 = vand.u32 2147483648, %v3441_v17  ;;  %v1716_v19 = vmul.f32 %v2052_v8, %v3479_v11  ;;  %vm1766_vm9 = vcmp.eq.f32.partialorder %v3568_v61, inf }
 0x7ac   :  { %1450 = vmin.xlane.f32.xlu0 %v1449_v36  ;;  %v941_v2 = vadd.f32 %v925_v27, %v573_v3  ;;  %v1762_v36 = vand.u32 2147483648, %v3460_v24  ;;  %v1629_v27 = vmul.f32 %v3604_v26, %v3604_v26  ;;  %v1751_v3 = vmul.f32 %v2054_v31, %v3494_v57 }
 0x7ad   :  { %v3740_v56 = vpop.xlane.xlu0 %1558  ;;  %vm1754_vm10 = vcmp.eq.f32.partialorder %v3494_v57, 0.0 }
 0x7ae   :  { %vm1560_vm11 = vcmp.eq.f32.partialorder %v3661_v63, %v3740_v56  ;;  %v924_v63 = vmul.f32 %v4279_v25, %v4279_v25  ;;  %v1293_v9 = vadd.f32 %v1277_v35, %v941_v2  ;;  %v2056_v25 = vpop.eup %2055  ;;  %v1776_v35 = vand.u32 2147483648, %v3511_v45 }
 0x7af   :  { %v1561_v21 = vsel %vm1560_vm11, %v1556_v50, inf  ;;  %v1704_v50 = vsel %vm1703_vm12, %v3441_v17, %v1702_v13  ;;  %v2058_v26 = vpop.eup %2057  ;;  %v1713_v17 = vand.u32 2147483648, %v3536_v54  ;;  %v1718_v13 = vsel %vm1717_vm2, %v3479_v11, %v1716_v19 }
 0x7b0   :  { %1562 = vmin.xlane.f32.xlu0 %v1561_v21  ;;  %v940_v34 = vadd.f32 %v924_v63, %v572_v1  ;;  %v1758_v21 = vmul.f32 %v2048_v52, %v3460_v24  ;;  %v1695_v63 = vmul.f32 %v2050_v6, %v3468_v49  ;;  %v1707_v48 = vsel %vm1705_vm13, %v1706_v46, %v1704_v50  ;;  %v2060_v1 = vpop.eup %2059 }
 0x7b1   :  { %v3800_v2 = vadd.f32 %v1629_v27, %v1293_v9  ;;  %v1753_v6 = vsel %vm1752_vm4, %v3494_v57, %v1751_v3  ;;  %v1734_v9 = vand.u32 2147483648, %v3543_v14  ;;  %v1807_v8 = vmax.f32 %v1707_v48, 1e-12 }
 0x7b2   :  { %v3766_v4 = vadd.f32 %v1276_v30, %v940_v34  ;;  %v1760_v33 = vsel %vm1759_vm14, %v3460_v24, %v1758_v21  ;;  %v1772_v30 = vmul.f32 %v2056_v25, %v3511_v45  ;;  %v1697_v52 = vsel %vm1696_vm15, %v3468_v49, %v1695_v63  ;;  %v2062_v34 = vpop.eup %2061 }
 0x7b3   :  { %v1709_v31 = vmul.f32 %v2058_v26, %v3536_v54  ;;  %v1730_v46 = vmul.f32 %v2060_v1, %v3543_v14  ;;  %v1769_v50 = vand.u32 2147483648, %v3568_v61  ;;  %v2064_v21 = vpop.eup %2063  ;;  %vm1787_vm11 = vcmp.eq.f32.partialorder %v3575_v38, inf }
 0x7b4   :  { %v3824_v27 = vsel %vm1773_vm5, %v3511_v45, %v1772_v30  ;;  %2071 = vrsqrt.f32 %v3800_v2  ;;  %v1383_v25 = vcvt.f32.s32 %v3665_v10  ;;  %v1765_v63 = vmul.f32 %v2062_v34, %v3568_v61  ;;  %v2066_v1 = vpop.eup %2065 }
 0x7b5   :  { %2073 = vrsqrt.f32 %v3643_v59  ;;  %v1628_v19 = vmul.f32 %v3638_v44, %v3638_v44  ;;  %v1763_v3 = vsel %vm1761_vm1, %v1762_v36, %v1760_v33  ;;  %v1790_v26 = vand.u32 2147483648, %v3575_v38  ;;  %v2068_v30 = vpop.eup %2067 }
 0x7b6   :  { %vm1724_vm12 = vcmp.eq.f32.partialorder %v3586_v28, inf  ;;  %2075 = vrcp.f32 %v1807_v8  ;;  %v3841_v10 = vsel %vm1710_vm6, %v3536_v54, %v1709_v31  ;;  %v3846_v44 = vsel %vm1731_vm7, %v3543_v14, %v1730_v46  ;;  %v2070_v49 = vpop.eup %2069 }
 0x7b7   :  { %v1786_v24 = vmul.f32 %v2064_v21, %v3575_v38  ;;  %v1700_v33 = vsel %vm1698_vm3, %v1699_v62, %v1697_v52  ;;  %vm1745_vm13 = vcmp.eq.f32.partialorder %v3601_v12, inf  ;;  %v1384_v34 = vshll.u32 %v1383_v25, 16 }
 0x7b8   :  { %v1815_v48 = vmax.f32 %v1763_v3, 1e-12  ;;  %v3855_v31 = vsel %vm1766_vm9, %v3568_v61, %v1765_v63  ;;  %vm1780_vm14 = vcmp.eq.f32.partialorder %v3625_v5, inf  ;;  %v3860_v21 = vadd.f32 %v1628_v19, %v3766_v4 }
 0x7b9   :  { %vm1775_vm15 = vcmp.eq.f32.partialorder %v3511_v45, 0.0  ;;  %v1783_v62 = vand.u32 2147483648, %v3625_v5  ;;  %v1495_v52 = vcvt.f32.s32 %v3671_v47  ;;  %v1806_v3 = vmax.f32 %v1700_v33, 1e-12 }
 0x7ba   :  { %vm1712_vm1 = vcmp.eq.f32.partialorder %v3536_v54, 0.0  ;;  %v3869_v63 = vsel %vm1787_vm11, %v3575_v38, %v1786_v24  ;;  %v1744_v4 = vmul.f32 %v2068_v30, %v3601_v12  ;;  %v1804_v19 = vand.u32 2147483648, %v3800_v2 }
 0x7bb   :  { %v1369_v46 = vcvt.f32.s32 %v3675_v42  ;;  %2077 = vrcp.f32 %v1815_v48  ;;  %v1721_v47 = vsel %vm1719_vm8, %v1720_v39, %v1718_v13  ;;  %v1779_v33 = vmul.f32 %v2070_v49, %v3625_v5  ;;  %v4284_v49 = vld [vmem:[#allocation11_spill] sm:$0xff] }
 0x7bc   :  { %2079 = vrsqrt.f32 %v3860_v21  ;;  %v1756_v42 = vsel %vm1754_vm10, %v1755_v32, %v1753_v6  ;;  %vm1733_vm3 = vcmp.eq.f32.partialorder %v3543_v14, 0.0  ;;  %vm1801_vm4 = vcmp.eq.f32.partialorder %v3800_v2, inf }
 0x7bd   :  { %v1496_v48 = vshll.u32 %v1495_v52, 16  ;;  %2081 = vrcp.f32 %v1806_v3  ;;  %v3897_v57 = vsel %vm1745_vm13, %v3601_v12, %v1744_v4  ;;  %v1809_v6 = vmax.f32 %v1721_v47, 1e-12 }
 0x7be   :  { %v2072_v30 = vpop.eup %2071  ;;  %vm1768_vm7 = vcmp.eq.f32.partialorder %v3568_v61, 0.0  ;;  %vm1738_vm8 = vcmp.eq.f32.partialorder %v3643_v59, inf  ;;  %v1481_v4 = vcvt.f32.s32 %v3683_v15  ;;  %v3910_v47 = vsel %vm1780_vm14, %v3625_v5, %v1779_v33 }
 0x7bf   :  { %v2074_v39 = vpop.eup %2073  ;;  %v1797_v32 = vand.u32 2147483648, %v3860_v21  ;;  %vm1789_vm10 = vcmp.eq.f32.partialorder %v3575_v38, 0.0  ;;  %v1777_v33 = vsel %vm1775_vm15, %v1776_v35, %v3824_v27  ;;  %2083 = vrcp.f32 %v1809_v6 }
 0x7c0   :  { %vm1726_vm13 = vcmp.eq.f32.partialorder %v3586_v28, 0.0  ;;  %vm1747_vm14 = vcmp.eq.f32.partialorder %v3601_v12, 0.0  ;;  %v1770_v14 = vsel %vm1768_vm7, %v1769_v50, %v3855_v31  ;;  %vm1803_vm7 = vcmp.eq.f32.partialorder %v3800_v2, 0.0 }
 0x7c1   :  { %v4288_v38 = vand.u32 2147483648, %v3586_v28 }
 0x818   :  { %v1381_v36 = vpop.xlane.xlu1 %1380 }
 0x819   :  { %v1382_v8 = vcvt.f32.s32 %v1381_v36  ;;  %v1723_v36 = vmul.f32 %v2066_v1, %v3586_v28 }
 0x81b   :  { %v1385_v25 = vadd.s32 %v1384_v34, %v1382_v8  ;;  %v2076_v34 = vpop.eup %2075  ;;  %v1370_v8 = vshll.u32 %v1369_v46, 16 }
 0x81c   :  { %v1493_v24 = vpop.xlane.xlu1 %1492  ;;  %v1367_v13 = vpop.xlane.xlu0 %1366 }
 0x81d   :  { %vm1583_vm2 = vcmp.eq.s32.totalorder %v2231_v41, %v1385_v25  ;;  %v1494_v11 = vcvt.f32.s32 %v1493_v24  ;;  %v1368_v3 = vcvt.f32.s32 %v1367_v13  ;;  %v1814_v24 = vmax.f32 %v1756_v42, 1e-12 }
 0x81e   :  { %v1599_v1 = vsel %vm1583_vm2, -inf, %v3329_v22  ;;  %v3892_v22 = vsel %vm1724_vm12, %v3586_v28, %v1723_v36  ;;  %v1411_v36 = vcvt.f32.s32 %v3681_v53  ;;  %v1737_v53 = vmul.f32 %v2074_v39, %v3643_v59  ;;  %v4285_v39 = vld [vmem:[#allocation12_spill] sm:$0xff] }
 0x81f   :  { %vm1647_vm5 = vcmp.eq.f32.partialorder %v1599_v1, -inf  ;;  %v1497_v25 = vadd.s32 %v1496_v48, %v1494_v11  ;;  %v1371_v46 = vadd.s32 %v1370_v8, %v1368_v3  ;;  %v1800_v48 = vmul.f32 %v2072_v30, %v3800_v2  ;;  %v2078_v11 = vpop.eup %2077 }
 0x820   :  { %vm1663_vm6 = vmand %vm1647_vm5, %vm219_vm0  ;;  %v1714_v42 = vsel %vm1712_vm1, %v1713_v17, %v3841_v10  ;;  %v1482_v30 = vshll.u32 %v1481_v4, 16  ;;  %2085 = vrcp.f32 %v1814_v24  ;;  %v2080_v10 = vpop.eup %2079  ;;  %v1735_v8 = vsel %vm1733_vm3, %v1734_v9, %v3846_v44 }
 0x821   :  { %v1679_v52 = vsel %vm1663_vm6, %v4284_v49, 0.0  ;;  %vm1591_vm9 = vcmp.eq.s32.totalorder %v2231_v41, %v1497_v25  ;;  %vm1582_vm12 = vcmp.eq.s32.totalorder %v2231_v41, %v1371_v46  ;;  %v1409_v35 = vpop.xlane.xlu1 %1408  ;;  %v1479_v27 = vpop.xlane.xlu0 %1478  ;;  %v3938_v6 = vsel %vm1801_vm4, %v3800_v2, %v1800_v48 }
 0x822   :  { %v1855_v1 = vmul.f32 %v2076_v34, %v1679_v52  ;;  %v1607_v15 = vsel %vm1591_vm9, -inf, %v3337_v16  ;;  %v1412_v16 = vshll.u32 %v1411_v36, 16  ;;  %v1598_v45 = vsel %vm1582_vm12, -inf, %v3340_v0  ;;  %v2082_v49 = vpop.eup %2081  ;;  %v4286_v52 = vld [vmem:[#allocation13_spill] sm:$0xff] }
 0x823   :  { %vm1655_vm11 = vcmp.eq.f32.partialorder %v1607_v15, -inf  ;;  %vm1646_vm15 = vcmp.eq.f32.partialorder %v1598_v45, -inf  ;;  %v1410_v54 = vcvt.f32.s32 %v1409_v35  ;;  %v1480_v17 = vcvt.f32.s32 %v1479_v27 }
 0x824   :  { %1871 = vst [vmem:[#allocation7 + $0x8] sm:$0xff] %v1855_v1  ;;  %vm1671_vm2 = vmand %vm1655_vm11, %vm219_vm0  ;;  %v1817_v0 = vmax.f32 %v1777_v33, 1e-12  ;;  %vm1794_vm5 = vcmp.eq.f32.partialorder %v3860_v21, inf  ;;  %v1808_v4 = vmax.f32 %v1714_v42, 1e-12  ;;  %v1523_v1 = vcvt.f32.s32 %v3691_v20  ;;  %v2084_v33 = vpop.eup %2083 }
 0x825   :  { %v1687_v13 = vsel %vm1671_vm2, %v4285_v39, 0.0  ;;  %vm1662_vm1 = vmand %vm1646_vm15, %vm219_vm0  ;;  %v1413_v3 = vadd.s32 %v1412_v16, %v1410_v54  ;;  %v1483_v36 = vadd.s32 %v1482_v30, %v1480_v17  ;;  %v1397_v24 = vcvt.f32.s32 %v3693_v29  ;;  %v4287_v42 = vld [vmem:[#allocation15_spill] sm:$0xff] }
 0x826   :  { %v1863_v34 = vmul.f32 %v2078_v11, %v1687_v13  ;;  %v1678_v25 = vsel %vm1662_vm1, %v4286_v52, 0.0  ;;  %vm1782_vm3 = vcmp.eq.f32.partialorder %v3625_v5, 0.0  ;;  %v3960_v9 = vsel %vm1738_vm8, %v3643_v59, %v1737_v53  ;;  %v4290_v11 = vld [vmem:[#allocation14_spill] sm:$0xff] }
 0x827   :  { %v1854_v46 = vmul.f32 %v2082_v49, %v1678_v25  ;;  %vm1585_vm4 = vcmp.eq.s32.totalorder %v2231_v41, %v1413_v3  ;;  %vm1590_vm6 = vcmp.eq.s32.totalorder %v2231_v41, %v1483_v36  ;;  %v1811_v20 = vmax.f32 %v1735_v8, 1e-12  ;;  %v1521_v50 = vpop.xlane.xlu1 %1520  ;;  %v1395_v31 = vpop.xlane.xlu0 %1394  ;;  %v4292_v8 = vld [vmem:[#allocation71_spill] sm:$0xff] }
 0x828   :  { %1879 = vst [vmem:[#allocation7 + $0x48] sm:$0xff] %v1863_v34  ;;  %v1793_v29 = vmul.f32 %v2080_v10, %v3860_v21  ;;  %v1601_v44 = vsel %vm1585_vm4, -inf, %v3349_v23  ;;  %v1606_v61 = vsel %vm1590_vm6, -inf, %v3352_v58  ;;  %2087 = vrcp.f32 %v1817_v0 }
 0x829   :  { %1870 = vst [vmem:[#allocation7] sm:$0xff] %v1854_v46  ;;  %vm1649_vm9 = vcmp.eq.f32.partialorder %v1601_v44, -inf  ;;  %vm1654_vm11 = vcmp.eq.f32.partialorder %v1606_v61, -inf  ;;  %2089 = vrcp.f32 %v1808_v4  ;;  %v1791_v48 = vsel %vm1789_vm10, %v1790_v26, %v3869_v63  ;;  %v4294_v44 = vld [vmem:[#allocation17_spill] sm:$0xff] }
 0x82a   :  { %v1524_v53 = vshll.u32 %v1523_v1, 16  ;;  %v1398_v15 = vshll.u32 %v1397_v24, 16  ;;  %vm1665_vm8 = vmand %vm1649_vm9, %vm219_vm0  ;;  %v1522_v23 = vcvt.f32.s32 %v1521_v50  ;;  %v1396_v58 = vcvt.f32.s32 %v1395_v31  ;;  %v2086_v35 = vpop.eup %2085 }
 0x82b   :  { %vm1740_vm12 = vcmp.eq.f32.partialorder %v3643_v59, 0.0  ;;  %v1681_v16 = vsel %vm1665_vm8, %v4287_v42, 0.0  ;;  %vm1670_vm2 = vmand %vm1654_vm11, %vm219_vm0  ;;  %v1816_v30 = vmax.f32 %v1770_v14, 1e-12  ;;  %v1728_v26 = vsel %vm1726_vm13, %v4288_v38, %v3892_v22 }
 0x82c   :  { %v4289_v63 = vand.u32 2147483648, %v3601_v12  ;;  %v1857_v27 = vmul.f32 %v2084_v33, %v1681_v16  ;;  %v1686_v39 = vsel %vm1670_vm2, %v4290_v11, 0.0  ;;  %v1525_v13 = vadd.s32 %v1524_v53, %v1522_v23  ;;  %v1437_v49 = vpop.xlane.xlu1 %1436  ;;  %v1507_v52 = vpop.xlane.xlu0 %1506 }
 0x82d   :  { %v1399_v54 = vadd.s32 %v1398_v15, %v1396_v58  ;;  %v1439_v17 = vcvt.f32.s32 %v3701_v60  ;;  %v1509_v10 = vcvt.f32.s32 %v3703_v51  ;;  %v1862_v34 = vmul.f32 %v2086_v35, %v1686_v39  ;;  %v4296_v15 = vld [vmem:[#allocation72_spill] sm:$0xff]  ;;  %v4297_v58 = vld [vmem:[#allocation73_spill] sm:$0xff] }
 0x82e   :  { %v3989_v45 = vsel %vm1747_vm14, %v4289_v63, %v3897_v57  ;;  %v1819_v28 = vmax.f32 %v1791_v48, 1e-12  ;;  %v3997_v22 = vsel %vm1794_vm5, %v3860_v21, %v1793_v29  ;;  %1873 = vst [vmem:[#allocation7 + $0x18] sm:$0xff] %v1857_v27  ;;  %vm1593_vm10 = vcmp.eq.s32.totalorder %v2231_v41, %v1525_v13  ;;  %v4291_v57 = vld [vmem:[#allocation70_spill] sm:$0xff] }
 0x82f   :  { %vm1584_vm13 = vcmp.eq.s32.totalorder %v2231_v41, %v1399_v54  ;;  %v1810_v12 = vmax.f32 %v1728_v26, 1e-12  ;;  %1878 = vst [vmem:[#allocation7 + $0x40] sm:$0xff] %v1862_v34  ;;  %v1609_v0 = vsel %vm1593_vm10, -inf, %v4291_v57  ;;  %2091 = vrcp.f32 %v1811_v20  ;;  %v4293_v20 = vld [vmem:[#allocation16_spill] sm:$0xff]  ;;  %v4299_v54 = vld [vmem:[#allocation18_spill] sm:$0xff] }
 0x830   :  { %v1600_v60 = vsel %vm1584_vm13, -inf, %v4292_v8  ;;  %v1813_v51 = vmax.f32 %v3989_v45, 1e-12  ;;  %vm1796_vm14 = vcmp.eq.f32.partialorder %v3860_v21, 0.0  ;;  %vm1657_vm15 = vcmp.eq.f32.partialorder %v1609_v0, -inf  ;;  %v1549_v2 = vpop.xlane.xlu1 %1548  ;;  %v4298_v45 = vld [vmem:[#allocation19_spill] sm:$0xff] }
 0x831   :  { %vm1648_vm1 = vcmp.eq.f32.partialorder %v1600_v60, -inf  ;;  %2093 = vrcp.f32 %v1816_v30  ;;  %v1784_v25 = vsel %vm1782_vm3, %v1783_v62, %v3910_v47  ;;  %v1440_v3 = vshll.u32 %v1439_v17, 16  ;;  %vm1673_vm5 = vmand %vm1657_vm15, %vm219_vm0  ;;  %v1423_v16 = vpop.xlane.xlu0 %1422  ;;  %v4301_v21 = vld [vmem:[#allocation75_spill] sm:$0xff] }
 0x832   :  { %v1510_v36 = vshll.u32 %v1509_v10, 16  ;;  %v1438_v4 = vcvt.f32.s32 %v1437_v49  ;;  %v1508_v1 = vcvt.f32.s32 %v1507_v52  ;;  %v2088_v24 = vpop.eup %2087  ;;  %v1551_v46 = vcvt.f32.s32 %v3711_v7  ;;  %vm1664_vm4 = vmand %vm1648_vm1, %vm219_vm0  ;;  %v4302_v49 = vld [vmem:[#allocation20_spill] sm:$0xff] }
 0x833   :  { %v1425_v14 = vcvt.f32.s32 %v3715_v55  ;;  %v1689_v29 = vsel %vm1673_vm5, %v4293_v20, 0.0  ;;  %v1805_v5 = vsel %vm1803_vm7, %v1804_v19, %v3938_v6  ;;  %v2090_v62 = vpop.eup %2089  ;;  %v1680_v61 = vsel %vm1664_vm4, %v4294_v44, 0.0 }
 0x834   :  { %v1865_v47 = vmul.f32 %v2088_v24, %v1689_v29  ;;  %v1441_v50 = vadd.s32 %v1440_v3, %v1438_v4  ;;  %v1511_v31 = vadd.s32 %v1510_v36, %v1508_v1  ;;  %v1856_v7 = vmul.f32 %v2090_v62, %v1680_v61  ;;  %v1465_v57 = vpop.xlane.xlu1 %1464  ;;  %v4303_v1 = vld [vmem:[#allocation21_spill] sm:$0xff] }
 0x835   :  { %2095 = vrcp.f32 %v1819_v28  ;;  %v1818_v55 = vmax.f32 %v1784_v25, 1e-12  ;;  %v4295_v48 = vand.u32 2147483648, %v3643_v59  ;;  %v1821_v19 = vmax.f32 %v1805_v5, 1e-12  ;;  %v4300_v28 = vld [vmem:[#allocation74_spill] sm:$0xff] }
 0x836   :  { %1881 = vst [vmem:[#allocation7 + $0x58] sm:$0xff] %v1865_v47  ;;  %vm1587_vm3 = vcmp.eq.s32.totalorder %v2231_v41, %v1441_v50  ;;  %vm1592_vm6 = vcmp.eq.s32.totalorder %v2231_v41, %v1511_v31  ;;  %2097 = vrcp.f32 %v1810_v12  ;;  %v1552_v6 = vshll.u32 %v1551_v46, 16  ;;  %1872 = vst [vmem:[#allocation7 + $0x10] sm:$0xff] %v1856_v7  ;;  %v4304_v47 = vld [vmem:[#allocation76_spill] sm:$0xff] }
 0x837   :  { %v1742_v53 = vsel %vm1740_vm12, %v4295_v48, %v3960_v9  ;;  %v1603_v23 = vsel %vm1587_vm3, -inf, %v4296_v15  ;;  %v1608_v33 = vsel %vm1592_vm6, -inf, %v4297_v58  ;;  %v1550_v42 = vcvt.f32.s32 %v1549_v2  ;;  %v4305_v48 = vld [vmem:[#allocation77_spill] sm:$0xff]  ;;  %v4306_v2 = vld [vmem:[#allocation23_spill] sm:$0xff] }
 0x838   :  { %v1426_v30 = vshll.u32 %v1425_v14, 16  ;;  %vm1651_vm7 = vcmp.eq.f32.partialorder %v1603_v23, -inf  ;;  %vm1656_vm9 = vcmp.eq.f32.partialorder %v1608_v33, -inf  ;;  %v1424_v59 = vcvt.f32.s32 %v1423_v16  ;;  %v1577_v46 = vpop.xlane.xlu1 %1576  ;;  %v4307_v23 = vld [vmem:[#allocation78_spill] sm:$0xff] }
 0x839   :  { %v1467_v9 = vcvt.f32.s32 %v3722_v40  ;;  %vm1667_vm11 = vmand %vm1651_vm7, %vm219_vm0  ;;  %v1553_v38 = vadd.s32 %v1552_v6, %v1550_v42  ;;  %2099 = vrcp.f32 %v1813_v51  ;;  %v1812_v26 = vmax.f32 %v1742_v53, 1e-12  ;;  %v2092_v63 = vpop.eup %2091  ;;  %v4308_v42 = vld [vmem:[#allocation22_spill] sm:$0xff] }
 0x83a   :  { %v1683_v35 = vsel %vm1667_vm11, %v4298_v45, 0.0  ;;  %vm1672_vm8 = vmand %vm1656_vm9, %vm219_vm0  ;;  %v1427_v27 = vadd.s32 %v1426_v30, %v1424_v59  ;;  %2101 = vrcp.f32 %v1818_v55  ;;  %v1798_v40 = vsel %vm1796_vm14, %v1797_v32, %v3997_v22 }
 0x83b   :  { %v2094_v11 = vpop.eup %2093  ;;  %v1537_v39 = vcvt.f32.s32 %v3727_v37  ;;  %v1859_v13 = vmul.f32 %v2092_v63, %v1683_v35  ;;  %v1688_v17 = vsel %vm1672_vm8, %v4299_v54, 0.0  ;;  %vm1595_vm12 = vcmp.eq.s32.totalorder %v2231_v41, %v1553_v38  ;;  %v4309_v38 = vld [vmem:[#allocation79_spill] sm:$0xff]  ;;  %v4310_v63 = vld [vmem:[#allocation24_spill] sm:$0xff] }
 0x83c   :  { %v1579_v10 = vcvt.f32.s32 %v3731_v43  ;;  %v1864_v34 = vmul.f32 %v2094_v11, %v1688_v17  ;;  %v1611_v12 = vsel %vm1595_vm12, -inf, %v4300_v28  ;;  %vm1586_vm2 = vcmp.eq.s32.totalorder %v2231_v41, %v1427_v27  ;;  %v1535_v43 = vpop.xlane.xlu0 %1534  ;;  %v4311_v11 = vld [vmem:[#allocation25_spill] sm:$0xff]  ;;  %v4312_v54 = vld [vmem:[#allocation80_spill] sm:$0xff] }
 0x83d   :  { %v1468_v0 = vshll.u32 %v1467_v9, 16  ;;  %1875 = vst [vmem:[#allocation7 + $0x28] sm:$0xff] %v1859_v13  ;;  %vm1659_vm10 = vcmp.eq.f32.partialorder %v1611_v12, -inf  ;;  %v1602_v32 = vsel %vm1586_vm2, -inf, %v4301_v21  ;;  %v1466_v22 = vcvt.f32.s32 %v1465_v57 }
 0x83e   :  { %v1453_v37 = vcvt.f32.s32 %v3736_v18  ;;  %1880 = vst [vmem:[#allocation7 + $0x50] sm:$0xff] %v1864_v34  ;;  %vm1675_vm13 = vmand %vm1659_vm10, %vm219_vm0  ;;  %vm1650_vm14 = vcmp.eq.f32.partialorder %v1602_v32, -inf  ;;  %2103 = vrcp.f32 %v1821_v19  ;;  %v1820_v8 = vmax.f32 %v1798_v40, 1e-12  ;;  %v4313_v34 = vld [vmem:[#allocation26_spill] sm:$0xff] }
 0x83f   :  { %v2096_v60 = vpop.eup %2095  ;;  %v1538_v51 = vshll.u32 %v1537_v39, 16  ;;  %v1691_v52 = vsel %vm1675_vm13, %v4302_v49, 0.0  ;;  %vm1666_vm15 = vmand %vm1650_vm14, %vm219_vm0  ;;  %v1469_v25 = vadd.s32 %v1468_v0, %v1466_v22  ;;  %v1536_v3 = vcvt.f32.s32 %v1535_v43 }
 0x840   :  { %v2098_v36 = vpop.eup %2097  ;;  %v1580_v4 = vshll.u32 %v1579_v10, 16  ;;  %v1867_v18 = vmul.f32 %v2096_v60, %v1691_v52  ;;  %v1682_v24 = vsel %vm1666_vm15, %v4303_v1, 0.0  ;;  %2105 = vrcp.f32 %v1812_v26  ;;  %v1451_v61 = vpop.xlane.xlu0 %1450 }
 0x841   :  { %v1858_v14 = vmul.f32 %v2098_v36, %v1682_v24  ;;  %vm1589_vm1 = vcmp.eq.s32.totalorder %v2231_v41, %v1469_v25  ;;  %v1539_v20 = vadd.s32 %v1538_v51, %v1536_v3  ;;  %v1578_v29 = vcvt.f32.s32 %v1577_v46 }
 0x842   :  { %v1454_v5 = vshll.u32 %v1453_v37, 16  ;;  %v1565_v62 = vcvt.f32.s32 %v3740_v56  ;;  %1883 = vst [vmem:[#allocation7 + $0x68] sm:$0xff] %v1867_v18  ;;  %v1605_v44 = vsel %vm1589_vm1, -inf, %v4304_v47  ;;  %v1452_v7 = vcvt.f32.s32 %v1451_v61 }
 0x843   :  { %v2100_v50 = vpop.eup %2099  ;;  %1874 = vst [vmem:[#allocation7 + $0x20] sm:$0xff] %v1858_v14  ;;  %vm1653_vm5 = vcmp.eq.f32.partialorder %v1605_v44, -inf  ;;  %vm1594_vm4 = vcmp.eq.s32.totalorder %v2231_v41, %v1539_v20  ;;  %v1581_v31 = vadd.s32 %v1580_v4, %v1578_v29  ;;  %2107 = vrcp.f32 %v1820_v8 }
 0x844   :  { %v2102_v55 = vpop.eup %2101  ;;  %vm1669_vm3 = vmand %vm1653_vm5, %vm219_vm0  ;;  %v1610_v53 = vsel %vm1594_vm4, -inf, %v4305_v48  ;;  %v1455_v19 = vadd.s32 %v1454_v5, %v1452_v7  ;;  %v1566_v6 = vshll.u32 %v1565_v62, 16  ;;  %v1563_v33 = vpop.xlane.xlu0 %1562 }
 0x845   :  { %v1685_v56 = vsel %vm1669_vm3, %v4306_v2, 0.0  ;;  %vm1658_vm6 = vcmp.eq.f32.partialorder %v1610_v53, -inf  ;;  %vm1597_vm7 = vcmp.eq.s32.totalorder %v2231_v41, %v1581_v31  ;;  %v1564_v30 = vcvt.f32.s32 %v1563_v33 }
 0x846   :  { %v1861_v15 = vmul.f32 %v2100_v50, %v1685_v56  ;;  %vm1674_vm9 = vmand %vm1658_vm6, %vm219_vm0  ;;  %v1613_v58 = vsel %vm1597_vm7, -inf, %v4307_v23  ;;  %vm1588_vm8 = vcmp.eq.s32.totalorder %v2231_v41, %v1455_v19 }
 0x847   :  { %v1690_v16 = vsel %vm1674_vm9, %v4308_v42, 0.0  ;;  %vm1661_vm11 = vcmp.eq.f32.partialorder %v1613_v58, -inf  ;;  %v1604_v26 = vsel %vm1588_vm8, -inf, %v4309_v38  ;;  %v1567_v35 = vadd.s32 %v1566_v6, %v1564_v30 }
 0x848   :  { %v2104_v59 = vpop.eup %2103  ;;  %1877 = vst [vmem:[#allocation7 + $0x38] sm:$0xff] %v1861_v15  ;;  %v1866_v9 = vmul.f32 %v2102_v55, %v1690_v16  ;;  %vm1677_vm12 = vmand %vm1661_vm11, %vm219_vm0  ;;  %vm1652_vm2 = vcmp.eq.f32.partialorder %v1604_v26, -inf }
 0x849   :  { %v1693_v45 = vsel %vm1677_vm12, %v4310_v63, 0.0  ;;  %vm1668_vm10 = vmand %vm1652_vm2, %vm219_vm0  ;;  %vm1596_vm13 = vcmp.eq.s32.totalorder %v2231_v41, %v1567_v35 }
 0x84a   :  { %v2106_v27 = vpop.eup %2105  ;;  %1882 = vst [vmem:[#allocation7 + $0x60] sm:$0xff] %v1866_v9  ;;  %v1869_v40 = vmul.f32 %v2104_v59, %v1693_v45  ;;  %v1684_v39 = vsel %vm1668_vm10, %v4311_v11, 0.0  ;;  %v1612_v17 = vsel %vm1596_vm13, -inf, %v4312_v54 }
 0x84b   :  { %v1860_v13 = vmul.f32 %v2106_v27, %v1684_v39  ;;  %vm1660_vm14 = vcmp.eq.f32.partialorder %v1612_v17, -inf }
 0x84c   :  { %1885 = vst [vmem:[#allocation7 + $0x78] sm:$0xff] %v1869_v40  ;;  %vm1676_vm15 = vmand %vm1660_vm14, %vm219_vm0 }
 0x84d   :  { %v2108_v10 = vpop.eup %2107  ;;  %1876 = vst [vmem:[#allocation7 + $0x30] sm:$0xff] %v1860_v13  ;;  %v1692_v28 = vsel %vm1676_vm15, %v4313_v34, 0.0 }
 0x84e   :  { %v1868_v12 = vmul.f32 %v2108_v10, %v1692_v28 }
 0x850   :  { %1884 = vst [vmem:[#allocation7 + $0x70] sm:$0xff] %v1868_v12 }
 0x851   :  { %2164 = shalt.err (!%p2161_p6)
}
 0x852   :  { %s2165_s10 = scalar_lea.hbm %s4100_s2, 2048 }
 0x853   :  { %p2166_p7 = scmp.ne.s32.totalorder %s4100_s2, %s2165_s10  ;;  %p2169_p8 = scmp.lt.u32.totalorder %s2165_s10, %s4100_s2 }
 0x855   :  { %p2171_p9 = pnand %p2169_p8, %p2166_p7 }
 0x857   :  { %2174 = shalt.err (!%p2171_p9)
}
 0x858   :  { %1897 = dma.vmem_to_hbm [thread:$0]  %s1892_s6, 2048, %s4100_s2, [#allocation4], %s2182_s19, %s2182_s19, %s2183_s20  }
 0x859   :  { %2179 = dma.done.wait [#allocation4], 2048  }
 0x85a   :  { %2180 = vsyncadd [#allocation4], 4294965248 }
 0x85b   :  { %1901 = vsyncpa [#allocation3], 1 }
 0x85c   :  { %1902 = vsyncpa [#allocation6], 1 }
 0x85d   :  { %1903 = vsyncpa [#allocation4], 1 }

</bundles_post_ra>
